<compile_context>
chip_gen: v6e
topology: v6e:2x2x1
jax: 0.10.0
libtpu: 0.0.40
codegen_flags: <defaults>
</compile_context>

<pallas_src>
import numpy as np
import jax
import jax.numpy as jnp
from jax.experimental import pallas as pl
from jax.experimental.pallas import tpu as pltpu


N_BATCH = 2                # batch size baked into the fused kernel's flat layout
NB = N_BATCH * 64          # flat spatial extent of one phase plane: lane = n*64 + u*8 + v
PADF = NB + 128            # padded flat extent (head-room for shifted in-kernel slices)

# shift groups (units of 8 lanes per pooled row, 1 lane per pooled col)
_S1_SHIFTS = tuple((sh, sv) for sh in range(2) for sv in range(2))   # conv1+pool1 stage
_S2_SHIFTS = tuple((sh, sv) for sh in range(3) for sv in range(3))   # conv2+pool2 stage


# ------------------------------ fused Pallas kernel ------------------------------

def _lenet_kernel(x4_ref, w1_ref, b1_ref, w2_ref, b2_ref,
                  wf1_ref, bf1_ref, wf2_ref, bf2_ref, wf3_ref, bf3_ref,
                  out_ref, p1_ref):
    f32 = jnp.float32

    # --- stage 1: conv1 (5x5, 3->6) + ReLU + 2x2 max-pool ----------------------
    # x4_ref : (48, PADF)   rows = (dh*4+dw)*3 + ci   (4x4 space-to-depth planes)
    # w1_ref : (4, 96, 48)  folded conv1 weights, one matrix per shift group
    # y1 rows = combo*6 + co, combo = (rho_h*2+rho_w)*4 + (a*2+b)
    x4 = x4_ref[...]
    y1 = jnp.zeros((96, NB), f32)
    for s_idx, (sh, sv) in enumerate(_S1_SHIFTS):
        off = sh * 8 + sv
        y1 = y1 + jnp.dot(w1_ref[s_idx], x4[:, off:off + NB],
                          preferred_element_type=f32)

    # max over the 4 pool-window offsets (a, b), + bias + ReLU.  The four parity
    # classes (rho) of the pooled 14x14 grid become rows of p1_ref, which is
    # exactly the layout conv2 consumes.  Pad lanes stay zero (finite garbage).
    p1_ref[...] = jnp.zeros((24, PADF), f32)
    for rho in range(4):
        m = y1[rho * 24:rho * 24 + 6, :]
        for ab in range(1, 4):
            m = jnp.maximum(m, y1[rho * 24 + ab * 6:rho * 24 + (ab + 1) * 6, :])
        p1_ref[rho * 6:(rho + 1) * 6, 0:NB] = jnp.maximum(m + b1_ref[...], 0.0)

    # --- stage 2: conv2 (5x5, 6->16) + ReLU + 2x2 max-pool ---------------------
    # p1_ref : (24, PADF)   rows = rho*6 + ci
    # w2_ref : (9, 64, 24)  folded conv2 weights, one matrix per shift group
    p1 = p1_ref[...]
    y2 = jnp.zeros((64, NB), f32)
    for s_idx, (sh, sv) in enumerate(_S2_SHIFTS):
        off = sh * 8 + sv
        y2 = y2 + jnp.dot(w2_ref[s_idx], p1[:, off:off + NB],
                          preferred_element_type=f32)
    m2 = y2[0:16, :]
    for ab in range(1, 4):
        m2 = jnp.maximum(m2, y2[ab * 16:(ab + 1) * 16, :])
    pool2 = jnp.maximum(m2 + b2_ref[...], 0.0)        # (16, NB); lane = n*64 + p*8 + q

    # --- fused FC head: 400 -> 120 -> 84 -> 10 ---------------------------------
    # fc1 weight is pre-laid onto the kernel's (16, 8, 8) pool2 frame with zeros at
    # the invalid frame positions, so no flatten / gather of pool2 is needed.
    acc = jnp.zeros((N_BATCH, 120), f32)
    for c in range(16):
        blk = jnp.concatenate(
            [pool2[c:c + 1, n * 64:(n + 1) * 64] for n in range(N_BATCH)], axis=0)
        acc = acc + jnp.dot(blk, wf1_ref[c * 64:(c + 1) * 64, :],
                            preferred_element_type=f32)
    h1 = jnp.maximum(acc + bf1_ref[...], 0.0)                              # (N, 120)
    h2 = jnp.maximum(
        jnp.dot(h1, wf2_ref[...], preferred_element_type=f32) + bf2_ref[...], 0.0)
    out_ref[...] = (jnp.dot(h2, wf3_ref[...], preferred_element_type=f32)
                    + bf3_ref[...])


def _lenet_pallas_call(x4, p):
    return pl.pallas_call(
        _lenet_kernel,
        out_shape=jax.ShapeDtypeStruct((N_BATCH, 10), jnp.float32),
        in_specs=[pl.BlockSpec(memory_space=pltpu.MemorySpace.VMEM)] * 11,
        out_specs=pl.BlockSpec(memory_space=pltpu.MemorySpace.VMEM),
        scratch_shapes=[pltpu.VMEM((24, PADF), jnp.float32)],
    )(x4, p["w1s"], p["b1"], p["w2s"], p["b2"],
      p["wf1"], p["bf1"], p["wf2"], p["bf2"], p["wf3"], p["bf3"])


# --------------------------------- forward pass ----------------------------------

def net_forward(prep, x_nchw):
    """Forward pass matching torch Net.forward; x_nchw: (N_BATCH, 3, 32, 32)."""
    assert x_nchw.shape == (N_BATCH, 3, 32, 32)
    x = x_nchw.astype(jnp.float32)
    # 4x4 space-to-depth, channel-major, flat lane = n*64 + u*8 + v.  This is the
    # only per-call XLA glue (a few tiny ops on the 24 KB input); everything else
    # runs inside the single fused kernel.
    planes = []
    for dh in range(4):
        for dw in range(4):
            c = x[:, :, dh::4, dw::4]                               # (N, 3, 8, 8)
            planes.append(jnp.transpose(c, (1, 0, 2, 3)).reshape(3, N_BATCH * 64))
    x4 = jnp.concatenate(planes, axis=0)                            # (48, NB)
    x4 = jnp.pad(x4, ((0, 0), (0, PADF - NB)))                      # (48, PADF)
    return _lenet_pallas_call(x4, prep)


# ------------------------- parameters & one-time re-layout ------------------------

def init_params(key):
    """Deterministic init mimicking torch's default U(-1/sqrt(fan_in), 1/sqrt(fan_in))."""
    ks = jax.random.split(key, 10)

    def u(k, shape, fan_in):
        bound = 1.0 / (fan_in ** 0.5)
        return jax.random.uniform(k, shape, jnp.float32, -bound, bound)

    return {
        "conv1_w": u(ks[0], (6, 3, 5, 5), 3 * 5 * 5),
        "conv1_b": u(ks[1], (6,), 3 * 5 * 5),
        "conv2_w": u(ks[2], (16, 6, 5, 5), 6 * 5 * 5),
        "conv2_b": u(ks[3], (16,), 6 * 5 * 5),
        "fc1_w":   u(ks[4], (120, 400), 400),
        "fc1_b":   u(ks[5], (120,), 400),
        "fc2_w":   u(ks[6], (84, 120), 120),
        "fc2_b":   u(ks[7], (84,), 120),
        "fc3_w":   u(ks[8], (10, 84), 84),
        "fc3_b":   u(ks[9], (10,), 84),
    }


def prepare_params(params):
    """One-time (hoisted) re-layout of torch-layout parameters into kernel layout."""
    w1 = np.asarray(params["conv1_w"], np.float32)     # (6, 3, 5, 5)
    w2 = np.asarray(params["conv2_w"], np.float32)     # (16, 6, 5, 5)
    f1w = np.asarray(params["fc1_w"], np.float32)      # (120, 400)
    f2w = np.asarray(params["fc2_w"], np.float32)      # (84, 120)
    f3w = np.asarray(params["fc3_w"], np.float32)      # (10, 84)

    # conv1 folded into 4 shift-group matrices: rows = combo*6+co, cols = plane*3+ci
    w1s = np.zeros((4, 96, 48), np.float32)
    for rh in range(2):
        for rw in range(2):
            for a in range(2):
                for b in range(2):
                    combo = (rh * 2 + rw) * 4 + a * 2 + b
                    for i in range(5):
                        for j in range(5):
                            eh, ew = 2 * rh + a + i, 2 * rw + b + j
                            s_idx = (eh // 4) * 2 + (ew // 4)
                            plane = (eh % 4) * 4 + (ew % 4)
                            w1s[s_idx, combo * 6:combo * 6 + 6,
                                plane * 3:plane * 3 + 3] += w1[:, :, i, j]

    # conv2 folded into 9 shift-group matrices: rows = (a*2+b)*16+co, cols = rho*6+ci
    w2s = np.zeros((9, 64, 24), np.float32)
    for a in range(2):
        for b in range(2):
            combo = a * 2 + b
            for i in range(5):
                for j in range(5):
                    eh, ew = a + i, b + j
                    s_idx = (eh // 2) * 3 + (ew // 2)
                    rho = (eh % 2) * 2 + (ew % 2)
                    w2s[s_idx, combo * 16:combo * 16 + 16,
                        rho * 6:rho * 6 + 6] += w2[:, :, i, j]

    # fc1 weight re-laid onto the kernel's (16, 8, 8) pool2 frame (zeros outside 5x5)
    wf1 = np.zeros((16, 8, 8, 120), np.float32)
    wf1[:, :5, :5, :] = f1w.reshape(120, 16, 5, 5).transpose(1, 2, 3, 0)
    wf1 = wf1.reshape(16 * 64, 120)

    return {
        "w1s": jnp.asarray(w1s),
        "b1":  jnp.asarray(np.asarray(params["conv1_b"], np.float32).reshape(6, 1)),
        "w2s": jnp.asarray(w2s),
        "b2":  jnp.asarray(np.asarray(params["conv2_b"], np.float32).reshape(16, 1)),
        "wf1": jnp.asarray(wf1),
        "bf1": jnp.asarray(np.asarray(params["fc1_b"], np.float32).reshape(1, 120)),
        "wf2": jnp.asarray(f2w.T.copy()),
        "bf2": jnp.asarray(np.asarray(params["fc2_b"], np.float32).reshape(1, 84)),
        "wf3": jnp.asarray(f3w.T.copy()),
        "bf3": jnp.asarray(np.asarray(params["fc3_b"], np.float32).reshape(1, 10)),
    }


# ------------------------------ plain-JAX reference ------------------------------

def net_reference(params, x_nchw):
    """Straightforward XLA implementation of the PyTorch module (for verification)."""
    hp = jax.lax.Precision.HIGHEST
    x = x_nchw.astype(jnp.float32)

    def conv_relu(x, w, b):
        y = jax.lax.conv_general_dilated(
            x, w, window_strides=(1, 1), padding="VALID",
            dimension_numbers=("NCHW", "OIHW", "NCHW"), precision=hp)
        return jax.nn.relu(y + b[None, :, None, None])

    def maxpool2(x):
        return jax.lax.reduce_window(x, -jnp.inf, jax.lax.max,
                                     (1, 1, 2, 2), (1, 1, 2, 2), "VALID")

    x = maxpool2(conv_relu(x, params["conv1_w"], params["conv1_b"]))
    x = maxpool2(conv_relu(x, params["conv2_w"], params["conv2_b"]))
    x = x.reshape(x.shape[0], 16 * 5 * 5)
    x = jax.nn.relu(jnp.dot(x, params["fc1_w"].T, precision=hp) + params["fc1_b"])
    x = jax.nn.relu(jnp.dot(x, params["fc2_w"].T, precision=hp) + params["fc2_b"])
    return jnp.dot(x, params["fc3_w"].T, precision=hp) + params["fc3_b"]


# --------------------------------------- main -------------------------------------

if __name__ == "__main__":
    key = jax.random.PRNGKey(0)
    k_param, k_x = jax.random.split(key)
    params = init_params(k_param)
    prep = prepare_params(params)                       # hoisted weight re-layout
    x = jax.random.normal(k_x, (N_BATCH, 3, 32, 32), dtype=jnp.float32)

    out = jax.block_until_ready(jax.jit(net_forward)(prep, x))
    assert out.shape == (N_BATCH, 10) and out.dtype == jnp.float32

    ref = jax.block_until_ready(jax.jit(net_reference)(params, x))
    np.testing.assert_allclose(np.asarray(out), np.asarray(ref), rtol=2e-2, atol=2e-2)

    print("KERNEL_OK")
</pallas_src>

<mosaic_0001>
module attributes {stable_mosaic.version = 11 : i64} {
  func.func @_lenet_kernel(%arg0: memref<48x256xf32, #tpu.memory_space<vmem>>, %arg1: memref<4x96x48xf32, #tpu.memory_space<vmem>>, %arg2: memref<6x1xf32, #tpu.memory_space<vmem>>, %arg3: memref<9x64x24xf32, #tpu.memory_space<vmem>>, %arg4: memref<16x1xf32, #tpu.memory_space<vmem>>, %arg5: memref<1024x120xf32, #tpu.memory_space<vmem>>, %arg6: memref<1x120xf32, #tpu.memory_space<vmem>>, %arg7: memref<120x84xf32, #tpu.memory_space<vmem>>, %arg8: memref<1x84xf32, #tpu.memory_space<vmem>>, %arg9: memref<84x10xf32, #tpu.memory_space<vmem>>, %arg10: memref<1x10xf32, #tpu.memory_space<vmem>>, %arg11: memref<2x10xf32, #tpu.memory_space<vmem>>, %arg12: memref<24x256xf32, #tpu.memory_space<vmem>>) attributes {dimension_semantics = [], scalar_prefetch = 0 : i64, scratch_operands = 1 : i64, tpu.core_type = #tpu.core_type<tc>} {
    %c0 = arith.constant 0 : index
    %c0_0 = arith.constant 0 : index
    %0 = vector.load %arg0[%c0, %c0_0] : memref<48x256xf32, #tpu.memory_space<vmem>>, vector<48x256xf32>
    %cst = arith.constant 0.000000e+00 : f32
    %1 = vector.broadcast %cst : f32 to vector<96x128xf32>
    %c0_1 = arith.constant 0 : index
    %c0_2 = arith.constant 0 : index
    %c0_3 = arith.constant 0 : index
    %2 = vector.load %arg1[%c0_1, %c0_2, %c0_3] : memref<4x96x48xf32, #tpu.memory_space<vmem>>, vector<1x96x48xf32>
    %3 = vector.shape_cast %2 : vector<1x96x48xf32> to vector<96x48xf32>
    %4 = vector.extract_strided_slice %0 {offsets = [0, 0], sizes = [48, 128], strides = [1, 1]} : vector<48x256xf32> to vector<48x128xf32>
    %cst_4 = arith.constant dense<0.000000e+00> : vector<96x128xf32>
    %5 = tpu.matmul %3, %4, %cst_4 {dimension_numbers = #tpu.dot_dimension_numbers<[1], [0], [0], [1], [0, 0, 1, 1], [], []>} : vector<96x48xf32>, vector<48x128xf32>, vector<96x128xf32> -> vector<96x128xf32>
    %6 = arith.addf %1, %5 : vector<96x128xf32>
    %c1 = arith.constant 1 : index
    %c0_5 = arith.constant 0 : index
    %c0_6 = arith.constant 0 : index
    %7 = vector.load %arg1[%c1, %c0_5, %c0_6] : memref<4x96x48xf32, #tpu.memory_space<vmem>>, vector<1x96x48xf32>
    %8 = vector.shape_cast %7 : vector<1x96x48xf32> to vector<96x48xf32>
    %9 = vector.extract_strided_slice %0 {offsets = [0, 1], sizes = [48, 128], strides = [1, 1]} : vector<48x256xf32> to vector<48x128xf32>
    %cst_7 = arith.constant dense<0.000000e+00> : vector<96x128xf32>
    %10 = tpu.matmul %8, %9, %cst_7 {dimension_numbers = #tpu.dot_dimension_numbers<[1], [0], [0], [1], [0, 0, 1, 1], [], []>} : vector<96x48xf32>, vector<48x128xf32>, vector<96x128xf32> -> vector<96x128xf32>
    %11 = arith.addf %6, %10 : vector<96x128xf32>
    %c2 = arith.constant 2 : index
    %c0_8 = arith.constant 0 : index
    %c0_9 = arith.constant 0 : index
    %12 = vector.load %arg1[%c2, %c0_8, %c0_9] : memref<4x96x48xf32, #tpu.memory_space<vmem>>, vector<1x96x48xf32>
    %13 = vector.shape_cast %12 : vector<1x96x48xf32> to vector<96x48xf32>
    %14 = vector.extract_strided_slice %0 {offsets = [0, 8], sizes = [48, 128], strides = [1, 1]} : vector<48x256xf32> to vector<48x128xf32>
    %cst_10 = arith.constant dense<0.000000e+00> : vector<96x128xf32>
    %15 = tpu.matmul %13, %14, %cst_10 {dimension_numbers = #tpu.dot_dimension_numbers<[1], [0], [0], [1], [0, 0, 1, 1], [], []>} : vector<96x48xf32>, vector<48x128xf32>, vector<96x128xf32> -> vector<96x128xf32>
    %16 = arith.addf %11, %15 : vector<96x128xf32>
    %c3 = arith.constant 3 : index
    %c0_11 = arith.constant 0 : index
    %c0_12 = arith.constant 0 : index
    %17 = vector.load %arg1[%c3, %c0_11, %c0_12] : memref<4x96x48xf32, #tpu.memory_space<vmem>>, vector<1x96x48xf32>
    %18 = vector.shape_cast %17 : vector<1x96x48xf32> to vector<96x48xf32>
    %19 = vector.extract_strided_slice %0 {offsets = [0, 9], sizes = [48, 128], strides = [1, 1]} : vector<48x256xf32> to vector<48x128xf32>
    %cst_13 = arith.constant dense<0.000000e+00> : vector<96x128xf32>
    %20 = tpu.matmul %18, %19, %cst_13 {dimension_numbers = #tpu.dot_dimension_numbers<[1], [0], [0], [1], [0, 0, 1, 1], [], []>} : vector<96x48xf32>, vector<48x128xf32>, vector<96x128xf32> -> vector<96x128xf32>
    %21 = arith.addf %16, %20 : vector<96x128xf32>
    %cst_14 = arith.constant 0.000000e+00 : f32
    %22 = vector.broadcast %cst_14 : f32 to vector<24x256xf32>
    %c0_15 = arith.constant 0 : index
    %c0_16 = arith.constant 0 : index
    %23 = vector.load %arg12[%c0_15, %c0_16] : memref<24x256xf32, #tpu.memory_space<vmem>>, vector<24x256xf32>
    tpu.vector_store %arg12[%c0_15, %c0_16], %22 {strides = array<i32>} : memref<24x256xf32, #tpu.memory_space<vmem>>, vector<24x256xf32>,
    %24 = vector.extract_strided_slice %21 {offsets = [0, 0], sizes = [6, 128], strides = [1, 1]} : vector<96x128xf32> to vector<6x128xf32>
    %25 = vector.extract_strided_slice %21 {offsets = [6, 0], sizes = [6, 128], strides = [1, 1]} : vector<96x128xf32> to vector<6x128xf32>
    %26 = arith.maximumf %24, %25 : vector<6x128xf32>
    %27 = vector.extract_strided_slice %21 {offsets = [12, 0], sizes = [6, 128], strides = [1, 1]} : vector<96x128xf32> to vector<6x128xf32>
    %28 = arith.maximumf %26, %27 : vector<6x128xf32>
    %29 = vector.extract_strided_slice %21 {offsets = [18, 0], sizes = [6, 128], strides = [1, 1]} : vector<96x128xf32> to vector<6x128xf32>
    %30 = arith.maximumf %28, %29 : vector<6x128xf32>
    %c0_17 = arith.constant 0 : index
    %c0_18 = arith.constant 0 : index
    %31 = vector.load %arg2[%c0_17, %c0_18] : memref<6x1xf32, #tpu.memory_space<vmem>>, vector<6x1xf32>
    %32 = vector.broadcast %31 : vector<6x1xf32> to vector<6x128xf32>
    %33 = arith.addf %30, %32 : vector<6x128xf32>
    %cst_19 = arith.constant 0.000000e+00 : f32
    %34 = vector.broadcast %cst_19 : f32 to vector<6x128xf32>
    %35 = arith.maximumf %33, %34 : vector<6x128xf32>
    %c0_20 = arith.constant 0 : index
    %c0_21 = arith.constant 0 : index
    %36 = vector.load %arg12[%c0_20, %c0_21] : memref<24x256xf32, #tpu.memory_space<vmem>>, vector<6x128xf32>
    tpu.vector_store %arg12[%c0_20, %c0_21], %35 {strides = array<i32>} : memref<24x256xf32, #tpu.memory_space<vmem>>, vector<6x128xf32>,
    %37 = vector.extract_strided_slice %21 {offsets = [24, 0], sizes = [6, 128], strides = [1, 1]} : vector<96x128xf32> to vector<6x128xf32>
    %38 = vector.extract_strided_slice %21 {offsets = [30, 0], sizes = [6, 128], strides = [1, 1]} : vector<96x128xf32> to vector<6x128xf32>
    %39 = arith.maximumf %37, %38 : vector<6x128xf32>
    %40 = vector.extract_strided_slice %21 {offsets = [36, 0], sizes = [6, 128], strides = [1, 1]} : vector<96x128xf32> to vector<6x128xf32>
    %41 = arith.maximumf %39, %40 : vector<6x128xf32>
    %42 = vector.extract_strided_slice %21 {offsets = [42, 0], sizes = [6, 128], strides = [1, 1]} : vector<96x128xf32> to vector<6x128xf32>
    %43 = arith.maximumf %41, %42 : vector<6x128xf32>
    %c0_22 = arith.constant 0 : index
    %c0_23 = arith.constant 0 : index
    %44 = vector.load %arg2[%c0_22, %c0_23] : memref<6x1xf32, #tpu.memory_space<vmem>>, vector<6x1xf32>
    %45 = vector.broadcast %44 : vector<6x1xf32> to vector<6x128xf32>
    %46 = arith.addf %43, %45 : vector<6x128xf32>
    %cst_24 = arith.constant 0.000000e+00 : f32
    %47 = vector.broadcast %cst_24 : f32 to vector<6x128xf32>
    %48 = arith.maximumf %46, %47 : vector<6x128xf32>
    %c6 = arith.constant 6 : index
    %c0_25 = arith.constant 0 : index
    %49 = vector.load %arg12[%c6, %c0_25] : memref<24x256xf32, #tpu.memory_space<vmem>>, vector<6x128xf32>
    tpu.vector_store %arg12[%c6, %c0_25], %48 {strides = array<i32>} : memref<24x256xf32, #tpu.memory_space<vmem>>, vector<6x128xf32>,
    %50 = vector.extract_strided_slice %21 {offsets = [48, 0], sizes = [6, 128], strides = [1, 1]} : vector<96x128xf32> to vector<6x128xf32>
    %51 = vector.extract_strided_slice %21 {offsets = [54, 0], sizes = [6, 128], strides = [1, 1]} : vector<96x128xf32> to vector<6x128xf32>
    %52 = arith.maximumf %50, %51 : vector<6x128xf32>
    %53 = vector.extract_strided_slice %21 {offsets = [60, 0], sizes = [6, 128], strides = [1, 1]} : vector<96x128xf32> to vector<6x128xf32>
    %54 = arith.maximumf %52, %53 : vector<6x128xf32>
    %55 = vector.extract_strided_slice %21 {offsets = [66, 0], sizes = [6, 128], strides = [1, 1]} : vector<96x128xf32> to vector<6x128xf32>
    %56 = arith.maximumf %54, %55 : vector<6x128xf32>
    %c0_26 = arith.constant 0 : index
    %c0_27 = arith.constant 0 : index
    %57 = vector.load %arg2[%c0_26, %c0_27] : memref<6x1xf32, #tpu.memory_space<vmem>>, vector<6x1xf32>
    %58 = vector.broadcast %57 : vector<6x1xf32> to vector<6x128xf32>
    %59 = arith.addf %56, %58 : vector<6x128xf32>
    %cst_28 = arith.constant 0.000000e+00 : f32
    %60 = vector.broadcast %cst_28 : f32 to vector<6x128xf32>
    %61 = arith.maximumf %59, %60 : vector<6x128xf32>
    %c12 = arith.constant 12 : index
    %c0_29 = arith.constant 0 : index
    %62 = vector.load %arg12[%c12, %c0_29] : memref<24x256xf32, #tpu.memory_space<vmem>>, vector<6x128xf32>
    tpu.vector_store %arg12[%c12, %c0_29], %61 {strides = array<i32>} : memref<24x256xf32, #tpu.memory_space<vmem>>, vector<6x128xf32>,
    %63 = vector.extract_strided_slice %21 {offsets = [72, 0], sizes = [6, 128], strides = [1, 1]} : vector<96x128xf32> to vector<6x128xf32>
    %64 = vector.extract_strided_slice %21 {offsets = [78, 0], sizes = [6, 128], strides = [1, 1]} : vector<96x128xf32> to vector<6x128xf32>
    %65 = arith.maximumf %63, %64 : vector<6x128xf32>
    %66 = vector.extract_strided_slice %21 {offsets = [84, 0], sizes = [6, 128], strides = [1, 1]} : vector<96x128xf32> to vector<6x128xf32>
    %67 = arith.maximumf %65, %66 : vector<6x128xf32>
    %68 = vector.extract_strided_slice %21 {offsets = [90, 0], sizes = [6, 128], strides = [1, 1]} : vector<96x128xf32> to vector<6x128xf32>
    %69 = arith.maximumf %67, %68 : vector<6x128xf32>
    %c0_30 = arith.constant 0 : index
    %c0_31 = arith.constant 0 : index
    %70 = vector.load %arg2[%c0_30, %c0_31] : memref<6x1xf32, #tpu.memory_space<vmem>>, vector<6x1xf32>
    %71 = vector.broadcast %70 : vector<6x1xf32> to vector<6x128xf32>
    %72 = arith.addf %69, %71 : vector<6x128xf32>
    %cst_32 = arith.constant 0.000000e+00 : f32
    %73 = vector.broadcast %cst_32 : f32 to vector<6x128xf32>
    %74 = arith.maximumf %72, %73 : vector<6x128xf32>
    %c18 = arith.constant 18 : index
    %c0_33 = arith.constant 0 : index
    %75 = vector.load %arg12[%c18, %c0_33] : memref<24x256xf32, #tpu.memory_space<vmem>>, vector<6x128xf32>
    tpu.vector_store %arg12[%c18, %c0_33], %74 {strides = array<i32>} : memref<24x256xf32, #tpu.memory_space<vmem>>, vector<6x128xf32>,
    %c0_34 = arith.constant 0 : index
    %c0_35 = arith.constant 0 : index
    %76 = vector.load %arg12[%c0_34, %c0_35] : memref<24x256xf32, #tpu.memory_space<vmem>>, vector<24x256xf32>
    %cst_36 = arith.constant 0.000000e+00 : f32
    %77 = vector.broadcast %cst_36 : f32 to vector<64x128xf32>
    %c0_37 = arith.constant 0 : index
    %c0_38 = arith.constant 0 : index
    %c0_39 = arith.constant 0 : index
    %78 = vector.load %arg3[%c0_37, %c0_38, %c0_39] : memref<9x64x24xf32, #tpu.memory_space<vmem>>, vector<1x64x24xf32>
    %79 = vector.shape_cast %78 : vector<1x64x24xf32> to vector<64x24xf32>
    %80 = vector.extract_strided_slice %76 {offsets = [0, 0], sizes = [24, 128], strides = [1, 1]} : vector<24x256xf32> to vector<24x128xf32>
    %cst_40 = arith.constant dense<0.000000e+00> : vector<64x128xf32>
    %81 = tpu.matmul %79, %80, %cst_40 {dimension_numbers = #tpu.dot_dimension_numbers<[1], [0], [0], [1], [0, 0, 1, 1], [], []>} : vector<64x24xf32>, vector<24x128xf32>, vector<64x128xf32> -> vector<64x128xf32>
    %82 = arith.addf %77, %81 : vector<64x128xf32>
    %c1_41 = arith.constant 1 : index
    %c0_42 = arith.constant 0 : index
    %c0_43 = arith.constant 0 : index
    %83 = vector.load %arg3[%c1_41, %c0_42, %c0_43] : memref<9x64x24xf32, #tpu.memory_space<vmem>>, vector<1x64x24xf32>
    %84 = vector.shape_cast %83 : vector<1x64x24xf32> to vector<64x24xf32>
    %85 = vector.extract_strided_slice %76 {offsets = [0, 1], sizes = [24, 128], strides = [1, 1]} : vector<24x256xf32> to vector<24x128xf32>
    %cst_44 = arith.constant dense<0.000000e+00> : vector<64x128xf32>
    %86 = tpu.matmul %84, %85, %cst_44 {dimension_numbers = #tpu.dot_dimension_numbers<[1], [0], [0], [1], [0, 0, 1, 1], [], []>} : vector<64x24xf32>, vector<24x128xf32>, vector<64x128xf32> -> vector<64x128xf32>
    %87 = arith.addf %82, %86 : vector<64x128xf32>
    %c2_45 = arith.constant 2 : index
    %c0_46 = arith.constant 0 : index
    %c0_47 = arith.constant 0 : index
    %88 = vector.load %arg3[%c2_45, %c0_46, %c0_47] : memref<9x64x24xf32, #tpu.memory_space<vmem>>, vector<1x64x24xf32>
    %89 = vector.shape_cast %88 : vector<1x64x24xf32> to vector<64x24xf32>
    %90 = vector.extract_strided_slice %76 {offsets = [0, 2], sizes = [24, 128], strides = [1, 1]} : vector<24x256xf32> to vector<24x128xf32>
    %cst_48 = arith.constant dense<0.000000e+00> : vector<64x128xf32>
    %91 = tpu.matmul %89, %90, %cst_48 {dimension_numbers = #tpu.dot_dimension_numbers<[1], [0], [0], [1], [0, 0, 1, 1], [], []>} : vector<64x24xf32>, vector<24x128xf32>, vector<64x128xf32> -> vector<64x128xf32>
    %92 = arith.addf %87, %91 : vector<64x128xf32>
    %c3_49 = arith.constant 3 : index
    %c0_50 = arith.constant 0 : index
    %c0_51 = arith.constant 0 : index
    %93 = vector.load %arg3[%c3_49, %c0_50, %c0_51] : memref<9x64x24xf32, #tpu.memory_space<vmem>>, vector<1x64x24xf32>
    %94 = vector.shape_cast %93 : vector<1x64x24xf32> to vector<64x24xf32>
    %95 = vector.extract_strided_slice %76 {offsets = [0, 8], sizes = [24, 128], strides = [1, 1]} : vector<24x256xf32> to vector<24x128xf32>
    %cst_52 = arith.constant dense<0.000000e+00> : vector<64x128xf32>
    %96 = tpu.matmul %94, %95, %cst_52 {dimension_numbers = #tpu.dot_dimension_numbers<[1], [0], [0], [1], [0, 0, 1, 1], [], []>} : vector<64x24xf32>, vector<24x128xf32>, vector<64x128xf32> -> vector<64x128xf32>
    %97 = arith.addf %92, %96 : vector<64x128xf32>
    %c4 = arith.constant 4 : index
    %c0_53 = arith.constant 0 : index
    %c0_54 = arith.constant 0 : index
    %98 = vector.load %arg3[%c4, %c0_53, %c0_54] : memref<9x64x24xf32, #tpu.memory_space<vmem>>, vector<1x64x24xf32>
    %99 = vector.shape_cast %98 : vector<1x64x24xf32> to vector<64x24xf32>
    %100 = vector.extract_strided_slice %76 {offsets = [0, 9], sizes = [24, 128], strides = [1, 1]} : vector<24x256xf32> to vector<24x128xf32>
    %cst_55 = arith.constant dense<0.000000e+00> : vector<64x128xf32>
    %101 = tpu.matmul %99, %100, %cst_55 {dimension_numbers = #tpu.dot_dimension_numbers<[1], [0], [0], [1], [0, 0, 1, 1], [], []>} : vector<64x24xf32>, vector<24x128xf32>, vector<64x128xf32> -> vector<64x128xf32>
    %102 = arith.addf %97, %101 : vector<64x128xf32>
    %c5 = arith.constant 5 : index
    %c0_56 = arith.constant 0 : index
    %c0_57 = arith.constant 0 : index
    %103 = vector.load %arg3[%c5, %c0_56, %c0_57] : memref<9x64x24xf32, #tpu.memory_space<vmem>>, vector<1x64x24xf32>
    %104 = vector.shape_cast %103 : vector<1x64x24xf32> to vector<64x24xf32>
    %105 = vector.extract_strided_slice %76 {offsets = [0, 10], sizes = [24, 128], strides = [1, 1]} : vector<24x256xf32> to vector<24x128xf32>
    %cst_58 = arith.constant dense<0.000000e+00> : vector<64x128xf32>
    %106 = tpu.matmul %104, %105, %cst_58 {dimension_numbers = #tpu.dot_dimension_numbers<[1], [0], [0], [1], [0, 0, 1, 1], [], []>} : vector<64x24xf32>, vector<24x128xf32>, vector<64x128xf32> -> vector<64x128xf32>
    %107 = arith.addf %102, %106 : vector<64x128xf32>
    %c6_59 = arith.constant 6 : index
    %c0_60 = arith.constant 0 : index
    %c0_61 = arith.constant 0 : index
    %108 = vector.load %arg3[%c6_59, %c0_60, %c0_61] : memref<9x64x24xf32, #tpu.memory_space<vmem>>, vector<1x64x24xf32>
    %109 = vector.shape_cast %108 : vector<1x64x24xf32> to vector<64x24xf32>
    %110 = vector.extract_strided_slice %76 {offsets = [0, 16], sizes = [24, 128], strides = [1, 1]} : vector<24x256xf32> to vector<24x128xf32>
    %cst_62 = arith.constant dense<0.000000e+00> : vector<64x128xf32>
    %111 = tpu.matmul %109, %110, %cst_62 {dimension_numbers = #tpu.dot_dimension_numbers<[1], [0], [0], [1], [0, 0, 1, 1], [], []>} : vector<64x24xf32>, vector<24x128xf32>, vector<64x128xf32> -> vector<64x128xf32>
    %112 = arith.addf %107, %111 : vector<64x128xf32>
    %c7 = arith.constant 7 : index
    %c0_63 = arith.constant 0 : index
    %c0_64 = arith.constant 0 : index
    %113 = vector.load %arg3[%c7, %c0_63, %c0_64] : memref<9x64x24xf32, #tpu.memory_space<vmem>>, vector<1x64x24xf32>
    %114 = vector.shape_cast %113 : vector<1x64x24xf32> to vector<64x24xf32>
    %115 = vector.extract_strided_slice %76 {offsets = [0, 17], sizes = [24, 128], strides = [1, 1]} : vector<24x256xf32> to vector<24x128xf32>
    %cst_65 = arith.constant dense<0.000000e+00> : vector<64x128xf32>
    %116 = tpu.matmul %114, %115, %cst_65 {dimension_numbers = #tpu.dot_dimension_numbers<[1], [0], [0], [1], [0, 0, 1, 1], [], []>} : vector<64x24xf32>, vector<24x128xf32>, vector<64x128xf32> -> vector<64x128xf32>
    %117 = arith.addf %112, %116 : vector<64x128xf32>
    %c8 = arith.constant 8 : index
    %c0_66 = arith.constant 0 : index
    %c0_67 = arith.constant 0 : index
    %118 = vector.load %arg3[%c8, %c0_66, %c0_67] : memref<9x64x24xf32, #tpu.memory_space<vmem>>, vector<1x64x24xf32>
    %119 = vector.shape_cast %118 : vector<1x64x24xf32> to vector<64x24xf32>
    %120 = vector.extract_strided_slice %76 {offsets = [0, 18], sizes = [24, 128], strides = [1, 1]} : vector<24x256xf32> to vector<24x128xf32>
    %cst_68 = arith.constant dense<0.000000e+00> : vector<64x128xf32>
    %121 = tpu.matmul %119, %120, %cst_68 {dimension_numbers = #tpu.dot_dimension_numbers<[1], [0], [0], [1], [0, 0, 1, 1], [], []>} : vector<64x24xf32>, vector<24x128xf32>, vector<64x128xf32> -> vector<64x128xf32>
    %122 = arith.addf %117, %121 : vector<64x128xf32>
    %123 = vector.extract_strided_slice %122 {offsets = [0, 0], sizes = [16, 128], strides = [1, 1]} : vector<64x128xf32> to vector<16x128xf32>
    %124 = vector.extract_strided_slice %122 {offsets = [16, 0], sizes = [16, 128], strides = [1, 1]} : vector<64x128xf32> to vector<16x128xf32>
    %125 = arith.maximumf %123, %124 : vector<16x128xf32>
    %126 = vector.extract_strided_slice %122 {offsets = [32, 0], sizes = [16, 128], strides = [1, 1]} : vector<64x128xf32> to vector<16x128xf32>
    %127 = arith.maximumf %125, %126 : vector<16x128xf32>
    %128 = vector.extract_strided_slice %122 {offsets = [48, 0], sizes = [16, 128], strides = [1, 1]} : vector<64x128xf32> to vector<16x128xf32>
    %129 = arith.maximumf %127, %128 : vector<16x128xf32>
    %c0_69 = arith.constant 0 : index
    %c0_70 = arith.constant 0 : index
    %130 = vector.load %arg4[%c0_69, %c0_70] : memref<16x1xf32, #tpu.memory_space<vmem>>, vector<16x1xf32>
    %131 = vector.broadcast %130 : vector<16x1xf32> to vector<16x128xf32>
    %132 = arith.addf %129, %131 : vector<16x128xf32>
    %cst_71 = arith.constant 0.000000e+00 : f32
    %133 = vector.broadcast %cst_71 : f32 to vector<16x128xf32>
    %134 = arith.maximumf %132, %133 : vector<16x128xf32>
    %cst_72 = arith.constant 0.000000e+00 : f32
    %135 = vector.broadcast %cst_72 : f32 to vector<2x120xf32>
    %136 = vector.extract_strided_slice %134 {offsets = [0, 0], sizes = [1, 64], strides = [1, 1]} : vector<16x128xf32> to vector<1x64xf32>
    %137 = vector.extract_strided_slice %134 {offsets = [0, 64], sizes = [1, 64], strides = [1, 1]} : vector<16x128xf32> to vector<1x64xf32>
    %138 = tpu.concatenate %136, %137 in 0 : vector<1x64xf32>, vector<1x64xf32> -> vector<2x64xf32>
    %c0_73 = arith.constant 0 : index
    %c0_74 = arith.constant 0 : index
    %139 = vector.load %arg5[%c0_73, %c0_74] : memref<1024x120xf32, #tpu.memory_space<vmem>>, vector<64x120xf32>
    %cst_75 = arith.constant dense<0.000000e+00> : vector<2x120xf32>
    %140 = tpu.matmul %138, %139, %cst_75 {dimension_numbers = #tpu.dot_dimension_numbers<[1], [0], [0], [1], [0, 0, 1, 1], [], []>} : vector<2x64xf32>, vector<64x120xf32>, vector<2x120xf32> -> vector<2x120xf32>
    %141 = arith.addf %135, %140 : vector<2x120xf32>
    %142 = vector.extract_strided_slice %134 {offsets = [1, 0], sizes = [1, 64], strides = [1, 1]} : vector<16x128xf32> to vector<1x64xf32>
    %143 = vector.extract_strided_slice %134 {offsets = [1, 64], sizes = [1, 64], strides = [1, 1]} : vector<16x128xf32> to vector<1x64xf32>
    %144 = tpu.concatenate %142, %143 in 0 : vector<1x64xf32>, vector<1x64xf32> -> vector<2x64xf32>
    %c64 = arith.constant 64 : index
    %c0_76 = arith.constant 0 : index
    %145 = vector.load %arg5[%c64, %c0_76] : memref<1024x120xf32, #tpu.memory_space<vmem>>, vector<64x120xf32>
    %cst_77 = arith.constant dense<0.000000e+00> : vector<2x120xf32>
    %146 = tpu.matmul %144, %145, %cst_77 {dimension_numbers = #tpu.dot_dimension_numbers<[1], [0], [0], [1], [0, 0, 1, 1], [], []>} : vector<2x64xf32>, vector<64x120xf32>, vector<2x120xf32> -> vector<2x120xf32>
    %147 = arith.addf %141, %146 : vector<2x120xf32>
    %148 = vector.extract_strided_slice %134 {offsets = [2, 0], sizes = [1, 64], strides = [1, 1]} : vector<16x128xf32> to vector<1x64xf32>
    %149 = vector.extract_strided_slice %134 {offsets = [2, 64], sizes = [1, 64], strides = [1, 1]} : vector<16x128xf32> to vector<1x64xf32>
    %150 = tpu.concatenate %148, %149 in 0 : vector<1x64xf32>, vector<1x64xf32> -> vector<2x64xf32>
    %c128 = arith.constant 128 : index
    %c0_78 = arith.constant 0 : index
    %151 = vector.load %arg5[%c128, %c0_78] : memref<1024x120xf32, #tpu.memory_space<vmem>>, vector<64x120xf32>
    %cst_79 = arith.constant dense<0.000000e+00> : vector<2x120xf32>
    %152 = tpu.matmul %150, %151, %cst_79 {dimension_numbers = #tpu.dot_dimension_numbers<[1], [0], [0], [1], [0, 0, 1, 1], [], []>} : vector<2x64xf32>, vector<64x120xf32>, vector<2x120xf32> -> vector<2x120xf32>
    %153 = arith.addf %147, %152 : vector<2x120xf32>
    %154 = vector.extract_strided_slice %134 {offsets = [3, 0], sizes = [1, 64], strides = [1, 1]} : vector<16x128xf32> to vector<1x64xf32>
    %155 = vector.extract_strided_slice %134 {offsets = [3, 64], sizes = [1, 64], strides = [1, 1]} : vector<16x128xf32> to vector<1x64xf32>
    %156 = tpu.concatenate %154, %155 in 0 : vector<1x64xf32>, vector<1x64xf32> -> vector<2x64xf32>
    %c192 = arith.constant 192 : index
    %c0_80 = arith.constant 0 : index
    %157 = vector.load %arg5[%c192, %c0_80] : memref<1024x120xf32, #tpu.memory_space<vmem>>, vector<64x120xf32>
    %cst_81 = arith.constant dense<0.000000e+00> : vector<2x120xf32>
    %158 = tpu.matmul %156, %157, %cst_81 {dimension_numbers = #tpu.dot_dimension_numbers<[1], [0], [0], [1], [0, 0, 1, 1], [], []>} : vector<2x64xf32>, vector<64x120xf32>, vector<2x120xf32> -> vector<2x120xf32>
    %159 = arith.addf %153, %158 : vector<2x120xf32>
    %160 = vector.extract_strided_slice %134 {offsets = [4, 0], sizes = [1, 64], strides = [1, 1]} : vector<16x128xf32> to vector<1x64xf32>
    %161 = vector.extract_strided_slice %134 {offsets = [4, 64], sizes = [1, 64], strides = [1, 1]} : vector<16x128xf32> to vector<1x64xf32>
    %162 = tpu.concatenate %160, %161 in 0 : vector<1x64xf32>, vector<1x64xf32> -> vector<2x64xf32>
    %c256 = arith.constant 256 : index
    %c0_82 = arith.constant 0 : index
    %163 = vector.load %arg5[%c256, %c0_82] : memref<1024x120xf32, #tpu.memory_space<vmem>>, vector<64x120xf32>
    %cst_83 = arith.constant dense<0.000000e+00> : vector<2x120xf32>
    %164 = tpu.matmul %162, %163, %cst_83 {dimension_numbers = #tpu.dot_dimension_numbers<[1], [0], [0], [1], [0, 0, 1, 1], [], []>} : vector<2x64xf32>, vector<64x120xf32>, vector<2x120xf32> -> vector<2x120xf32>
    %165 = arith.addf %159, %164 : vector<2x120xf32>
    %166 = vector.extract_strided_slice %134 {offsets = [5, 0], sizes = [1, 64], strides = [1, 1]} : vector<16x128xf32> to vector<1x64xf32>
    %167 = vector.extract_strided_slice %134 {offsets = [5, 64], sizes = [1, 64], strides = [1, 1]} : vector<16x128xf32> to vector<1x64xf32>
    %168 = tpu.concatenate %166, %167 in 0 : vector<1x64xf32>, vector<1x64xf32> -> vector<2x64xf32>
    %c320 = arith.constant 320 : index
    %c0_84 = arith.constant 0 : index
    %169 = vector.load %arg5[%c320, %c0_84] : memref<1024x120xf32, #tpu.memory_space<vmem>>, vector<64x120xf32>
    %cst_85 = arith.constant dense<0.000000e+00> : vector<2x120xf32>
    %170 = tpu.matmul %168, %169, %cst_85 {dimension_numbers = #tpu.dot_dimension_numbers<[1], [0], [0], [1], [0, 0, 1, 1], [], []>} : vector<2x64xf32>, vector<64x120xf32>, vector<2x120xf32> -> vector<2x120xf32>
    %171 = arith.addf %165, %170 : vector<2x120xf32>
    %172 = vector.extract_strided_slice %134 {offsets = [6, 0], sizes = [1, 64], strides = [1, 1]} : vector<16x128xf32> to vector<1x64xf32>
    %173 = vector.extract_strided_slice %134 {offsets = [6, 64], sizes = [1, 64], strides = [1, 1]} : vector<16x128xf32> to vector<1x64xf32>
    %174 = tpu.concatenate %172, %173 in 0 : vector<1x64xf32>, vector<1x64xf32> -> vector<2x64xf32>
    %c384 = arith.constant 384 : index
    %c0_86 = arith.constant 0 : index
    %175 = vector.load %arg5[%c384, %c0_86] : memref<1024x120xf32, #tpu.memory_space<vmem>>, vector<64x120xf32>
    %cst_87 = arith.constant dense<0.000000e+00> : vector<2x120xf32>
    %176 = tpu.matmul %174, %175, %cst_87 {dimension_numbers = #tpu.dot_dimension_numbers<[1], [0], [0], [1], [0, 0, 1, 1], [], []>} : vector<2x64xf32>, vector<64x120xf32>, vector<2x120xf32> -> vector<2x120xf32>
    %177 = arith.addf %171, %176 : vector<2x120xf32>
    %178 = vector.extract_strided_slice %134 {offsets = [7, 0], sizes = [1, 64], strides = [1, 1]} : vector<16x128xf32> to vector<1x64xf32>
    %179 = vector.extract_strided_slice %134 {offsets = [7, 64], sizes = [1, 64], strides = [1, 1]} : vector<16x128xf32> to vector<1x64xf32>
    %180 = tpu.concatenate %178, %179 in 0 : vector<1x64xf32>, vector<1x64xf32> -> vector<2x64xf32>
    %c448 = arith.constant 448 : index
    %c0_88 = arith.constant 0 : index
    %181 = vector.load %arg5[%c448, %c0_88] : memref<1024x120xf32, #tpu.memory_space<vmem>>, vector<64x120xf32>
    %cst_89 = arith.constant dense<0.000000e+00> : vector<2x120xf32>
    %182 = tpu.matmul %180, %181, %cst_89 {dimension_numbers = #tpu.dot_dimension_numbers<[1], [0], [0], [1], [0, 0, 1, 1], [], []>} : vector<2x64xf32>, vector<64x120xf32>, vector<2x120xf32> -> vector<2x120xf32>
    %183 = arith.addf %177, %182 : vector<2x120xf32>
    %184 = vector.extract_strided_slice %134 {offsets = [8, 0], sizes = [1, 64], strides = [1, 1]} : vector<16x128xf32> to vector<1x64xf32>
    %185 = vector.extract_strided_slice %134 {offsets = [8, 64], sizes = [1, 64], strides = [1, 1]} : vector<16x128xf32> to vector<1x64xf32>
    %186 = tpu.concatenate %184, %185 in 0 : vector<1x64xf32>, vector<1x64xf32> -> vector<2x64xf32>
    %c512 = arith.constant 512 : index
    %c0_90 = arith.constant 0 : index
    %187 = vector.load %arg5[%c512, %c0_90] : memref<1024x120xf32, #tpu.memory_space<vmem>>, vector<64x120xf32>
    %cst_91 = arith.constant dense<0.000000e+00> : vector<2x120xf32>
    %188 = tpu.matmul %186, %187, %cst_91 {dimension_numbers = #tpu.dot_dimension_numbers<[1], [0], [0], [1], [0, 0, 1, 1], [], []>} : vector<2x64xf32>, vector<64x120xf32>, vector<2x120xf32> -> vector<2x120xf32>
    %189 = arith.addf %183, %188 : vector<2x120xf32>
    %190 = vector.extract_strided_slice %134 {offsets = [9, 0], sizes = [1, 64], strides = [1, 1]} : vector<16x128xf32> to vector<1x64xf32>
    %191 = vector.extract_strided_slice %134 {offsets = [9, 64], sizes = [1, 64], strides = [1, 1]} : vector<16x128xf32> to vector<1x64xf32>
    %192 = tpu.concatenate %190, %191 in 0 : vector<1x64xf32>, vector<1x64xf32> -> vector<2x64xf32>
    %c576 = arith.constant 576 : index
    %c0_92 = arith.constant 0 : index
    %193 = vector.load %arg5[%c576, %c0_92] : memref<1024x120xf32, #tpu.memory_space<vmem>>, vector<64x120xf32>
    %cst_93 = arith.constant dense<0.000000e+00> : vector<2x120xf32>
    %194 = tpu.matmul %192, %193, %cst_93 {dimension_numbers = #tpu.dot_dimension_numbers<[1], [0], [0], [1], [0, 0, 1, 1], [], []>} : vector<2x64xf32>, vector<64x120xf32>, vector<2x120xf32> -> vector<2x120xf32>
    %195 = arith.addf %189, %194 : vector<2x120xf32>
    %196 = vector.extract_strided_slice %134 {offsets = [10, 0], sizes = [1, 64], strides = [1, 1]} : vector<16x128xf32> to vector<1x64xf32>
    %197 = vector.extract_strided_slice %134 {offsets = [10, 64], sizes = [1, 64], strides = [1, 1]} : vector<16x128xf32> to vector<1x64xf32>
    %198 = tpu.concatenate %196, %197 in 0 : vector<1x64xf32>, vector<1x64xf32> -> vector<2x64xf32>
    %c640 = arith.constant 640 : index
    %c0_94 = arith.constant 0 : index
    %199 = vector.load %arg5[%c640, %c0_94] : memref<1024x120xf32, #tpu.memory_space<vmem>>, vector<64x120xf32>
    %cst_95 = arith.constant dense<0.000000e+00> : vector<2x120xf32>
    %200 = tpu.matmul %198, %199, %cst_95 {dimension_numbers = #tpu.dot_dimension_numbers<[1], [0], [0], [1], [0, 0, 1, 1], [], []>} : vector<2x64xf32>, vector<64x120xf32>, vector<2x120xf32> -> vector<2x120xf32>
    %201 = arith.addf %195, %200 : vector<2x120xf32>
    %202 = vector.extract_strided_slice %134 {offsets = [11, 0], sizes = [1, 64], strides = [1, 1]} : vector<16x128xf32> to vector<1x64xf32>
    %203 = vector.extract_strided_slice %134 {offsets = [11, 64], sizes = [1, 64], strides = [1, 1]} : vector<16x128xf32> to vector<1x64xf32>
    %204 = tpu.concatenate %202, %203 in 0 : vector<1x64xf32>, vector<1x64xf32> -> vector<2x64xf32>
    %c704 = arith.constant 704 : index
    %c0_96 = arith.constant 0 : index
    %205 = vector.load %arg5[%c704, %c0_96] : memref<1024x120xf32, #tpu.memory_space<vmem>>, vector<64x120xf32>
    %cst_97 = arith.constant dense<0.000000e+00> : vector<2x120xf32>
    %206 = tpu.matmul %204, %205, %cst_97 {dimension_numbers = #tpu.dot_dimension_numbers<[1], [0], [0], [1], [0, 0, 1, 1], [], []>} : vector<2x64xf32>, vector<64x120xf32>, vector<2x120xf32> -> vector<2x120xf32>
    %207 = arith.addf %201, %206 : vector<2x120xf32>
    %208 = vector.extract_strided_slice %134 {offsets = [12, 0], sizes = [1, 64], strides = [1, 1]} : vector<16x128xf32> to vector<1x64xf32>
    %209 = vector.extract_strided_slice %134 {offsets = [12, 64], sizes = [1, 64], strides = [1, 1]} : vector<16x128xf32> to vector<1x64xf32>
    %210 = tpu.concatenate %208, %209 in 0 : vector<1x64xf32>, vector<1x64xf32> -> vector<2x64xf32>
    %c768 = arith.constant 768 : index
    %c0_98 = arith.constant 0 : index
    %211 = vector.load %arg5[%c768, %c0_98] : memref<1024x120xf32, #tpu.memory_space<vmem>>, vector<64x120xf32>
    %cst_99 = arith.constant dense<0.000000e+00> : vector<2x120xf32>
    %212 = tpu.matmul %210, %211, %cst_99 {dimension_numbers = #tpu.dot_dimension_numbers<[1], [0], [0], [1], [0, 0, 1, 1], [], []>} : vector<2x64xf32>, vector<64x120xf32>, vector<2x120xf32> -> vector<2x120xf32>
    %213 = arith.addf %207, %212 : vector<2x120xf32>
    %214 = vector.extract_strided_slice %134 {offsets = [13, 0], sizes = [1, 64], strides = [1, 1]} : vector<16x128xf32> to vector<1x64xf32>
    %215 = vector.extract_strided_slice %134 {offsets = [13, 64], sizes = [1, 64], strides = [1, 1]} : vector<16x128xf32> to vector<1x64xf32>
    %216 = tpu.concatenate %214, %215 in 0 : vector<1x64xf32>, vector<1x64xf32> -> vector<2x64xf32>
    %c832 = arith.constant 832 : index
    %c0_100 = arith.constant 0 : index
    %217 = vector.load %arg5[%c832, %c0_100] : memref<1024x120xf32, #tpu.memory_space<vmem>>, vector<64x120xf32>
    %cst_101 = arith.constant dense<0.000000e+00> : vector<2x120xf32>
    %218 = tpu.matmul %216, %217, %cst_101 {dimension_numbers = #tpu.dot_dimension_numbers<[1], [0], [0], [1], [0, 0, 1, 1], [], []>} : vector<2x64xf32>, vector<64x120xf32>, vector<2x120xf32> -> vector<2x120xf32>
    %219 = arith.addf %213, %218 : vector<2x120xf32>
    %220 = vector.extract_strided_slice %134 {offsets = [14, 0], sizes = [1, 64], strides = [1, 1]} : vector<16x128xf32> to vector<1x64xf32>
    %221 = vector.extract_strided_slice %134 {offsets = [14, 64], sizes = [1, 64], strides = [1, 1]} : vector<16x128xf32> to vector<1x64xf32>
    %222 = tpu.concatenate %220, %221 in 0 : vector<1x64xf32>, vector<1x64xf32> -> vector<2x64xf32>
    %c896 = arith.constant 896 : index
    %c0_102 = arith.constant 0 : index
    %223 = vector.load %arg5[%c896, %c0_102] : memref<1024x120xf32, #tpu.memory_space<vmem>>, vector<64x120xf32>
    %cst_103 = arith.constant dense<0.000000e+00> : vector<2x120xf32>
    %224 = tpu.matmul %222, %223, %cst_103 {dimension_numbers = #tpu.dot_dimension_numbers<[1], [0], [0], [1], [0, 0, 1, 1], [], []>} : vector<2x64xf32>, vector<64x120xf32>, vector<2x120xf32> -> vector<2x120xf32>
    %225 = arith.addf %219, %224 : vector<2x120xf32>
    %226 = vector.extract_strided_slice %134 {offsets = [15, 0], sizes = [1, 64], strides = [1, 1]} : vector<16x128xf32> to vector<1x64xf32>
    %227 = vector.extract_strided_slice %134 {offsets = [15, 64], sizes = [1, 64], strides = [1, 1]} : vector<16x128xf32> to vector<1x64xf32>
    %228 = tpu.concatenate %226, %227 in 0 : vector<1x64xf32>, vector<1x64xf32> -> vector<2x64xf32>
    %c960 = arith.constant 960 : index
    %c0_104 = arith.constant 0 : index
    %229 = vector.load %arg5[%c960, %c0_104] : memref<1024x120xf32, #tpu.memory_space<vmem>>, vector<64x120xf32>
    %cst_105 = arith.constant dense<0.000000e+00> : vector<2x120xf32>
    %230 = tpu.matmul %228, %229, %cst_105 {dimension_numbers = #tpu.dot_dimension_numbers<[1], [0], [0], [1], [0, 0, 1, 1], [], []>} : vector<2x64xf32>, vector<64x120xf32>, vector<2x120xf32> -> vector<2x120xf32>
    %231 = arith.addf %225, %230 : vector<2x120xf32>
    %c0_106 = arith.constant 0 : index
    %c0_107 = arith.constant 0 : index
    %232 = vector.load %arg6[%c0_106, %c0_107] : memref<1x120xf32, #tpu.memory_space<vmem>>, vector<1x120xf32>
    %233 = vector.broadcast %232 : vector<1x120xf32> to vector<2x120xf32>
    %234 = arith.addf %231, %233 : vector<2x120xf32>
    %cst_108 = arith.constant 0.000000e+00 : f32
    %235 = vector.broadcast %cst_108 : f32 to vector<2x120xf32>
    %236 = arith.maximumf %234, %235 : vector<2x120xf32>
    %c0_109 = arith.constant 0 : index
    %c0_110 = arith.constant 0 : index
    %237 = vector.load %arg7[%c0_109, %c0_110] : memref<120x84xf32, #tpu.memory_space<vmem>>, vector<120x84xf32>
    %cst_111 = arith.constant dense<0.000000e+00> : vector<2x84xf32>
    %238 = tpu.matmul %236, %237, %cst_111 {dimension_numbers = #tpu.dot_dimension_numbers<[1], [0], [0], [1], [0, 0, 1, 1], [], []>} : vector<2x120xf32>, vector<120x84xf32>, vector<2x84xf32> -> vector<2x84xf32>
    %c0_112 = arith.constant 0 : index
    %c0_113 = arith.constant 0 : index
    %239 = vector.load %arg8[%c0_112, %c0_113] : memref<1x84xf32, #tpu.memory_space<vmem>>, vector<1x84xf32>
    %240 = vector.broadcast %239 : vector<1x84xf32> to vector<2x84xf32>
    %241 = arith.addf %238, %240 : vector<2x84xf32>
    %cst_114 = arith.constant 0.000000e+00 : f32
    %242 = vector.broadcast %cst_114 : f32 to vector<2x84xf32>
    %243 = arith.maximumf %241, %242 : vector<2x84xf32>
    %c0_115 = arith.constant 0 : index
    %c0_116 = arith.constant 0 : index
    %244 = vector.load %arg9[%c0_115, %c0_116] : memref<84x10xf32, #tpu.memory_space<vmem>>, vector<84x10xf32>
    %cst_117 = arith.constant dense<0.000000e+00> : vector<2x10xf32>
    %245 = tpu.matmul %243, %244, %cst_117 {dimension_numbers = #tpu.dot_dimension_numbers<[1], [0], [0], [1], [0, 0, 1, 1], [], []>} : vector<2x84xf32>, vector<84x10xf32>, vector<2x10xf32> -> vector<2x10xf32>
    %c0_118 = arith.constant 0 : index
    %c0_119 = arith.constant 0 : index
    %246 = vector.load %arg10[%c0_118, %c0_119] : memref<1x10xf32, #tpu.memory_space<vmem>>, vector<1x10xf32>
    %247 = vector.broadcast %246 : vector<1x10xf32> to vector<2x10xf32>
    %248 = arith.addf %245, %247 : vector<2x10xf32>
    %c0_120 = arith.constant 0 : index
    %c0_121 = arith.constant 0 : index
    %249 = vector.load %arg11[%c0_120, %c0_121] : memref<2x10xf32, #tpu.memory_space<vmem>>, vector<2x10xf32>
    tpu.vector_store %arg11[%c0_120, %c0_121], %248 {strides = array<i32>} : memref<2x10xf32, #tpu.memory_space<vmem>>, vector<2x10xf32>,
    return
  }
}

</mosaic_0001>

<bundles_post_ra>
// kernel: net_forward.1
= control target key start
LH: loop header
LB: loop body
LE: loop exit
PB: predicated region body
PF: predicated region fallthrough
CT: control target
= control target key end

     0   :  { %s5424_s21 = smov 127   ;;  %s7054_s0 = inlined_call_operand.vmem [shape: f32[48,256], index: 0, kind: input, shape index: {}]   ;;  %s7055_s1 = inlined_call_operand.vmem [shape: f32[4,96,48], index: 1, kind: input, shape index: {}]   ;;  %s7056_s2 = inlined_call_operand.vmem [shape: f32[6,1], index: 2, kind: input, shape index: {}]   ;;  %s7057_s3 = inlined_call_operand.vmem [shape: f32[9,64,24], index: 3, kind: input, shape index: {}]   ;;  %s7058_s4 = inlined_call_operand.vmem [shape: f32[16,1], index: 4, kind: input, shape index: {}]   ;;  %s7059_s5 = inlined_call_operand.vmem [shape: f32[1024,120], index: 5, kind: input, shape index: {}]   ;;  %s7060_s6 = inlined_call_operand.vmem [shape: f32[1,120], index: 6, kind: input, shape index: {}]   ;;  %s7061_s7 = inlined_call_operand.vmem [shape: f32[120,84], index: 7, kind: input, shape index: {}]   ;;  %s7062_s8 = inlined_call_operand.vmem [shape: f32[1,84], index: 8, kind: input, shape index: {}]   ;;  %s7063_s9 = inlined_call_operand.vmem [shape: f32[84,10], index: 9, kind: input, shape index: {}]   ;;  %s7064_s10 = inlined_call_operand.vmem [shape: f32[1,10], index: 10, kind: input, shape index: {}]   ;;  %s7065_s11 = inlined_call_operand.hbm [shape: f32[2,10], index: 11, kind: output, shape index: {}]  }
   0x1   :  { %v49_v0 = vld [vmem:[%s7054_s0 + $0x50] sm:$0xff]  ;;  %v47_v1 = vld [vmem:[%s7054_s0 + $0x40] sm:$0xff]  ;;  %v50_v2 = vld [vmem:[%s7054_s0 + $0x58] sm:$0xff] }
   0x2   :  { %108 = vrot.lane.b32.xlu0 %v49_v0, %s5424_s21  ;;  %104 = vrot.lane.b32.xlu1 %v47_v1, %s5424_s21  ;;  %v48_v3 = vld [vmem:[%s7054_s0 + $0x48] sm:$0xff] }
   0x3   :  { %4731 = vmatprep.subr.mxu1 %v49_v0 }
   0x4   :  { %4732 = vmatpush3.msra.mxu1 %v49_v0 }
   0x5   :  { %4733 = vmatprep.subr.mxu1 %v47_v1 }
   0x6   :  { %16 = vsyncpa [#allocation4], 0  ;;  %110 = vrot.lane.b32.xlu0 %v50_v2, %s5424_s21  ;;  %106 = vrot.lane.b32.xlu1 %v48_v3, %s5424_s21  ;;  %v46_v4 = vld [vmem:[%s7054_s0 + $0x38] sm:$0xff]  ;;  %v45_v5 = vld [vmem:[%s7054_s0 + $0x30] sm:$0xff]  ;;  %vm125_vm0 = vcmask 392192   ;;  %s5425_s30 = smov 120  }
   0x7   :  { %4734 = vmatpush3.msra.mxu1 %v47_v1  ;;  %v5524_v6 = vld [vmem:[%s7054_s0 + $0x20] sm:$0xff]  ;;  %v44_v7 = vld [vmem:[%s7054_s0 + $0x28] sm:$0xff]  ;;  %v5533_v8 = vld [vmem:[%s7054_s0 + $0x10] sm:$0xff]  ;;  %v5427_v27 = vmov 0   ;;  %vm112_vm1 = vcmask 1039360   ;;  %vm485_vm2 = vcmask 982016  }
   0x8   :  { %4735 = vmatprep.subr.mxu1 %v45_v5  ;;  %v4116_v9 = vld [vmem:[%s7055_s1 + $0x60] sm:$0xff]  ;;  %v42_v10 = vld [vmem:[%s7054_s0 + $0x18] sm:$0xff]  ;;  %v40_v12 = vld [vmem:[%s7054_s0 + $0x8] sm:$0xff]  ;;  %5358 = vset.pattern.permute.xlu0 %v5427_v27  ;;  %vm708_vm3 = vcmask 973824   ;;  %vm902_vm4 = vcmask 1041408   ;;  %vm909_vm5 = vcmask 1043456  }
   0x9   :  { %4736 = vmatpush3.msra.mxu1 %v45_v5  ;;  %4713 = vmatprep.mubr.msk.f32.mxu0 %vm125_vm0, %v4116_v9  ;;  %v39_v11 = vld [vmem:[%s7054_s0] sm:$0xff]  ;;  %v52_v14 = vld [vmem:[%s7055_s1 + $0x8] sm:$0xff]  ;;  %s5426_s0 = smov 119   ;;  %v53_v15 = vld [vmem:[%s7055_s1 + $0x10] sm:$0xff]  ;;  %vm1060_vm6 = vcmask 195584   ;;  %s5429_s23 = smov 126  }
   0xa   :  { %102 = vrot.lane.b32.xlu1 %v46_v4, %s5424_s21  ;;  %100 = vrot.lane.b32.xlu0 %v45_v5, %s5424_s21  ;;  %v51_v13 = vld [vmem:[%s7055_s1] sm:$0xff]  ;;  %v54_v16 = vld [vmem:[%s7055_s1 + $0x18] sm:$0xff]  ;;  %s5430_s22 = smov 118   ;;  %s5432_s24 = smov 111   ;;  %vm1340_vm7 = vcmask 1031168   ;;  %vm1998_vm8 = vcmask 916480  }
   0xb   :  { %4737 = vmatprep.subr.mxu1 %v5524_v6  ;;  %4743 = vmatprep.mubr.msk.f32.mxu1 %vm125_vm0, %v51_v13  ;;  %v55_v17 = vld [vmem:[%s7055_s1 + $0x20] sm:$0xff]  ;;  %v56_v18 = vld [vmem:[%s7055_s1 + $0x28] sm:$0xff]  ;;  %v57_v19 = vld [vmem:[%s7055_s1 + $0x30] sm:$0xff]  ;;  %vm1833_vm9 = vcmask 965632   ;;  %vm2328_vm10 = vcmask 900096   ;;  %vm2163_vm11 = vcmask 908288  }
   0xc   :  { %4738 = vmatpush3.msra.mxu1 %v5524_v6  ;;  %v58_v20 = vld [vmem:[%s7055_s1 + $0x38] sm:$0xff]  ;;  %v59_v21 = vld [vmem:[%s7055_s1 + $0x40] sm:$0xff]  ;;  %v60_v22 = vld [vmem:[%s7055_s1 + $0x48] sm:$0xff]  ;;  %5359 = vset.pattern.permute.xlu1 %v5427_v27  ;;  %vm5434_vm12 = vmmov 0   ;;  %vm2499_vm13 = vcmask 1040384   ;;  %vm2523_vm14 = vcmask 523264  }
   0xd   :  { %4739 = vmatprep.subr.mxu1 %v5533_v8  ;;  %v61_v23 = vld [vmem:[%s7055_s1 + $0x50] sm:$0xff]  ;;  %v62_v24 = vld [vmem:[%s7055_s1 + $0x58] sm:$0xff]  ;;  %v4176_v25 = vld [vmem:[%s7055_s1 + $0x120] sm:$0xff]  ;;  %vm4023_vm15 = vcmask 687104   ;;  %s5436_s14 = smov [#allocation3]  }
   0xe   :  { %98 = vrot.lane.b32.xlu1 %v44_v7, %s5424_s21  ;;  %96 = vrot.lane.b32.xlu0 %v5524_v6, %s5424_s21  ;;  %v972_v26 = vld [vmem:[%s7056_s2] sm:$0x3f]  ;;  %v4117_v49 = vld [vmem:[%s7055_s1 + $0x68] sm:$0xff]  ;;  %s4108_s15 = sshll.u32 %s5436_s14, 4  ;;  %s4109_s15 = int_to_ptr.vmem [resolvable:$true] %s4108_s15 }
   0xf   :  { %4740 = vmatpush3.msra.mxu1 %v5533_v8  ;;  %v1001_v28 = vld [vmem:[%s7056_s2] sm:$0x3f]  ;;  %v4118_v50 = vld [vmem:[%s7055_s1 + $0x70] sm:$0xff]  ;;  %v4119_v54 = vld [vmem:[%s7055_s1 + $0x78] sm:$0xff]  ;;  %p5407_p1 = scmp.lt.s32.totalorder %s4109_s15, %s4109_s15 }
  0x10   :  { %4741 = vmatprep.subr.mxu1 %v39_v11  ;;  %v918_v29 = vld [vmem:[%s7056_s2] sm:$0x3f]  ;;  %v4121_v59 = vld [vmem:[%s7055_s1 + $0x88] sm:$0xff]  ;;  %v4122_v60 = vld [vmem:[%s7055_s1 + $0x90] sm:$0xff] }
  0x11   :  { %4742 = vmatpush3.msra.mxu1 %v39_v11  ;;  %v943_v30 = vld [vmem:[%s7056_s2] sm:$0x3f]  ;;  %v4153_v27 = vld [vmem:[%s7055_s1 + $0xc8] sm:$0xff] }
  0x12   :  { %94 = vrot.lane.b32.xlu1 %v42_v10, %s5424_s21  ;;  %92 = vrot.lane.b32.xlu0 %v5533_v8, %s5424_s21  ;;  %v4120_v55 = vld [vmem:[%s7055_s1 + $0x80] sm:$0xff] }
  0x13   :  { %4744 = vmatmul.mubr.msk.f32.vlgmr.msra.gmra.mxu1 %vm125_vm0, %v52_v14 }
  0x14   :  { %4746 = vmatprep.mubr.msk.f32.mxu1 %vm125_vm0, %v53_v15 }
  0x16   :  { %90 = vrot.lane.b32.xlu1 %v40_v12, %s5424_s21  ;;  %88 = vrot.lane.b32.xlu0 %v39_v11, %s5424_s21 }
  0x17   :  { %4747 = vmatmul.mubr.msk.f32.gmra.mxu1 %vm125_vm0, %v54_v16 }
  0x18   :  { %4749 = vmatprep.mubr.msk.f32.mxu1 %vm125_vm0, %v55_v17 }
  0x1a   :  { %483 = vrot.lane.b32.xlu1 %v50_v2, %s5425_s30  ;;  %481 = vrot.lane.b32.xlu0 %v49_v0, %s5425_s30 }
  0x1b   :  { %4750 = vmatmul.mubr.msk.f32.gmra.mxu1 %vm125_vm0, %v56_v18 }
  0x1c   :  { %4752 = vmatprep.mubr.msk.f32.mxu1 %vm125_vm0, %v57_v19 }
  0x1e   :  { %479 = vrot.lane.b32.xlu1 %v48_v3, %s5425_s30  ;;  %477 = vrot.lane.b32.xlu0 %v47_v1, %s5425_s30 }
  0x1f   :  { %4753 = vmatmul.mubr.msk.f32.gmra.mxu1 %vm125_vm0, %v58_v20 }
  0x20   :  { %4755 = vmatprep.mubr.msk.f32.mxu1 %vm125_vm0, %v59_v21 }
  0x22   :  { %706 = vrot.lane.b32.xlu1 %v50_v2, %s5426_s0  ;;  %704 = vrot.lane.b32.xlu0 %v49_v0, %s5426_s0  ;;  %v4123_v0 = vld [vmem:[%s7055_s1 + $0x98] sm:$0xff] }
  0x23   :  { %4756 = vmatmul.mubr.msk.f32.gmra.mxu1 %vm125_vm0, %v60_v22 }
  0x24   :  { %4758 = vmatprep.mubr.msk.f32.mxu1 %vm125_vm0, %v61_v23 }
  0x26   :  { %475 = vrot.lane.b32.xlu1 %v46_v4, %s5425_s30  ;;  %473 = vrot.lane.b32.xlu0 %v45_v5, %s5425_s30 }
  0x27   :  { %4759 = vmatmul.mubr.msk.f32.gmra.mxu1 %vm125_vm0, %v62_v24 }
  0x28   :  { %4803 = vmatprep.mubr.msk.f32.mxu1 %vm125_vm0, %v4176_v25 }
  0x2a   :  { %702 = vrot.lane.b32.xlu1 %v48_v3, %s5426_s0  ;;  %700 = vrot.lane.b32.xlu0 %v47_v1, %s5426_s0  ;;  %v4124_v1 = vld [vmem:[%s7055_s1 + $0xa0] sm:$0xff] }
  0x2e   :  { %471 = vrot.lane.b32.xlu1 %v44_v7, %s5425_s30  ;;  %469 = vrot.lane.b32.xlu0 %v5524_v6, %s5425_s30 }
  0x32   :  { %698 = vrot.lane.b32.xlu1 %v46_v4, %s5426_s0  ;;  %696 = vrot.lane.b32.xlu0 %v45_v5, %s5426_s0  ;;  %v4125_v5 = vld [vmem:[%s7055_s1 + $0xa8] sm:$0xff] }
  0x36   :  { %467 = vrot.lane.b32.xlu1 %v42_v10, %s5425_s30  ;;  %465 = vrot.lane.b32.xlu0 %v5533_v8, %s5425_s30 }
  0x3a   :  { %694 = vrot.lane.b32.xlu1 %v44_v7, %s5426_s0  ;;  %692 = vrot.lane.b32.xlu0 %v5524_v6, %s5426_s0  ;;  %v4126_v6 = vld [vmem:[%s7055_s1 + $0xb0] sm:$0xff] }
  0x3e   :  { %463 = vrot.lane.b32.xlu1 %v40_v12, %s5425_s30  ;;  %461 = vrot.lane.b32.xlu0 %v39_v11, %s5425_s30 }
  0x42   :  { %690 = vrot.lane.b32.xlu1 %v42_v10, %s5426_s0  ;;  %688 = vrot.lane.b32.xlu0 %v5533_v8, %s5426_s0  ;;  %v4127_v10 = vld [vmem:[%s7055_s1 + $0xb8] sm:$0xff] }
  0x46   :  { %686 = vrot.lane.b32.xlu1 %v40_v12, %s5426_s0  ;;  %684 = vrot.lane.b32.xlu0 %v39_v11, %s5426_s0  ;;  %v4152_v11 = vld [vmem:[%s7055_s1 + $0xc0] sm:$0xff] }
  0x4a   :  { %975 = vperm.xlu0 %5358, %v972_v26   ;;  %1004 = vperm.xlu1 %5359, %v1001_v28   ;;  %v4154_v28 = vld [vmem:[%s7055_s1 + $0xd0] sm:$0xff] }
  0x4e   :  { %921 = vperm.xlu0 %5358, %v918_v29   ;;  %946 = vperm.xlu1 %5359, %v943_v30  }
  0x74   :  { %v109_v31 = vpop.permute.xlu0 %108  ;;  %v105_v32 = vpop.permute.xlu1 %104 }
  0x78   :  { %v111_v33 = vpop.permute.xlu0 %110  ;;  %v107_v34 = vpop.permute.xlu1 %106 }
  0x79   :  { %v118_v35 = vsel %vm112_vm1, %v109_v31, %v111_v33  ;;  %v117_v36 = vsel %vm112_vm1, %v105_v32, %v107_v34  ;;  %v4155_v32 = vld [vmem:[%s7055_s1 + $0xd8] sm:$0xff]  ;;  %v4156_v33 = vld [vmem:[%s7055_s1 + $0xe0] sm:$0xff] }
  0x7a   :  { %4701 = vmatprep.subr.mxu0 %v118_v35 }
  0x7b   :  { %4702 = vmatpush3.msra.mxu0 %v118_v35 }
  0x7c   :  { %4703 = vmatprep.subr.mxu0 %v117_v36  ;;  %v103_v37 = vpop.permute.xlu1 %102  ;;  %v101_v38 = vpop.permute.xlu0 %100 }
  0x7d   :  { %4704 = vmatpush3.msra.mxu0 %v117_v36  ;;  %v116_v39 = vsel %vm112_vm1, %v101_v38, %v103_v37  ;;  %v4157_v37 = vld [vmem:[%s7055_s1 + $0xe8] sm:$0xff] }
  0x7e   :  { %4705 = vmatprep.subr.mxu0 %v116_v39  ;;  %v4177_v38 = vld [vmem:[%s7055_s1 + $0x128] sm:$0xff] }
  0x7f   :  { %4706 = vmatpush3.msra.mxu0 %v116_v39  ;;  %v4158_v39 = vld [vmem:[%s7055_s1 + $0xf0] sm:$0xff] }
  0x80   :  { %v99_v40 = vpop.permute.xlu1 %98  ;;  %v97_v41 = vpop.permute.xlu0 %96 }
  0x81   :  { %v115_v42 = vsel %vm112_vm1, %v97_v41, %v99_v40  ;;  %v4178_v40 = vld [vmem:[%s7055_s1 + $0x130] sm:$0xff]  ;;  %v4159_v41 = vld [vmem:[%s7055_s1 + $0xf8] sm:$0xff] }
  0x82   :  { %4707 = vmatprep.subr.mxu0 %v115_v42 }
  0x83   :  { %4708 = vmatpush3.msra.mxu0 %v115_v42  ;;  %v4179_v42 = vld [vmem:[%s7055_s1 + $0x138] sm:$0xff] }
  0x84   :  { %v95_v43 = vpop.permute.xlu1 %94  ;;  %v93_v44 = vpop.permute.xlu0 %92 }
  0x85   :  { %v114_v45 = vsel %vm112_vm1, %v93_v44, %v95_v43  ;;  %v4160_v43 = vld [vmem:[%s7055_s1 + $0x100] sm:$0xff] }
  0x86   :  { %4709 = vmatprep.subr.mxu0 %v114_v45  ;;  %v4180_v44 = vld [vmem:[%s7055_s1 + $0x140] sm:$0xff] }
  0x87   :  { %4710 = vmatpush3.msra.mxu0 %v114_v45  ;;  %v4161_v45 = vld [vmem:[%s7055_s1 + $0x108] sm:$0xff] }
  0x88   :  { %v91_v46 = vpop.permute.xlu1 %90  ;;  %v89_v47 = vpop.permute.xlu0 %88 }
  0x89   :  { %v113_v48 = vsel %vm112_vm1, %v89_v47, %v91_v46  ;;  %v4181_v46 = vld [vmem:[%s7055_s1 + $0x148] sm:$0xff]  ;;  %v4162_v47 = vld [vmem:[%s7055_s1 + $0x110] sm:$0xff] }
  0x8a   :  { %4711 = vmatprep.subr.mxu0 %v113_v48 }
  0x8b   :  { %4712 = vmatpush3.msra.mxu0 %v113_v48  ;;  %v4182_v48 = vld [vmem:[%s7055_s1 + $0x150] sm:$0xff] }
  0x8c   :  { %v484_v51 = vpop.permute.xlu1 %483  ;;  %v482_v52 = vpop.permute.xlu0 %481  ;;  %4714 = vmatmul.mubr.msk.f32.vlgmr.msra.gmra.mxu0 %vm125_vm0, %v4117_v49  ;;  %v4163_v49 = vld [vmem:[%s7055_s1 + $0x118] sm:$0xff] }
  0x8d   :  { %v491_v53 = vsel %vm485_vm2, %v482_v52, %v484_v51  ;;  %4716 = vmatprep.mubr.msk.f32.mxu0 %vm125_vm0, %v4118_v50  ;;  %v4183_v50 = vld [vmem:[%s7055_s1 + $0x158] sm:$0xff]  ;;  %v4184_v51 = vld [vmem:[%s7055_s1 + $0x160] sm:$0xff]  ;;  %v4185_v52 = vld [vmem:[%s7055_s1 + $0x168] sm:$0xff] }
  0x8e   :  { %4761 = vmatprep.subr.mxu0 %v491_v53 }
  0x8f   :  { %4762 = vmatpush3.msra.mxu0 %v491_v53  ;;  %v4186_v53 = vld [vmem:[%s7055_s1 + $0x170] sm:$0xff] }
  0x90   :  { %v480_v56 = vpop.permute.xlu1 %479  ;;  %v478_v57 = vpop.permute.xlu0 %477  ;;  %4717 = vmatmul.mubr.msk.f32.gmra.mxu0 %vm125_vm0, %v4119_v54  ;;  %v4187_v54 = vld [vmem:[%s7055_s1 + $0x178] sm:$0xff] }
  0x91   :  { %v490_v58 = vsel %vm485_vm2, %v478_v57, %v480_v56  ;;  %4719 = vmatprep.mubr.msk.f32.mxu0 %vm125_vm0, %v4120_v55  ;;  %v5428_v55 = vmov 0.0  }
  0x92   :  { %4763 = vmatprep.subr.mxu0 %v490_v58  ;;  %894 = vst [vmem:[#allocation2 + $0x28] sm:$0xff] %v5428_v55  ;;  %895 = vst [vmem:[#allocation2 + $0x10] sm:$0xff] %v5428_v55  ;;  %1044 = vrot.lane.b32.xlu1 %v5428_v55, %s5424_s21 }
  0x93   :  { %4764 = vmatpush3.msra.mxu0 %v490_v58  ;;  %896 = vst [vmem:[#allocation2 + $0x8] sm:$0xff] %v5428_v55  ;;  %898 = vst [vmem:[#allocation2 + $0x18] sm:$0xff] %v5428_v55  ;;  %5361 = vrot.lane.b32.xlu0 %v5428_v55, %s5424_s21 }
  0x94   :  { %v707_v61 = vpop.permute.xlu1 %706  ;;  %v705_v62 = vpop.permute.xlu0 %704  ;;  %4720 = vmatmul.mubr.msk.f32.gmra.mxu0 %vm125_vm0, %v4121_v59 }
  0x95   :  { %v714_v63 = vsel %vm708_vm3, %v705_v62, %v707_v61  ;;  %4722 = vmatprep.mubr.msk.f32.mxu0 %vm125_vm0, %v4122_v60 }
  0x96   :  { %4791 = vmatprep.subr.mxu1 %v714_v63 }
  0x97   :  { %4792 = vmatpush3.msra.mxu1 %v714_v63 }
  0x98   :  { %v476_v2 = vpop.permute.xlu1 %475  ;;  %v474_v3 = vpop.permute.xlu0 %473  ;;  %4723 = vmatmul.mubr.msk.f32.gmra.mxu0 %vm125_vm0, %v4123_v0 }
  0x99   :  { %v489_v4 = vsel %vm485_vm2, %v474_v3, %v476_v2  ;;  %4725 = vmatprep.mubr.msk.f32.mxu0 %vm125_vm0, %v4124_v1 }
  0x9a   :  { %4765 = vmatprep.subr.mxu0 %v489_v4 }
  0x9b   :  { %4766 = vmatpush3.msra.mxu0 %v489_v4 }
  0x9c   :  { %v703_v7 = vpop.permute.xlu1 %702  ;;  %v701_v8 = vpop.permute.xlu0 %700  ;;  %4726 = vmatmul.mubr.msk.f32.gmra.mxu0 %vm125_vm0, %v4125_v5 }
  0x9d   :  { %v713_v9 = vsel %vm708_vm3, %v701_v8, %v703_v7  ;;  %4728 = vmatprep.mubr.msk.f32.mxu0 %vm125_vm0, %v4126_v6 }
  0x9e   :  { %4793 = vmatprep.subr.mxu1 %v713_v9 }
  0x9f   :  { %4794 = vmatpush3.msra.mxu1 %v713_v9 }
  0xa0   :  { %v472_v12 = vpop.permute.xlu1 %471  ;;  %v470_v13 = vpop.permute.xlu0 %469  ;;  %4729 = vmatmul.mubr.msk.f32.gmra.mxu0 %vm125_vm0, %v4127_v10 }
  0xa1   :  { %v488_v14 = vsel %vm485_vm2, %v470_v13, %v472_v12  ;;  %4773 = vmatprep.mubr.msk.f32.mxu0 %vm125_vm0, %v4152_v11 }
  0xa2   :  { %4767 = vmatprep.subr.mxu0 %v488_v14 }
  0xa3   :  { %4768 = vmatpush3.msra.mxu0 %v488_v14 }
  0xa4   :  { %v699_v15 = vpop.permute.xlu1 %698  ;;  %v697_v16 = vpop.permute.xlu0 %696 }
  0xa5   :  { %v712_v17 = vsel %vm708_vm3, %v697_v16, %v699_v15 }
  0xa6   :  { %4795 = vmatprep.subr.mxu1 %v712_v17 }
  0xa7   :  { %4796 = vmatpush3.msra.mxu1 %v712_v17 }
  0xa8   :  { %v468_v18 = vpop.permute.xlu1 %467  ;;  %v466_v19 = vpop.permute.xlu0 %465 }
  0xa9   :  { %v487_v20 = vsel %vm485_vm2, %v466_v19, %v468_v18 }
  0xaa   :  { %4769 = vmatprep.subr.mxu0 %v487_v20 }
  0xab   :  { %4770 = vmatpush3.msra.mxu0 %v487_v20 }
  0xac   :  { %v695_v21 = vpop.permute.xlu1 %694  ;;  %v693_v22 = vpop.permute.xlu0 %692 }
  0xad   :  { %v711_v23 = vsel %vm708_vm3, %v693_v22, %v695_v21 }
  0xae   :  { %4797 = vmatprep.subr.mxu1 %v711_v23 }
  0xaf   :  { %4798 = vmatpush3.msra.mxu1 %v711_v23 }
  0xb0   :  { %v464_v24 = vpop.permute.xlu1 %463  ;;  %v462_v25 = vpop.permute.xlu0 %461 }
  0xb1   :  { %v486_v26 = vsel %vm485_vm2, %v462_v25, %v464_v24 }
  0xb2   :  { %4771 = vmatprep.subr.mxu0 %v486_v26 }
  0xb3   :  { %4772 = vmatpush3.msra.mxu0 %v486_v26 }
  0xb4   :  { %v691_v29 = vpop.permute.xlu1 %690  ;;  %4774 = vmatmul.mubr.msk.f32.vlgmr.msra.gmra.mxu0 %vm125_vm0, %v4153_v27  ;;  %v689_v30 = vpop.permute.xlu0 %688 }
  0xb5   :  { %v710_v31 = vsel %vm708_vm3, %v689_v30, %v691_v29  ;;  %4776 = vmatprep.mubr.msk.f32.mxu0 %vm125_vm0, %v4154_v28 }
  0xb6   :  { %4799 = vmatprep.subr.mxu1 %v710_v31 }
  0xb7   :  { %4800 = vmatpush3.msra.mxu1 %v710_v31 }
  0xb8   :  { %v687_v34 = vpop.permute.xlu1 %686  ;;  %4777 = vmatmul.mubr.msk.f32.gmra.mxu0 %vm125_vm0, %v4155_v32  ;;  %v685_v35 = vpop.permute.xlu0 %684 }
  0xb9   :  { %v709_v36 = vsel %vm708_vm3, %v685_v35, %v687_v34  ;;  %4779 = vmatprep.mubr.msk.f32.mxu0 %vm125_vm0, %v4156_v33 }
  0xba   :  { %4801 = vmatprep.subr.mxu1 %v709_v36 }
  0xbb   :  { %4802 = vmatpush3.msra.mxu1 %v709_v36 }
  0xbc   :  { %4780 = vmatmul.mubr.msk.f32.gmra.mxu0 %vm125_vm0, %v4157_v37  ;;  %4804 = vmatmul.mubr.msk.f32.vlgmr.msra.gmra.mxu1 %vm125_vm0, %v4177_v38 }
  0xbd   :  { %4782 = vmatprep.mubr.msk.f32.mxu0 %vm125_vm0, %v4158_v39  ;;  %4806 = vmatprep.mubr.msk.f32.mxu1 %vm125_vm0, %v4178_v40 }
  0xc0   :  { %4783 = vmatmul.mubr.msk.f32.gmra.mxu0 %vm125_vm0, %v4159_v41  ;;  %4807 = vmatmul.mubr.msk.f32.gmra.mxu1 %vm125_vm0, %v4179_v42 }
  0xc1   :  { %4785 = vmatprep.mubr.msk.f32.mxu0 %vm125_vm0, %v4160_v43  ;;  %4809 = vmatprep.mubr.msk.f32.mxu1 %vm125_vm0, %v4180_v44 }
  0xc4   :  { %4786 = vmatmul.mubr.msk.f32.gmra.mxu0 %vm125_vm0, %v4161_v45  ;;  %4810 = vmatmul.mubr.msk.f32.gmra.mxu1 %vm125_vm0, %v4181_v46 }
  0xc5   :  { %4788 = vmatprep.mubr.msk.f32.mxu0 %vm125_vm0, %v4162_v47  ;;  %4812 = vmatprep.mubr.msk.f32.mxu1 %vm125_vm0, %v4182_v48 }
  0xc8   :  { %4789 = vmatmul.mubr.msk.f32.gmra.mxu0 %vm125_vm0, %v4163_v49  ;;  %4813 = vmatmul.mubr.msk.f32.gmra.mxu1 %vm125_vm0, %v4183_v50  ;;  %v5828_v50 = vpop.permute.xlu0 %975 }
  0xc9   :  { %4815 = vmatprep.mubr.msk.f32.mxu1 %vm125_vm0, %v4184_v51 }
  0xcc   :  { %4816 = vmatmul.mubr.msk.f32.gmra.mxu1 %vm125_vm0, %v4185_v52 }
  0xcd   :  { %4818 = vmatprep.mubr.msk.f32.mxu1 %vm125_vm0, %v4186_v53 }
  0xd0   :  { %4819 = vmatmul.mubr.msk.f32.gmra.mxu1 %vm125_vm0, %v4187_v54  ;;  %vm4100_vm0 = vcmask 74752  }
  0xd3   :  { %v4745_v58 = vpop.f32.mrf.mxu1 }
  0xd5   :  { %v389_v61 = vpop.f32.mrf.mxu1 }
  0xd7   :  { %v4748_v63 = vpop.f32.mrf.mxu1 }
  0xd9   :  { %v399_v1 = vpop.f32.mrf.mxu1 }
  0xdb   :  { %v4751_v3 = vpop.f32.mrf.mxu1 }
  0xdd   :  { %v409_v5 = vpop.f32.mrf.mxu1 }
  0xdf   :  { %v4754_v7 = vpop.f32.mrf.mxu1 }
  0xe1   :  { %v419_v9 = vpop.f32.mrf.mxu1 }
  0xe3   :  { %v5819_v11 = vpop.f32.mrf.mxu1 }
  0xe5   :  { %v429_v13 = vpop.f32.mrf.mxu1 }
  0xe7   :  { %v5823_v15 = vpop.f32.mrf.mxu1 }
  0xe9   :  { %v5825_v18 = vpop.f32.mrf.mxu1 }
 0x14c   :  { %v4715_v56 = vpop.f32.mrf.mxu0 }
 0x14d   :  { %v395_v20 = vadd.f32 %v4745_v58, %v4715_v56 }
 0x14e   :  { %v228_v57 = vpop.f32.mrf.mxu0 }
 0x14f   :  { %v390_v21 = vadd.f32 %v389_v61, %v228_v57 }
 0x150   :  { %v4718_v59 = vpop.f32.mrf.mxu0 }
 0x151   :  { %v405_v33 = vadd.f32 %v4748_v63, %v4718_v59 }
 0x152   :  { %v238_v60 = vpop.f32.mrf.mxu0 }
 0x153   :  { %v400_v28 = vadd.f32 %v399_v1, %v238_v60 }
 0x154   :  { %v4721_v62 = vpop.f32.mrf.mxu0 }
 0x155   :  { %v415_v36 = vadd.f32 %v4751_v3, %v4721_v62  ;;  %v5831_v3 = vpop.permute.xlu1 %1004 }
 0x156   :  { %v248_v0 = vpop.f32.mrf.mxu0 }
 0x157   :  { %v410_v39 = vadd.f32 %v409_v5, %v248_v0 }
 0x158   :  { %v4724_v2 = vpop.f32.mrf.mxu0 }
 0x159   :  { %v425_v51 = vadd.f32 %v4754_v7, %v4724_v2 }
 0x15a   :  { %v258_v4 = vpop.f32.mrf.mxu0 }
 0x15b   :  { %v420_v58 = vadd.f32 %v419_v9, %v258_v4  ;;  %v922_v9 = vpop.permute.xlu0 %921 }
 0x15c   :  { %v5813_v6 = vpop.f32.mrf.mxu0 }
 0x15e   :  { %v5815_v8 = vpop.f32.mrf.mxu0 }
 0x160   :  { %v5817_v10 = vpop.f32.mrf.mxu0 }
 0x162   :  { %v5821_v12 = vpop.f32.mrf.mxu0 }
 0x174   :  { %v4775_v14 = vpop.f32.mrf.mxu0 }
 0x175   :  { %v660_v24 = vadd.f32 %v4775_v14, %v395_v20 }
 0x176   :  { %v600_v16 = vpop.f32.mrf.mxu0 }
 0x177   :  { %v659_v25 = vadd.f32 %v600_v16, %v390_v21  ;;  %v435_v21 = vadd.f32 %v5819_v11, %v5813_v6  ;;  %v440_v6 = vadd.f32 %v5825_v18, %v5821_v12 }
 0x178   :  { %v4778_v17 = vpop.f32.mrf.mxu0 }
 0x179   :  { %v662_v40 = vadd.f32 %v4778_v17, %v405_v33 }
 0x17a   :  { %v610_v19 = vpop.f32.mrf.mxu0 }
 0x17b   :  { %v661_v34 = vadd.f32 %v610_v19, %v400_v28  ;;  %v430_v19 = vadd.f32 %v429_v13, %v5815_v8 }
 0x17c   :  { %v4781_v22 = vpop.f32.mrf.mxu0  ;;  %v4805_v23 = vpop.f32.mrf.mxu1 }
 0x17d   :  { %v883_v29 = vadd.f32 %v4805_v23, %v660_v24  ;;  %v664_v43 = vadd.f32 %v4781_v22, %v415_v36 }
 0x17e   :  { %v620_v26 = vpop.f32.mrf.mxu0  ;;  %v823_v27 = vpop.f32.mrf.mxu1 }
 0x17f   :  { %v882_v30 = vadd.f32 %v823_v27, %v659_v25  ;;  %v904_v41 = vrot.slane %v883_v29, 6  ;;  %v663_v46 = vadd.f32 %v620_v26, %v410_v39  ;;  %v910_v52 = vrot.slane %v883_v29, 4 }
 0x180   :  { %v4784_v31 = vpop.f32.mrf.mxu0  ;;  %v4808_v32 = vpop.f32.mrf.mxu1  ;;  %v445_v26 = vadd.f32 %v5823_v15, %v5817_v10 }
 0x181   :  { %v903_v35 = vrot.slane %v882_v30, 6  ;;  %v885_v48 = vadd.f32 %v4808_v32, %v662_v40  ;;  %v666_v60 = vadd.f32 %v4784_v31, %v425_v51 }
 0x182   :  { %v630_v37 = vpop.f32.mrf.mxu0  ;;  %v833_v38 = vpop.f32.mrf.mxu1 }
 0x183   :  { %v884_v42 = vadd.f32 %v833_v38, %v661_v34  ;;  %v905_v47 = vsel %vm902_vm4, %v903_v35, %v904_v41  ;;  %v929_v63 = vrot.slane %v885_v48, 6  ;;  %v665_v5 = vadd.f32 %v630_v37, %v420_v58  ;;  %v947_v35 = vpop.permute.xlu1 %946 }
 0x184   :  { %v4787_v44 = vpop.f32.mrf.mxu0  ;;  %v4811_v45 = vpop.f32.mrf.mxu1  ;;  %v907_v59 = vmax.f32 %v882_v30, %v905_v47 }
 0x185   :  { %v911_v49 = vrot.slane %v884_v42, 4  ;;  %v887_v56 = vadd.f32 %v4811_v45, %v664_v43  ;;  %v915_v14 = vrot.slane %v884_v42, 2  ;;  %v668_v11 = vadd.f32 %v4787_v44, %v435_v21  ;;  %v1023_v21 = vld [vmem:[%s7057_s3 + $0x20] sm:$0xff] }
 0x186   :  { %v640_v53 = vpop.f32.mrf.mxu0  ;;  %v843_v54 = vpop.f32.mrf.mxu1 }
 0x187   :  { %v886_v57 = vadd.f32 %v843_v54, %v663_v46  ;;  %v912_v62 = vsel %vm909_vm5, %v910_v52, %v911_v49  ;;  %v936_v20 = vrot.slane %v887_v56, 4  ;;  %v940_v27 = vrot.slane %v887_v56, 2 }
 0x188   :  { %v4814_v61 = vpop.f32.mrf.mxu1  ;;  %v4790_v16 = vpop.f32.mrf.mxu0  ;;  %v914_v17 = vmax.f32 %v907_v59, %v912_v62  ;;  %v667_v28 = vadd.f32 %v640_v53, %v430_v19 }
 0x189   :  { %v930_v0 = vrot.slane %v886_v57, 6  ;;  %v935_v1 = vrot.slane %v886_v57, 4  ;;  %v889_v2 = vadd.f32 %v4814_v61, %v666_v60  ;;  %v670_v36 = vadd.f32 %v4790_v16, %v445_v26  ;;  %v2479_v26 = vld [vmem:[%s7058_s4 + $0x8] sm:$0xff] }
 0x18a   :  { %v853_v7 = vpop.f32.mrf.mxu1  ;;  %v917_v23 = vmax.f32 %v914_v17, %v915_v14  ;;  %v650_v8 = vpop.f32.mrf.mxu0  ;;  %v4200_v17 = vld [vmem:[%s7057_s3 + $0x40] sm:$0xff] }
 0x18b   :  { %v931_v4 = vsel %vm902_vm4, %v929_v63, %v930_v0  ;;  %v888_v22 = vadd.f32 %v853_v7, %v665_v5  ;;  %v937_v29 = vsel %vm909_vm5, %v935_v1, %v936_v20  ;;  %v959_v30 = vrot.slane %v889_v2, 6  ;;  %4827 = vmatprep.mubr.msk.f32.mxu0 %vm1060_vm6, %v4200_v17  ;;  %v1020_v20 = vld [vmem:[%s7057_s3 + $0x8] sm:$0xff] }
 0x18c   :  { %v4817_v24 = vpop.f32.mrf.mxu1  ;;  %v933_v25 = vmax.f32 %v885_v48, %v931_v4  ;;  %v924_v31 = vadd.f32 %v922_v9, %v917_v23  ;;  %v964_v39 = vrot.slane %v889_v2, 4  ;;  %v669_v40 = vadd.f32 %v650_v8, %v440_v6  ;;  %v1021_v4 = vld [vmem:[%s7057_s3 + $0x10] sm:$0xff]  ;;  %v1022_v9 = vld [vmem:[%s7057_s3 + $0x18] sm:$0xff]  ;;  %v4229_v17 = vld [vmem:[%s7057_s3 + $0xa8] sm:$0xff] }
 0x18d   :  { %v958_v13 = vrot.slane %v888_v22, 6  ;;  %v891_v41 = vadd.f32 %v4817_v24, %v668_v11  ;;  %v1025_v23 = vld [vmem:[%s7057_s3 + $0x30] sm:$0xff]  ;;  %v1026_v24 = vld [vmem:[%s7057_s3 + $0x38] sm:$0xff] }
 0x18e   :  { %v863_v32 = vpop.f32.mrf.mxu1  ;;  %v939_v33 = vmax.f32 %v933_v25, %v937_v29  ;;  %v925_v10 = vmax.f32 %v924_v31, 0.0  ;;  %v4240_v25 = vld [vmem:[%s7057_s3 + $0xc0] sm:$0xff] }
 0x18f   :  { %v890_v34 = vadd.f32 %v863_v32, %v667_v28  ;;  %v960_v37 = vsel %vm902_vm4, %v958_v13, %v959_v30  ;;  %v987_v51 = vrot.slane %v891_v41, 6  ;;  %v5362_v28 = vpop.permute.xlu0 %5361  ;;  %v1045_v30 = vpop.permute.xlu1 %1044 }
 0x190   :  { %v4820_v15 = vpop.f32.mrf.mxu1  ;;  %v942_v38 = vmax.f32 %v939_v33, %v940_v27  ;;  %v962_v43 = vmax.f32 %v888_v22, %v960_v37  ;;  %926 = vst [vmem:[#allocation2 + $0x28] sm:$0x3f] %v925_v10  ;;  %v1024_v22 = vld [vmem:[%s7057_s3 + $0x28] sm:$0xff]  ;;  %v2478_v27 = vld [vmem:[%s7058_s4] sm:$0xff]  ;;  %v5364_v32 = vunpack.i.h.bf16 %v5362_v28  ;;  %v5363_v33 = vunpack.i.l.bf16 %v5362_v28  ;;  %v4243_v28 = vld [vmem:[%s7057_s3 + $0xd8] sm:$0xff] }
 0x191   :  { %v965_v42 = vrot.slane %v890_v34, 4  ;;  %v893_v12 = vadd.f32 %v4820_v15, %v670_v36  ;;  %v969_v48 = vrot.slane %v890_v34, 2  ;;  %v4201_v10 = vld [vmem:[%s7057_s3 + $0x48] sm:$0xff] }
 0x192   :  { %v949_v45 = vadd.f32 %v947_v35, %v942_v38  ;;  %v873_v46 = vpop.f32.mrf.mxu1  ;;  %v4202_v38 = vld [vmem:[%s7057_s3 + $0x50] sm:$0xff] }
 0x193   :  { %v966_v47 = vsel %vm909_vm5, %v964_v39, %v965_v42  ;;  %v892_v18 = vadd.f32 %v873_v46, %v669_v40  ;;  %v994_v57 = vrot.slane %v893_v12, 4  ;;  %v998_v63 = vrot.slane %v893_v12, 2  ;;  %v4203_v42 = vld [vmem:[%s7057_s3 + $0x58] sm:$0xff] }
 0x194   :  { %v968_v44 = vmax.f32 %v962_v43, %v966_v47  ;;  %v950_v49 = vmax.f32 %v949_v45, 0.0  ;;  %v4204_v45 = vld [vmem:[%s7057_s3 + $0x60] sm:$0xff] }
 0x195   :  { %v988_v52 = vrot.slane %v892_v18, 6  ;;  %v993_v53 = vrot.slane %v892_v18, 4  ;;  %v4205_v18 = vld [vmem:[%s7057_s3 + $0x68] sm:$0xff] }
 0x196   :  { %v971_v54 = vmax.f32 %v968_v44, %v969_v48  ;;  %v952_v56 = vrot.slane %v950_v49, 2  ;;  %v4206_v48 = vld [vmem:[%s7057_s3 + $0x70] sm:$0xff] }
 0x197   :  { %v989_v58 = vsel %vm902_vm4, %v987_v51, %v988_v52  ;;  %v995_v61 = vsel %vm909_vm5, %v993_v53, %v994_v57  ;;  %v4207_v52 = vld [vmem:[%s7057_s3 + $0x78] sm:$0xff]  ;;  %v4225_v57 = vld [vmem:[%s7057_s3 + $0x88] sm:$0xff] }
 0x198   :  { %v978_v59 = vadd.f32 %v5828_v50, %v971_v54  ;;  %954 = vst [vmem:[#allocation2 + $0x8] ss:$36 sps:$4 sm:$0xcf] %v952_v56   ;;  %v991_v60 = vmax.f32 %v891_v41, %v989_v58  ;;  %v4224_v54 = vld [vmem:[%s7057_s3 + $0x80] sm:$0xff] }
 0x19a   :  { %v979_v62 = vmax.f32 %v978_v59, 0.0  ;;  %v997_v0 = vmax.f32 %v991_v60, %v995_v61  ;;  %v4226_v59 = vld [vmem:[%s7057_s3 + $0x90] sm:$0xff] }
 0x19c   :  { %v981_v1 = vrot.slane %v979_v62, 4  ;;  %v1000_v5 = vmax.f32 %v997_v0, %v998_v63  ;;  %v4227_v63 = vld [vmem:[%s7057_s3 + $0x98] sm:$0xff] }
 0x19e   :  { %983 = vst [vmem:[#allocation2 + $0x18] ss:$-12 sps:$4 sm:$0xf3] %v981_v1   ;;  %v1007_v14 = vadd.f32 %v5831_v3, %v1000_v5  ;;  %v1019_v3 = vld [vmem:[%s7057_s3] sm:$0xff] }
 0x19f   :  { %v5848_v16 = vld [vmem:[#allocation2 + $0x28] sm:$0xff]  ;;  %4845 = vmatprep.mubr.msk.f32.mxu1 %vm1060_vm6, %v1019_v3  ;;  %v4228_v1 = vld [vmem:[%s7057_s3 + $0xa0] sm:$0xff] }
 0x1a0   :  { %v1008_v2 = vmax.f32 %v1007_v14, 0.0  ;;  %1042 = vrot.lane.b32.xlu0 %v5848_v16, %s5424_s21 }
 0x1a2   :  { %v1010_v7 = vrot.slane %v1008_v2, 6 }
 0x1a4   :  { %1012 = vst [vmem:[#allocation2 + $0x18] sm:$0xfc] %v1010_v7 }
 0x1a5   :  { %v5852_v50 = vld [vmem:[#allocation2 + $0x8] sm:$0xff] }
 0x1a6   :  { %1046 = vrot.lane.b32.xlu1 %v5852_v50, %s5424_s21  ;;  %1332 = vrot.lane.b32.xlu0 %v5852_v50, %s5429_s23 }
 0x1aa   :  { %1330 = vrot.lane.b32.xlu0 %v5428_v55, %s5429_s23 }
 0x1ab   :  { %v1017_v19 = vld [vmem:[#allocation2 + $0x18] sm:$0xff] }
 0x1ac   :  { %4839 = vmatprep.subr.mxu1 %v1017_v19  ;;  %1050 = vrot.lane.b32.xlu1 %v1017_v19, %s5424_s21 }
 0x1ad   :  { %4840 = vmatpush3.msra.mxu1 %v1017_v19 }
 0x1ae   :  { %4841 = vmatprep.subr.mxu1 %v5852_v50  ;;  %5371 = vrot.lane.b32.xlu0 %v5428_v55, %s5425_s30 }
 0x1af   :  { %4842 = vmatpush3.msra.mxu1 %v5852_v50 }
 0x1b0   :  { %5366 = vrot.lane.b32.xlu1 %v5428_v55, %s5429_s23  ;;  %4843 = vmatprep.subr.mxu1 %v5848_v16 }
 0x1b1   :  { %4844 = vmatpush3.msra.mxu1 %v5848_v16 }
 0x1b2   :  { %1493 = vrot.lane.b32.xlu0 %v5848_v16, %s5425_s30  ;;  %4846 = vmatmul.mubr.msk.f32.vlgmr.msra.gmra.mxu1 %vm1060_vm6, %v1020_v20 }
 0x1b3   :  { %4848 = vmatprep.mubr.msk.f32.mxu1 %vm1060_vm6, %v1021_v4 }
 0x1b4   :  { %1328 = vrot.lane.b32.xlu1 %v5848_v16, %s5429_s23 }
 0x1b6   :  { %1336 = vrot.lane.b32.xlu0 %v1017_v19, %s5429_s23  ;;  %4849 = vmatmul.mubr.msk.f32.gmra.mxu1 %vm1060_vm6, %v1022_v9  ;;  %s5431_s23 = smov 112   ;;  %v4230_v9 = vld [vmem:[%s7057_s3 + $0xb0] sm:$0xff] }
 0x1b7   :  { %4851 = vmatprep.mubr.msk.f32.mxu1 %vm1060_vm6, %v1023_v21 }
 0x1b8   :  { %1497 = vrot.lane.b32.xlu1 %v5852_v50, %s5425_s30 }
 0x1ba   :  { %1661 = vrot.lane.b32.xlu0 %v5852_v50, %s5426_s0  ;;  %4852 = vmatmul.mubr.msk.f32.gmra.mxu1 %vm1060_vm6, %v1024_v22  ;;  %v4231_v22 = vld [vmem:[%s7057_s3 + $0xb8] sm:$0xff] }
 0x1bb   :  { %4854 = vmatprep.mubr.msk.f32.mxu1 %vm1060_vm6, %v1025_v23  ;;  %v4241_v23 = vld [vmem:[%s7057_s3 + $0xc8] sm:$0xff] }
 0x1bc   :  { %5376 = vrot.lane.b32.xlu1 %v5428_v55, %s5426_s0 }
 0x1be   :  { %1659 = vrot.lane.b32.xlu0 %v5428_v55, %s5426_s0  ;;  %4855 = vmatmul.mubr.msk.f32.gmra.mxu1 %vm1060_vm6, %v1026_v24 }
 0x1bf   :  { %4881 = vmatprep.mubr.msk.f32.mxu1 %vm1060_vm6, %v4240_v25  ;;  %v4242_v25 = vld [vmem:[%s7057_s3 + $0xd0] sm:$0xff] }
 0x1c0   :  { %1495 = vrot.lane.b32.xlu1 %v5428_v55, %s5425_s30 }
 0x1c2   :  { %5381 = vrot.lane.b32.xlu0 %v5428_v55, %s5430_s22 }
 0x1c4   :  { %1657 = vrot.lane.b32.xlu1 %v5848_v16, %s5426_s0 }
 0x1c6   :  { %1665 = vrot.lane.b32.xlu0 %v1017_v19, %s5426_s0 }
 0x1c8   :  { %1501 = vrot.lane.b32.xlu1 %v1017_v19, %s5425_s30  ;;  %s5433_s30 = smov 110  }
 0x1ca   :  { %1821 = vrot.lane.b32.xlu0 %v5848_v16, %s5430_s22 }
 0x1cc   :  { %1825 = vrot.lane.b32.xlu1 %v5852_v50, %s5430_s22 }
 0x1ce   :  { %1990 = vrot.lane.b32.xlu0 %v5852_v50, %s5431_s23 }
 0x1d0   :  { %5386 = vrot.lane.b32.xlu1 %v5428_v55, %s5431_s23 }
 0x1d2   :  { %1988 = vrot.lane.b32.xlu0 %v5428_v55, %s5431_s23 }
 0x1d4   :  { %1823 = vrot.lane.b32.xlu1 %v5428_v55, %s5430_s22 }
 0x1d6   :  { %1994 = vrot.lane.b32.xlu0 %v1017_v19, %s5431_s23 }
 0x1d8   :  { %1829 = vrot.lane.b32.xlu1 %v1017_v19, %s5430_s22 }
 0x1da   :  { %5391 = vrot.lane.b32.xlu0 %v5428_v55, %s5432_s24 }
 0x1dc   :  { %1986 = vrot.lane.b32.xlu1 %v5848_v16, %s5431_s23 }
 0x1de   :  { %2151 = vrot.lane.b32.xlu0 %v5848_v16, %s5432_s24 }
 0x1e0   :  { %2155 = vrot.lane.b32.xlu1 %v5852_v50, %s5432_s24 }
 0x1e2   :  { %2320 = vrot.lane.b32.xlu0 %v5852_v50, %s5433_s30 }
 0x1e4   :  { %5396 = vrot.lane.b32.xlu1 %v5428_v55, %s5433_s30 }
 0x1e6   :  { %2324 = vrot.lane.b32.xlu0 %v1017_v19, %s5433_s30 }
 0x1e8   :  { %2159 = vrot.lane.b32.xlu1 %v1017_v19, %s5432_s24 }
 0x1ea   :  { %2318 = vrot.lane.b32.xlu0 %v5428_v55, %s5433_s30 }
 0x1ec   :  { %2153 = vrot.lane.b32.xlu1 %v5428_v55, %s5432_s24 }
 0x1ee   :  { %2487 = vperm.xlu0 %5358, %v2479_v26   ;;  %v4256_v26 = vld [vmem:[%s7057_s3 + $0x100] sm:$0xff] }
 0x1f0   :  { %2316 = vrot.lane.b32.xlu1 %v5848_v16, %s5433_s30 }
 0x1f4   :  { %2482 = vperm.xlu1 %5359, %v2478_v27  }
 0x212   :  { %v1043_v29 = vpop.permute.xlu0 %1042 }
 0x213   :  { %v1054_v37 = vsel %vm112_vm1, %v1043_v29, %v1045_v30  ;;  %v4257_v29 = vld [vmem:[%s7057_s3 + $0x108] sm:$0xff] }
 0x218   :  { %v1333_v8 = vpop.permute.xlu0 %1332  ;;  %v1047_v13 = vpop.permute.xlu1 %1046 }
 0x219   :  { %v1055_v35 = vsel %vm112_vm1, %v1047_v13, %v5364_v32  ;;  %v4258_v13 = vld [vmem:[%s7057_s3 + $0x110] sm:$0xff] }
 0x21c   :  { %v1331_v31 = vpop.permute.xlu0 %1330 }
 0x21e   :  { %v1051_v6 = vpop.permute.xlu1 %1050 }
 0x21f   :  { %v1056_v11 = vsel %vm112_vm1, %v1051_v6, %v5363_v33  ;;  %v4245_v33 = vld [vmem:[%s7057_s3 + $0xe8] sm:$0xff]  ;;  %v4259_v6 = vld [vmem:[%s7057_s3 + $0x118] sm:$0xff] }
 0x220   :  { %4821 = vmatprep.subr.mxu0 %v1056_v11  ;;  %v5946_v34 = vpop.permute.xlu0 %5371 }
 0x221   :  { %4822 = vmatpush3.msra.mxu0 %v1056_v11  ;;  %v5373_v5 = vunpack.i.l.bf16 %v5946_v34  ;;  %v5374_v2 = vunpack.i.h.bf16 %v5946_v34 }
 0x222   :  { %4823 = vmatprep.subr.mxu0 %v1055_v35  ;;  %v5367_v36 = vpop.permute.xlu1 %5366 }
 0x223   :  { %4824 = vmatpush3.msra.mxu0 %v1055_v35  ;;  %v5369_v40 = vunpack.i.h.bf16 %v5367_v36  ;;  %v5368_v41 = vunpack.i.l.bf16 %v5367_v36  ;;  %v4246_v35 = vld [vmem:[%s7057_s3 + $0xf0] sm:$0xff] }
 0x224   :  { %4825 = vmatprep.subr.mxu0 %v1054_v37  ;;  %v5953_v15 = vpop.permute.xlu0 %1493 }
 0x225   :  { %4826 = vmatpush3.msra.mxu0 %v1054_v37  ;;  %v1342_v12 = vsel %vm1340_vm7, %v1333_v8, %v5369_v40  ;;  %v4244_v8 = vld [vmem:[%s7057_s3 + $0xe0] sm:$0xff] }
 0x226   :  { %v1329_v39 = vpop.permute.xlu1 %1328  ;;  %4828 = vmatmul.mubr.msk.f32.vlgmr.msra.gmra.mxu0 %vm1060_vm6, %v4201_v10 }
 0x227   :  { %4830 = vmatprep.mubr.msk.f32.mxu0 %vm1060_vm6, %v4202_v38  ;;  %v1341_v49 = vsel %vm1340_vm7, %v1329_v39, %v1331_v31 }
 0x228   :  { %v1337_v43 = vpop.permute.xlu0 %1336 }
 0x229   :  { %v1343_v46 = vsel %vm1340_vm7, %v1337_v43, %v5368_v41  ;;  %v4247_v41 = vld [vmem:[%s7057_s3 + $0xf8] sm:$0xff] }
 0x22a   :  { %v1498_v47 = vpop.permute.xlu1 %1497  ;;  %4831 = vmatmul.mubr.msk.f32.gmra.mxu0 %vm1060_vm6, %v4203_v42  ;;  %4857 = vmatprep.subr.mxu0 %v1343_v46  ;;  %v4261_v42 = vld [vmem:[%s7057_s3 + $0x128] sm:$0xff] }
 0x22b   :  { %4858 = vmatpush3.msra.mxu0 %v1343_v46  ;;  %4833 = vmatprep.mubr.msk.f32.mxu0 %vm1060_vm6, %v4204_v45  ;;  %v1506_v19 = vsel %vm485_vm2, %v1498_v47, %v5374_v2  ;;  %v4262_v46 = vld [vmem:[%s7057_s3 + $0x130] sm:$0xff] }
 0x22c   :  { %4859 = vmatprep.subr.mxu0 %v1342_v12  ;;  %v1662_v44 = vpop.permute.xlu0 %1661 }
 0x22d   :  { %4860 = vmatpush3.msra.mxu0 %v1342_v12 }
 0x22e   :  { %v5377_v51 = vpop.permute.xlu1 %5376  ;;  %4834 = vmatmul.mubr.msk.f32.gmra.mxu0 %vm1060_vm6, %v4205_v18  ;;  %4861 = vmatprep.subr.mxu0 %v1341_v49  ;;  %v4272_v18 = vld [vmem:[%s7057_s3 + $0x140] sm:$0xff] }
 0x22f   :  { %4862 = vmatpush3.msra.mxu0 %v1341_v49  ;;  %4836 = vmatprep.mubr.msk.f32.mxu0 %vm1060_vm6, %v4206_v48  ;;  %v5379_v61 = vunpack.i.h.bf16 %v5377_v51  ;;  %v5378_v62 = vunpack.i.l.bf16 %v5377_v51  ;;  %v4263_v49 = vld [vmem:[%s7057_s3 + $0x138] sm:$0xff]  ;;  %v4273_v51 = vld [vmem:[%s7057_s3 + $0x148] sm:$0xff] }
 0x230   :  { %v1660_v53 = vpop.permute.xlu0 %1659 }
 0x231   :  { %v1670_v7 = vsel %vm708_vm3, %v1662_v44, %v5379_v61  ;;  %v4290_v61 = vld [vmem:[%s7057_s3 + $0x190] sm:$0xff] }
 0x232   :  { %v1496_v56 = vpop.permute.xlu1 %1495  ;;  %4837 = vmatmul.mubr.msk.f32.gmra.mxu0 %vm1060_vm6, %v4207_v52 }
 0x233   :  { %4863 = vmatprep.mubr.msk.f32.mxu0 %vm1060_vm6, %v4224_v54  ;;  %v1505_v21 = vsel %vm485_vm2, %v5953_v15, %v1496_v56  ;;  %v4260_v15 = vld [vmem:[%s7057_s3 + $0x120] sm:$0xff] }
 0x234   :  { %v5987_v58 = vpop.permute.xlu0 %5381  ;;  %v4288_v54 = vld [vmem:[%s7057_s3 + $0x180] sm:$0xff] }
 0x235   :  { %v5383_v36 = vunpack.i.l.bf16 %v5987_v58  ;;  %v5384_v43 = vunpack.i.h.bf16 %v5987_v58  ;;  %v4289_v58 = vld [vmem:[%s7057_s3 + $0x188] sm:$0xff] }
 0x236   :  { %v1658_v60 = vpop.permute.xlu1 %1657  ;;  %4864 = vmatmul.mubr.msk.f32.vlgmr.msra.gmra.mxu0 %vm1060_vm6, %v4225_v57  ;;  %v4275_v57 = vld [vmem:[%s7057_s3 + $0x158] sm:$0xff] }
 0x237   :  { %4866 = vmatprep.mubr.msk.f32.mxu0 %vm1060_vm6, %v4226_v59  ;;  %v1669_v4 = vsel %vm708_vm3, %v1658_v60, %v1660_v53  ;;  %v4274_v53 = vld [vmem:[%s7057_s3 + $0x150] sm:$0xff]  ;;  %v4276_v60 = vld [vmem:[%s7057_s3 + $0x160] sm:$0xff] }
 0x238   :  { %v1666_v0 = vpop.permute.xlu0 %1665 }
 0x239   :  { %v1671_v14 = vsel %vm708_vm3, %v1666_v0, %v5378_v62 }
 0x23a   :  { %v1502_v16 = vpop.permute.xlu1 %1501  ;;  %4867 = vmatmul.mubr.msk.f32.gmra.mxu0 %vm1060_vm6, %v4227_v63  ;;  %4893 = vmatprep.subr.mxu0 %v1671_v14 }
 0x23b   :  { %4894 = vmatpush3.msra.mxu0 %v1671_v14  ;;  %v1507_v50 = vsel %vm485_vm2, %v1502_v16, %v5373_v5  ;;  %4869 = vmatprep.mubr.msk.f32.mxu0 %vm1060_vm6, %v4228_v1  ;;  %v4277_v5 = vld [vmem:[%s7057_s3 + $0x168] sm:$0xff]  ;;  %v4291_v14 = vld [vmem:[%s7057_s3 + $0x198] sm:$0xff] }
 0x23c   :  { %4895 = vmatprep.subr.mxu0 %v1670_v7  ;;  %v6010_v3 = vpop.permute.xlu0 %1821  ;;  %4875 = vmatprep.subr.mxu1 %v1507_v50 }
 0x23d   :  { %4876 = vmatpush3.msra.mxu1 %v1507_v50  ;;  %4896 = vmatpush3.msra.mxu0 %v1670_v7  ;;  %v4278_v50 = vld [vmem:[%s7057_s3 + $0x170] sm:$0xff] }
 0x23e   :  { %v6013_v20 = vpop.permute.xlu1 %1825  ;;  %4870 = vmatmul.mubr.msk.f32.gmra.mxu0 %vm1060_vm6, %v4229_v17  ;;  %4877 = vmatprep.subr.mxu1 %v1506_v19  ;;  %v4292_v17 = vld [vmem:[%s7057_s3 + $0x1a0] sm:$0xff] }
 0x23f   :  { %4897 = vmatprep.subr.mxu0 %v1669_v4  ;;  %4878 = vmatpush3.msra.mxu1 %v1506_v19  ;;  %v1835_v47 = vsel %vm1833_vm9, %v6013_v20, %v5384_v43  ;;  %v4279_v20 = vld [vmem:[%s7057_s3 + $0x178] sm:$0xff]  ;;  %v2506_v43 = vld [vmem:[%s7059_s5 + $0x28] sm:$0xff] }
 0x240   :  { %4898 = vmatpush3.msra.mxu0 %v1669_v4  ;;  %v1991_v24 = vpop.permute.xlu0 %1990  ;;  %4879 = vmatprep.subr.mxu1 %v1505_v21  ;;  %v4293_v4 = vld [vmem:[%s7057_s3 + $0x1a8] sm:$0xff] }
 0x241   :  { %4872 = vmatprep.mubr.msk.f32.mxu0 %vm1060_vm6, %v4230_v9  ;;  %4880 = vmatpush3.msra.mxu1 %v1505_v21  ;;  %v4294_v21 = vld [vmem:[%s7057_s3 + $0x1b0] sm:$0xff] }
 0x242   :  { %v5387_v27 = vpop.permute.xlu1 %5386  ;;  %4873 = vmatmul.mubr.msk.f32.gmra.mxu0 %vm1060_vm6, %v4231_v22  ;;  %4882 = vmatmul.mubr.msk.f32.vlgmr.msra.gmra.mxu1 %vm1060_vm6, %v4241_v23  ;;  %v4304_v22 = vld [vmem:[%s7057_s3 + $0x1c0] sm:$0xff] }
 0x243   :  { %4884 = vmatprep.mubr.msk.f32.mxu1 %vm1060_vm6, %v4242_v25  ;;  %4899 = vmatprep.mubr.msk.f32.mxu0 %vm1060_vm6, %v4256_v26  ;;  %v5388_v32 = vunpack.i.l.bf16 %v5387_v27  ;;  %v5389_v11 = vunpack.i.h.bf16 %v5387_v27  ;;  %v4295_v26 = vld [vmem:[%s7057_s3 + $0x1b8] sm:$0xff] }
 0x244   :  { %v1989_v30 = vpop.permute.xlu0 %1988 }
 0x245   :  { %v2000_v39 = vsel %vm1998_vm8, %v1991_v24, %v5389_v11  ;;  %v4309_v11 = vld [vmem:[%s7057_s3 + $0x1e8] sm:$0xff] }
 0x246   :  { %v1824_v31 = vpop.permute.xlu1 %1823  ;;  %4885 = vmatmul.mubr.msk.f32.gmra.mxu1 %vm1060_vm6, %v4243_v28  ;;  %4900 = vmatmul.mubr.msk.f32.vlgmr.msra.gmra.mxu0 %vm1060_vm6, %v4257_v29  ;;  %v4305_v28 = vld [vmem:[%s7057_s3 + $0x1c8] sm:$0xff] }
 0x247   :  { %4887 = vmatprep.mubr.msk.f32.mxu1 %vm1060_vm6, %v4244_v8  ;;  %4902 = vmatprep.mubr.msk.f32.mxu0 %vm1060_vm6, %v4258_v13  ;;  %v1834_v48 = vsel %vm1833_vm9, %v6010_v3, %v1824_v31  ;;  %v4320_v8 = vld [vmem:[%s7057_s3 + $0x200] sm:$0xff]  ;;  %v4321_v13 = vld [vmem:[%s7057_s3 + $0x208] sm:$0xff]  ;;  %v4307_v31 = vld [vmem:[%s7057_s3 + $0x1d8] sm:$0xff] }
 0x248   :  { %v1995_v34 = vpop.permute.xlu0 %1994 }
 0x249   :  { %v2001_v37 = vsel %vm1998_vm8, %v1995_v34, %v5388_v32  ;;  %v4322_v32 = vld [vmem:[%s7057_s3 + $0x210] sm:$0xff]  ;;  %v4324_v34 = vld [vmem:[%s7057_s3 + $0x220] sm:$0xff] }
 0x24a   :  { %v1830_v10 = vpop.permute.xlu1 %1829  ;;  %4888 = vmatmul.mubr.msk.f32.gmra.mxu1 %vm1060_vm6, %v4245_v33  ;;  %4903 = vmatmul.mubr.msk.f32.gmra.mxu0 %vm1060_vm6, %v4259_v6  ;;  %v4308_v33 = vld [vmem:[%s7057_s3 + $0x1e0] sm:$0xff]  ;;  %v4323_v6 = vld [vmem:[%s7057_s3 + $0x218] sm:$0xff] }
 0x24b   :  { %4929 = vmatprep.subr.mxu0 %v2001_v37  ;;  %v1836_v38 = vsel %vm1833_vm9, %v1830_v10, %v5383_v36  ;;  %4890 = vmatprep.mubr.msk.f32.mxu1 %vm1060_vm6, %v4246_v35  ;;  %v4310_v35 = vld [vmem:[%s7057_s3 + $0x1f0] sm:$0xff]  ;;  %v4325_v36 = vld [vmem:[%s7057_s3 + $0x228] sm:$0xff] }
 0x24c   :  { %4930 = vmatpush3.msra.mxu0 %v2001_v37  ;;  %v6074_v40 = vpop.permute.xlu0 %5391  ;;  %4911 = vmatprep.subr.mxu1 %v1836_v38  ;;  %v4311_v37 = vld [vmem:[%s7057_s3 + $0x1f8] sm:$0xff]  ;;  %v4326_v10 = vld [vmem:[%s7057_s3 + $0x230] sm:$0xff] }
 0x24d   :  { %4931 = vmatprep.subr.mxu0 %v2000_v39  ;;  %4905 = vmatprep.mubr.msk.f32.mxu0 %vm1060_vm6, %v4260_v15  ;;  %v5393_v1 = vunpack.i.l.bf16 %v6074_v40  ;;  %v5394_v3 = vunpack.i.h.bf16 %v6074_v40  ;;  %v4327_v15 = vld [vmem:[%s7057_s3 + $0x238] sm:$0xff] }
 0x24e   :  { %4912 = vmatpush3.msra.mxu1 %v1836_v38  ;;  %4932 = vmatpush3.msra.mxu0 %v2000_v39  ;;  %v1987_v45 = vpop.permute.xlu1 %1986  ;;  %v2522_v38 = vld [vmem:[%s7059_s5 + $0x78] sm:$0xff]  ;;  %v2521_v39 = vld [vmem:[%s7059_s5 + $0x70] sm:$0xff] }
 0x24f   :  { %4891 = vmatmul.mubr.msk.f32.gmra.mxu1 %vm1060_vm6, %v4247_v41  ;;  %4906 = vmatmul.mubr.msk.f32.gmra.mxu0 %vm1060_vm6, %v4261_v42  ;;  %v1999_v12 = vsel %vm1998_vm8, %v1987_v45, %v1989_v30  ;;  %v4306_v30 = vld [vmem:[%s7057_s3 + $0x1d0] sm:$0xff]  ;;  %v2508_v40 = vld [vmem:[%s7059_s5 + $0x38] sm:$0xff]  ;;  %v2520_v42 = vld [vmem:[%s7059_s5 + $0x68] sm:$0xff]  ;;  %s5435_s3 = smov 64  }
 0x250   :  { %4913 = vmatprep.subr.mxu1 %v1835_v47  ;;  %4933 = vmatprep.subr.mxu0 %v1999_v12  ;;  %v2152_v44 = vpop.permute.xlu0 %2151  ;;  %v2507_v41 = vld [vmem:[%s7059_s5 + $0x30] sm:$0xff]  ;;  %v2519_v45 = vld [vmem:[%s7059_s5 + $0x60] sm:$0xff] }
 0x251   :  { %4914 = vmatpush3.msra.mxu1 %v1835_v47  ;;  %4908 = vmatprep.mubr.msk.f32.mxu0 %vm1060_vm6, %v4262_v46  ;;  %v2505_v46 = vld [vmem:[%s7059_s5 + $0x20] sm:$0xff]  ;;  %v2518_v47 = vld [vmem:[%s7059_s5 + $0x58] sm:$0xff] }
 0x252   :  { %4915 = vmatprep.subr.mxu1 %v1834_v48  ;;  %4917 = vmatprep.mubr.msk.f32.mxu1 %vm1060_vm6, %v4272_v18  ;;  %v2156_v52 = vpop.permute.xlu1 %2155 }
 0x253   :  { %4916 = vmatpush3.msra.mxu1 %v1834_v48  ;;  %4934 = vmatpush3.msra.mxu0 %v1999_v12  ;;  %v2165_v23 = vsel %vm2163_vm11, %v2156_v52, %v5394_v3  ;;  %v2504_v12 = vld [vmem:[%s7059_s5 + $0x18] sm:$0xff]  ;;  %v2503_v48 = vld [vmem:[%s7059_s5 + $0x10] sm:$0xff]  ;;  %v2502_v52 = vld [vmem:[%s7059_s5 + $0x8] sm:$0xff] }
 0x254   :  { %4909 = vmatmul.mubr.msk.f32.gmra.mxu0 %vm1060_vm6, %v4263_v49  ;;  %4918 = vmatmul.mubr.msk.f32.vlgmr.msra.gmra.mxu1 %vm1060_vm6, %v4273_v51  ;;  %v2321_v56 = vpop.permute.xlu0 %2320  ;;  %v2516_v51 = vld [vmem:[%s7059_s5 + $0x48] sm:$0xff] }
 0x255   :  { %4920 = vmatprep.mubr.msk.f32.mxu1 %vm1060_vm6, %v4274_v53  ;;  %4935 = vmatprep.mubr.msk.f32.mxu0 %vm1060_vm6, %v4288_v54 }
 0x256   :  { %v5397_v59 = vpop.permute.xlu1 %5396 }
 0x257   :  { %v5398_v62 = vunpack.i.l.bf16 %v5397_v59  ;;  %v5399_v63 = vunpack.i.h.bf16 %v5397_v59 }
 0x258   :  { %4921 = vmatmul.mubr.msk.f32.gmra.mxu1 %vm1060_vm6, %v4275_v57  ;;  %4936 = vmatmul.mubr.msk.f32.vlgmr.msra.gmra.mxu0 %vm1060_vm6, %v4289_v58  ;;  %v2325_v0 = vpop.permute.xlu0 %2324 }
 0x259   :  { %4923 = vmatprep.mubr.msk.f32.mxu1 %vm1060_vm6, %v4276_v60  ;;  %4938 = vmatprep.mubr.msk.f32.mxu0 %vm1060_vm6, %v4290_v61  ;;  %v2331_v16 = vsel %vm2328_vm10, %v2325_v0, %v5398_v62  ;;  %v2330_v19 = vsel %vm2328_vm10, %v2321_v56, %v5399_v63  ;;  %v2515_v56 = vld [vmem:[%s7059_s5 + $0x40] sm:$0xff] }
 0x25a   :  { %v2160_v2 = vpop.permute.xlu1 %2159  ;;  %4965 = vmatprep.subr.mxu0 %v2331_v16 }
 0x25b   :  { %4966 = vmatpush3.msra.mxu0 %v2331_v16  ;;  %v2166_v7 = vsel %vm2163_vm11, %v2160_v2, %v5393_v1 }
 0x25c   :  { %4924 = vmatmul.mubr.msk.f32.gmra.mxu1 %vm1060_vm6, %v4277_v5  ;;  %4939 = vmatmul.mubr.msk.f32.gmra.mxu0 %vm1060_vm6, %v4291_v14  ;;  %v2319_v25 = vpop.permute.xlu0 %2318 }
 0x25d   :  { %4947 = vmatprep.subr.mxu1 %v2166_v7  ;;  %4967 = vmatprep.subr.mxu0 %v2330_v19 }
 0x25e   :  { %4926 = vmatprep.mubr.msk.f32.mxu1 %vm1060_vm6, %v4278_v50  ;;  %4941 = vmatprep.mubr.msk.f32.mxu0 %vm1060_vm6, %v4292_v17  ;;  %v2154_v9 = vpop.permute.xlu1 %2153 }
 0x25f   :  { %4948 = vmatpush3.msra.mxu1 %v2166_v7  ;;  %4968 = vmatpush3.msra.mxu0 %v2330_v19  ;;  %v2164_v24 = vsel %vm2163_vm11, %v2152_v44, %v2154_v9  ;;  %v6275_v44 = vld [vmem:[#allocation2 + $0x10] sm:$0xff] }
 0x260   :  { %4927 = vmatmul.mubr.msk.f32.gmra.mxu1 %vm1060_vm6, %v4279_v20  ;;  %4942 = vmatmul.mubr.msk.f32.gmra.mxu0 %vm1060_vm6, %v4293_v4  ;;  %7068 = vst [vmem:[#allocation6_spill] sm:$0xff] %v6275_v44 }
 0x261   :  { %4949 = vmatprep.subr.mxu1 %v2165_v23  ;;  %4944 = vmatprep.mubr.msk.f32.mxu0 %vm1060_vm6, %v4294_v21 }
 0x262   :  { %4950 = vmatpush3.msra.mxu1 %v2165_v23  ;;  %4953 = vmatprep.mubr.msk.f32.mxu1 %vm1060_vm6, %v4304_v22  ;;  %v2317_v27 = vpop.permute.xlu1 %2316 }
 0x263   :  { %4951 = vmatprep.subr.mxu1 %v2164_v24  ;;  %v2329_v29 = vsel %vm2328_vm10, %v2317_v27, %v2319_v25 }
 0x264   :  { %4952 = vmatpush3.msra.mxu1 %v2164_v24  ;;  %4945 = vmatmul.mubr.msk.f32.gmra.mxu0 %vm1060_vm6, %v4295_v26 }
 0x265   :  { %4954 = vmatmul.mubr.msk.f32.vlgmr.msra.gmra.mxu1 %vm1060_vm6, %v4305_v28  ;;  %4969 = vmatprep.subr.mxu0 %v2329_v29 }
 0x266   :  { %4956 = vmatprep.mubr.msk.f32.mxu1 %vm1060_vm6, %v4306_v30  ;;  %4970 = vmatpush3.msra.mxu0 %v2329_v29 }
 0x267   :  { %4971 = vmatprep.mubr.msk.f32.mxu0 %vm1060_vm6, %v4320_v8  ;;  %4983 = vmatprep.subr.mxu1 %v5428_v55 }
 0x268   :  { %4972 = vmatmul.mubr.msk.f32.vlgmr.msra.gmra.mxu0 %vm1060_vm6, %v4321_v13  ;;  %5002 = vmatprep.subr.mxu0 %v5428_v55 }
 0x269   :  { %4957 = vmatmul.mubr.msk.f32.gmra.mxu1 %vm1060_vm6, %v4307_v31  ;;  %4974 = vmatprep.mubr.msk.f32.mxu0 %vm1060_vm6, %v4322_v32 }
 0x26a   :  { %4959 = vmatprep.mubr.msk.f32.mxu1 %vm1060_vm6, %v4308_v33  ;;  %4984 = vmatpush3.msra.mxu1 %v2522_v38 }
 0x26b   :  { %5003 = vmatpush3.msra.mxu0 %v2508_v40  ;;  %4985 = vmatprep.subr.mxu1 %v5428_v55 }
 0x26c   :  { %4975 = vmatmul.mubr.msk.f32.gmra.mxu0 %vm1060_vm6, %v4323_v6  ;;  %5004 = vmatprep.subr.mxu0 %v5428_v55 }
 0x26d   :  { %4960 = vmatmul.mubr.msk.f32.gmra.mxu1 %vm1060_vm6, %v4309_v11  ;;  %4977 = vmatprep.mubr.msk.f32.mxu0 %vm1060_vm6, %v4324_v34 }
 0x26e   :  { %4962 = vmatprep.mubr.msk.f32.mxu1 %vm1060_vm6, %v4310_v35  ;;  %4986 = vmatpush3.msra.mxu1 %v2521_v39 }
 0x26f   :  { %5005 = vmatpush3.msra.mxu0 %v2507_v41  ;;  %4987 = vmatprep.subr.mxu1 %v5428_v55 }
 0x270   :  { %4978 = vmatmul.mubr.msk.f32.gmra.mxu0 %vm1060_vm6, %v4325_v36  ;;  %5006 = vmatprep.subr.mxu0 %v5428_v55 }
 0x271   :  { %4963 = vmatmul.mubr.msk.f32.gmra.mxu1 %vm1060_vm6, %v4311_v37  ;;  %4980 = vmatprep.mubr.msk.f32.mxu0 %vm1060_vm6, %v4326_v10 }
 0x272   :  { %4988 = vmatpush3.msra.mxu1 %v2520_v42  ;;  %5007 = vmatpush3.msra.mxu0 %v2506_v43  ;;  %v6273_v18 = vpop.f32.mrf.mxu1 }
 0x273   :  { %4989 = vmatprep.subr.mxu1 %v5428_v55  ;;  %5008 = vmatprep.subr.mxu0 %v5428_v55  ;;  %v2517_v55 = vld [vmem:[%s7059_s5 + $0x50] sm:$0xff] }
 0x274   :  { %4981 = vmatmul.mubr.msk.f32.gmra.mxu0 %vm1060_vm6, %v4327_v15  ;;  %4990 = vmatpush3.msra.mxu1 %v2519_v45  ;;  %v6297_v54 = vpop.f32.mrf.mxu1 }
 0x275   :  { %5009 = vmatpush3.msra.mxu0 %v2505_v46  ;;  %4991 = vmatprep.subr.mxu1 %v6275_v44 }
 0x276   :  { %5010 = vmatprep.subr.mxu0 %v6275_v44  ;;  %4992 = vmatpush3.msra.mxu1 %v2518_v47  ;;  %v4850_v59 = vpop.f32.mrf.mxu1 }
 0x277   :  { %5011 = vmatpush3.msra.mxu0 %v2504_v12  ;;  %4993 = vmatprep.subr.mxu1 %v6275_v44 }
 0x278   :  { %5012 = vmatprep.subr.mxu0 %v6275_v44  ;;  %4994 = vmatpush3.msra.mxu1 %v2517_v55  ;;  %v1290_v62 = vpop.f32.mrf.mxu1 }
 0x279   :  { %5013 = vmatpush3.msra.mxu0 %v2503_v48  ;;  %4995 = vmatprep.subr.mxu1 %v6275_v44 }
 0x27a   :  { %5014 = vmatprep.subr.mxu0 %v6275_v44  ;;  %4996 = vmatpush3.msra.mxu1 %v2516_v51  ;;  %v4853_v1 = vpop.f32.mrf.mxu1 }
 0x27b   :  { %5015 = vmatpush3.msra.mxu0 %v2502_v52  ;;  %4997 = vmatprep.subr.mxu1 %v6275_v44 }
 0x27c   :  { %5016 = vmatprep.subr.mxu0 %v6275_v44  ;;  %4998 = vmatpush3.msra.mxu1 %v2515_v56  ;;  %v1300_v16 = vpop.f32.mrf.mxu1 }
 0x27d   :  { %5021 = vmatprep.subr.mxu1 %v6275_v44 }
 0x27e   :  { %v4856_v50 = vpop.f32.mrf.mxu1 }
 0x280   :  { %v1310_v3 = vpop.f32.mrf.mxu1 }
 0x2e6   :  { %v6285_v49 = vpop.f32.mrf.mxu0 }
 0x2e7   :  { %v1286_v40 = vadd.f32 %v6273_v18, %v6285_v49 }
 0x2e8   :  { %v6295_v53 = vpop.f32.mrf.mxu0 }
 0x2e9   :  { %v1281_v56 = vadd.f32 %v6297_v54, %v6295_v53 }
 0x2ea   :  { %v4832_v57 = vpop.f32.mrf.mxu0 }
 0x2eb   :  { %v1296_v41 = vadd.f32 %v4850_v59, %v4832_v57 }
 0x2ec   :  { %v1161_v58 = vpop.f32.mrf.mxu0 }
 0x2ed   :  { %v1291_v55 = vadd.f32 %v1290_v62, %v1161_v58 }
 0x2ee   :  { %v4835_v60 = vpop.f32.mrf.mxu0 }
 0x2ef   :  { %v1306_v48 = vadd.f32 %v4853_v1, %v4835_v60 }
 0x2f0   :  { %v1171_v61 = vpop.f32.mrf.mxu0 }
 0x2f1   :  { %v1301_v44 = vadd.f32 %v1300_v16, %v1171_v61 }
 0x2f2   :  { %v4838_v63 = vpop.f32.mrf.mxu0 }
 0x2f3   :  { %v1316_v59 = vadd.f32 %v4856_v50, %v4838_v63 }
 0x2f4   :  { %v6307_v0 = vpop.f32.mrf.mxu0 }
 0x2f5   :  { %v1311_v1 = vadd.f32 %v1310_v3, %v6307_v0 }
 0x2f6   :  { %v4865_v5 = vpop.f32.mrf.mxu0 }
 0x2f7   :  { %v1477_v45 = vadd.f32 %v4865_v5, %v1286_v40 }
 0x2f8   :  { %v1437_v14 = vpop.f32.mrf.mxu0 }
 0x2f9   :  { %v1476_v57 = vadd.f32 %v1437_v14, %v1281_v56 }
 0x2fa   :  { %v4868_v2 = vpop.f32.mrf.mxu0 }
 0x2fb   :  { %v1479_v46 = vadd.f32 %v4868_v2, %v1296_v41 }
 0x2fc   :  { %v1447_v7 = vpop.f32.mrf.mxu0 }
 0x2fe   :  { %v4871_v17 = vpop.f32.mrf.mxu0 }
 0x300   :  { %v1457_v19 = vpop.f32.mrf.mxu0 }
 0x301   :  { %v1480_v5 = vadd.f32 %v1457_v19, %v1301_v44 }
 0x302   :  { %v4874_v20 = vpop.f32.mrf.mxu0  ;;  %v4883_v4 = vpop.f32.mrf.mxu1 }
 0x303   :  { %v1641_v51 = vadd.f32 %v4883_v4, %v1477_v45  ;;  %v1483_v4 = vadd.f32 %v4874_v20, %v1316_v59 }
 0x304   :  { %v6309_v9 = vpop.f32.mrf.mxu0  ;;  %v1601_v21 = vpop.f32.mrf.mxu1 }
 0x305   :  { %7069 = vst [vmem:[#allocation7_spill] sm:$0xff] %v6309_v9  ;;  %v1640_v53 = vadd.f32 %v1601_v21, %v1476_v57 }
 0x306   :  { %v4886_v22 = vpop.f32.mrf.mxu1  ;;  %v4901_v23 = vpop.f32.mrf.mxu0 }
 0x307   :  { %v1643_v52 = vadd.f32 %v4886_v22, %v1479_v46  ;;  %v1805_v9 = vadd.f32 %v4901_v23, %v1641_v51 }
 0x308   :  { %v1611_v24 = vpop.f32.mrf.mxu1  ;;  %v1765_v25 = vpop.f32.mrf.mxu0 }
 0x309   :  { %v1804_v44 = vadd.f32 %v1765_v25, %v1640_v53 }
 0x30a   :  { %v4889_v26 = vpop.f32.mrf.mxu1  ;;  %v4904_v27 = vpop.f32.mrf.mxu0 }
 0x30b   :  { %v1807_v18 = vadd.f32 %v4904_v27, %v1643_v52 }
 0x30c   :  { %v1621_v28 = vpop.f32.mrf.mxu1  ;;  %v1775_v29 = vpop.f32.mrf.mxu0  ;;  %v7073_v14 = vld [vmem:[#allocation7_spill] sm:$0xff] }
 0x30d   :  { %v1644_v54 = vadd.f32 %v1621_v28, %v1480_v5  ;;  %v1482_v63 = vadd.f32 %v7073_v14, %v1311_v1 }
 0x30f   :  { %v4892_v30 = vpop.f32.mrf.mxu1  ;;  %v4907_v8 = vpop.f32.mrf.mxu0 }
 0x310   :  { %v1647_v50 = vadd.f32 %v4892_v30, %v1483_v4 }
 0x311   :  { %v6311_v13 = vpop.f32.mrf.mxu1  ;;  %v1785_v31 = vpop.f32.mrf.mxu0 }
 0x312   :  { %7070 = vst [vmem:[#allocation8_spill] sm:$0xff] %v6311_v13  ;;  %v1481_v13 = vadd.f32 %v4871_v17, %v1306_v48  ;;  %v1808_v19 = vadd.f32 %v1785_v31, %v1644_v54 }
 0x314   :  { %v4910_v32 = vpop.f32.mrf.mxu0  ;;  %v4919_v33 = vpop.f32.mrf.mxu1  ;;  %v1645_v41 = vadd.f32 %v4889_v26, %v1481_v13 }
 0x315   :  { %v1970_v58 = vadd.f32 %v4919_v33, %v1805_v9  ;;  %v1811_v21 = vadd.f32 %v4910_v32, %v1647_v50 }
 0x316   :  { %v6313_v6 = vpop.f32.mrf.mxu0  ;;  %v1930_v11 = vpop.f32.mrf.mxu1 }
 0x317   :  { %7071 = vst [vmem:[#allocation9_spill] sm:$0xff] %v6313_v6  ;;  %v1478_v6 = vadd.f32 %v1447_v7, %v1291_v55  ;;  %v1809_v7 = vadd.f32 %v4907_v8, %v1645_v41  ;;  %v1969_v28 = vadd.f32 %v1930_v11, %v1804_v44 }
 0x318   :  { %v4922_v34 = vpop.f32.mrf.mxu1  ;;  %v4937_v35 = vpop.f32.mrf.mxu0 }
 0x319   :  { %v1642_v40 = vadd.f32 %v1611_v24, %v1478_v6  ;;  %v1972_v60 = vadd.f32 %v4922_v34, %v1807_v18  ;;  %v2135_v17 = vadd.f32 %v4937_v35, %v1970_v58  ;;  %v7074_v3 = vld [vmem:[#allocation8_spill] sm:$0xff] }
 0x31a   :  { %v1940_v36 = vpop.f32.mrf.mxu1  ;;  %v6315_v37 = vpop.f32.mrf.mxu0  ;;  %v1646_v20 = vadd.f32 %v7074_v3, %v1482_v63 }
 0x31b   :  { %7072 = vst [vmem:[#allocation10_spill] sm:$0xff] %v6315_v37  ;;  %v1806_v16 = vadd.f32 %v1775_v29, %v1642_v40  ;;  %v2488_v63 = vpop.permute.xlu0 %2487 }
 0x31c   :  { %v4925_v10 = vpop.f32.mrf.mxu1  ;;  %v4940_v15 = vpop.f32.mrf.mxu0 }
 0x31d   :  { %v2137_v22 = vadd.f32 %v4940_v15, %v1972_v60  ;;  %v1971_v9 = vadd.f32 %v1940_v36, %v1806_v16  ;;  %v1974_v26 = vadd.f32 %v4925_v10, %v1809_v7  ;;  %v2483_v16 = vpop.permute.xlu1 %2482 }
 0x31e   :  { %v1950_v38 = vpop.f32.mrf.mxu1  ;;  %v2105_v39 = vpop.f32.mrf.mxu0  ;;  %v7075_v25 = vld [vmem:[#allocation9_spill] sm:$0xff] }
 0x31f   :  { %v1973_v29 = vadd.f32 %v1950_v38, %v1808_v19  ;;  %v2136_v33 = vadd.f32 %v2105_v39, %v1971_v9  ;;  %v1810_v30 = vadd.f32 %v7075_v25, %v1646_v20  ;;  %v2681_v25 = vld [vmem:[%s7059_s5 + $0xa8] sm:$0xff] }
 0x320   :  { %v4928_v42 = vpop.f32.mrf.mxu1  ;;  %v4943_v43 = vpop.f32.mrf.mxu0 }
 0x321   :  { %v2139_v6 = vadd.f32 %v4943_v43, %v1974_v26  ;;  %v1976_v36 = vadd.f32 %v4928_v42, %v1811_v21 }
 0x322   :  { %v1960_v47 = vpop.f32.mrf.mxu1  ;;  %v2115_v12 = vpop.f32.mrf.mxu0  ;;  %v7076_v31 = vld [vmem:[#allocation10_spill] sm:$0xff] }
 0x323   :  { %v2134_v45 = vadd.f32 %v7076_v31, %v1969_v28  ;;  %v2138_v46 = vadd.f32 %v2115_v12, %v1973_v29  ;;  %v1975_v32 = vadd.f32 %v1960_v47, %v1810_v30  ;;  %v7077_v12 = vld [vmem:[#allocation6_spill] sm:$0xff]  ;;  %v2501_v47 = vld [vmem:[%s7059_s5] sm:$0xff] }
 0x324   :  { %v4946_v37 = vpop.f32.mrf.mxu0  ;;  %4999 = vmatprep.mubr.msk.f32.mxu1 %vm5434_vm12, %v7077_v12  ;;  %5018 = vmatprep.mubr.msk.f32.mxu0 %vm5434_vm12, %v7077_v12  ;;  %v2770_v30 = vld [vmem:[%s7059_s5 + $0xf0] sm:$0xff]  ;;  %v2680_v31 = vld [vmem:[%s7059_s5 + $0xa0] sm:$0xff] }
 0x325   :  { %v4955_v49 = vpop.f32.mrf.mxu1  ;;  %v2141_v56 = vadd.f32 %v4946_v37, %v1976_v36  ;;  %5017 = vmatpush3.msra.mxu0 %v2501_v47  ;;  %v2679_v36 = vld [vmem:[%s7059_s5 + $0x98] sm:$0xff]  ;;  %v2854_v47 = vld [vmem:[%s7059_s5 + $0x110] sm:$0xff] }
 0x326   :  { %v2125_v2 = vpop.f32.mrf.mxu0  ;;  %v2300_v27 = vadd.f32 %v4955_v49, %v2135_v17  ;;  %5040 = vmatprep.subr.mxu0 %v7077_v12 }
 0x327   :  { %v2260_v62 = vpop.f32.mrf.mxu1  ;;  %v2140_v57 = vadd.f32 %v2125_v2, %v1975_v32  ;;  %v2676_v32 = vld [vmem:[%s7059_s5 + $0x80] sm:$0xff] }
 0x328   :  { %v4973_v61 = vpop.f32.mrf.mxu0  ;;  %v2299_v11 = vadd.f32 %v2260_v62, %v2134_v45  ;;  %v2769_v45 = vld [vmem:[%s7059_s5 + $0xe8] sm:$0xff] }
 0x329   :  { %v4958_v23 = vpop.f32.mrf.mxu1  ;;  %v2465_v34 = vadd.f32 %v4973_v61, %v2300_v27 }
 0x32a   :  { %v2425_v24 = vpop.f32.mrf.mxu0  ;;  %v2302_v13 = vadd.f32 %v4958_v23, %v2137_v22 }
 0x32b   :  { %v2270_v0 = vpop.f32.mrf.mxu1  ;;  %v2464_v59 = vadd.f32 %v2425_v24, %v2299_v11  ;;  %v2765_v11 = vld [vmem:[%s7059_s5 + $0xc8] sm:$0xff] }
 0x32c   :  { %v4976_v8 = vpop.f32.mrf.mxu0  ;;  %v2301_v55 = vadd.f32 %v2270_v0, %v2136_v33 }
 0x32d   :  { %v4961_v35 = vpop.f32.mrf.mxu1  ;;  %v2467_v15 = vadd.f32 %v4976_v8, %v2302_v13  ;;  %v2683_v8 = vld [vmem:[%s7059_s5 + $0xb8] sm:$0xff] }
 0x32e   :  { %v2435_v10 = vpop.f32.mrf.mxu0  ;;  %v2304_v48 = vadd.f32 %v4961_v35, %v2139_v6  ;;  %v2771_v35 = vld [vmem:[%s7059_s5 + $0xf8] sm:$0xff] }
 0x32f   :  { %v2473_v51 = vmax.f32 %v2465_v34, %v2467_v15  ;;  %v2280_v52 = vpop.f32.mrf.mxu1  ;;  %v2466_v43 = vadd.f32 %v2435_v10, %v2301_v55  ;;  %v2682_v34 = vld [vmem:[%s7059_s5 + $0xb0] sm:$0xff]  ;;  %v2768_v10 = vld [vmem:[%s7059_s5 + $0xe0] sm:$0xff]  ;;  %v2767_v55 = vld [vmem:[%s7059_s5 + $0xd8] sm:$0xff] }
 0x330   :  { %v4979_v38 = vpop.f32.mrf.mxu0  ;;  %v2303_v39 = vadd.f32 %v2280_v52, %v2138_v46  ;;  %v2678_v46 = vld [vmem:[%s7059_s5 + $0x90] sm:$0xff] }
 0x331   :  { %v4964_v18 = vpop.f32.mrf.mxu1  ;;  %v2469_v49 = vadd.f32 %v4979_v38, %v2304_v48  ;;  %v2472_v2 = vmax.f32 %v2464_v59, %v2466_v43  ;;  %v2677_v48 = vld [vmem:[%s7059_s5 + $0x88] sm:$0xff]  ;;  %v2764_v38 = vld [vmem:[%s7059_s5 + $0xc0] sm:$0xff]  ;;  %v2859_v43 = vld [vmem:[%s7059_s5 + $0x138] sm:$0xff] }
 0x332   :  { %v2445_v5 = vpop.f32.mrf.mxu0  ;;  %v2306_v40 = vadd.f32 %v4964_v18, %v2141_v56  ;;  %v2858_v18 = vld [vmem:[%s7059_s5 + $0x130] sm:$0xff]  ;;  %v2857_v59 = vld [vmem:[%s7059_s5 + $0x128] sm:$0xff] }
 0x333   :  { %v2475_v41 = vmax.f32 %v2473_v51, %v2469_v49  ;;  %v2290_v42 = vpop.f32.mrf.mxu1  ;;  %v2468_v58 = vadd.f32 %v2445_v5, %v2303_v39  ;;  %v2766_v51 = vld [vmem:[%s7059_s5 + $0xd0] sm:$0xff] }
 0x334   :  { %v4982_v37 = vpop.f32.mrf.mxu0  ;;  %v2305_v60 = vadd.f32 %v2290_v42, %v2140_v57  ;;  %v2947_v57 = vld [vmem:[%s7059_s5 + $0x178] sm:$0xff]  ;;  %v2946_v5 = vld [vmem:[%s7059_s5 + $0x170] sm:$0xff] }
 0x335   :  { %v2471_v62 = vadd.f32 %v4982_v37, %v2306_v40  ;;  %v2474_v4 = vmax.f32 %v2472_v2, %v2468_v58  ;;  %v2856_v40 = vld [vmem:[%s7059_s5 + $0x120] sm:$0xff]  ;;  %v2855_v42 = vld [vmem:[%s7059_s5 + $0x118] sm:$0xff]  ;;  %v2853_v2 = vld [vmem:[%s7059_s5 + $0x108] sm:$0xff] }
 0x336   :  { %v2455_v1 = vpop.f32.mrf.mxu0  ;;  %v2944_v58 = vld [vmem:[%s7059_s5 + $0x160] sm:$0xff]  ;;  %v2943_v37 = vld [vmem:[%s7059_s5 + $0x158] sm:$0xff] }
 0x337   :  { %v2477_v53 = vmax.f32 %v2475_v41, %v2471_v62  ;;  %v2470_v54 = vadd.f32 %v2455_v1, %v2305_v60  ;;  %v2945_v41 = vld [vmem:[%s7059_s5 + $0x168] sm:$0xff]  ;;  %v2942_v60 = vld [vmem:[%s7059_s5 + $0x150] sm:$0xff]  ;;  %v2852_v62 = vld [vmem:[%s7059_s5 + $0x100] sm:$0xff] }
 0x339   :  { %v2476_v61 = vmax.f32 %v2474_v4, %v2470_v54  ;;  %v2491_v44 = vadd.f32 %v2488_v63, %v2477_v53  ;;  %v2941_v4 = vld [vmem:[%s7059_s5 + $0x148] sm:$0xff]  ;;  %v2940_v53 = vld [vmem:[%s7059_s5 + $0x140] sm:$0xff] }
 0x33a   :  { %v3033_v63 = vld [vmem:[%s7059_s5 + $0x1a8] sm:$0xff] }
 0x33b   :  { %v2490_v7 = vadd.f32 %v2483_v16, %v2476_v61  ;;  %v6353_v24 = vmax.f32 %v2491_v44, 0.0  ;;  %v3035_v16 = vld [vmem:[%s7059_s5 + $0x1b8] sm:$0xff]  ;;  %v3121_v44 = vld [vmem:[%s7059_s5 + $0x1f0] sm:$0xff] }
 0x33d   :  { %v6334_v17 = vmax.f32 %v2490_v7, 0.0  ;;  %v3198_v27 = vrot.slane %v6353_v24, 7  ;;  %v3285_v13 = vrot.slane %v6353_v24, 1  ;;  %v3373_v0 = vrot.slane %v6353_v24, 2  ;;  %v3034_v7 = vld [vmem:[%s7059_s5 + $0x1b0] sm:$0xff] }
 0x33e   :  { %v3461_v3 = vrot.slane %v6353_v24, 3  ;;  %v3549_v20 = vrot.slane %v6353_v24, 4  ;;  %v3637_v21 = vrot.slane %v6353_v24, 5  ;;  %v3725_v28 = vrot.slane %v6353_v24, 6 }
 0x33f   :  { %2511 = vrot.lane.b32.xlu1 %v6334_v17, %s5435_s3  ;;  %v2495_v22 = vrot.slane %v6334_v17, 7  ;;  %v2509_v23 = vrot.slane %v6334_v17, 1  ;;  %v2670_v14 = vrot.slane %v6334_v17, 2  ;;  %v2758_v50 = vrot.slane %v6334_v17, 3 }
 0x340   :  { %v2846_v19 = vrot.slane %v6334_v17, 4  ;;  %v2934_v9 = vrot.slane %v6334_v17, 5  ;;  %v3022_v26 = vrot.slane %v6334_v17, 6 }
 0x341   :  { %2496 = vrot.lane.b32.xlu0 %v2495_v22, %s5435_s3 }
 0x343   :  { %2672 = vrot.lane.b32.xlu1 %v2509_v23, %s5435_s3 }
 0x345   :  { %2760 = vrot.lane.b32.xlu0 %v2670_v14, %s5435_s3 }
 0x347   :  { %2848 = vrot.lane.b32.xlu1 %v2758_v50, %s5435_s3 }
 0x349   :  { %2936 = vrot.lane.b32.xlu0 %v2846_v19, %s5435_s3 }
 0x34b   :  { %3024 = vrot.lane.b32.xlu1 %v2934_v9, %s5435_s3 }
 0x34d   :  { %3111 = vrot.lane.b32.xlu0 %v3022_v26, %s5435_s3 }
 0x34f   :  { %3199 = vrot.lane.b32.xlu1 %v3198_v27, %s5435_s3 }
 0x351   :  { %3287 = vrot.lane.b32.xlu0 %v6353_v24, %s5435_s3 }
 0x353   :  { %3375 = vrot.lane.b32.xlu1 %v3285_v13, %s5435_s3 }
 0x355   :  { %3463 = vrot.lane.b32.xlu0 %v3373_v0, %s5435_s3 }
 0x357   :  { %3551 = vrot.lane.b32.xlu1 %v3461_v3, %s5435_s3 }
 0x359   :  { %3639 = vrot.lane.b32.xlu0 %v3549_v20, %s5435_s3 }
 0x35b   :  { %3727 = vrot.lane.b32.xlu1 %v3637_v21, %s5435_s3 }
 0x35d   :  { %3814 = vrot.lane.b32.xlu0 %v3725_v28, %s5435_s3 }
 0x3b1   :  { %v2512_v29 = vpop.permute.xlu1 %2511 }
 0x3b2   :  { %v2514_v33 = vsel %vm2499_vm13, %v2509_v23, %v2512_v29  ;;  %v3119_v29 = vld [vmem:[%s7059_s5 + $0x1e0] sm:$0xff] }
 0x3b3   :  { %5000 = vmatmul.mubr.msk.f32.vlgmr.msra.gmra.mxu1 %vm2523_vm14, %v2514_v33  ;;  %v2497_v6 = vpop.permute.xlu0 %2496  ;;  %v3118_v33 = vld [vmem:[%s7059_s5 + $0x1d8] sm:$0xff] }
 0x3b4   :  { %5022 = vmatpush3.msra.mxu1 %v2683_v8  ;;  %v2500_v15 = vsel %vm2499_vm13, %v6334_v17, %v2497_v6  ;;  %5037 = vmatprep.mubr.msk.f32.mxu1 %vm5434_vm12, %v7077_v12  ;;  %v3030_v8 = vld [vmem:[%s7059_s5 + $0x190] sm:$0xff]  ;;  %v3029_v6 = vld [vmem:[%s7059_s5 + $0x188] sm:$0xff] }
 0x3b5   :  { %5023 = vmatprep.subr.mxu1 %v7077_v12  ;;  %5019 = vmatmul.mubr.msk.f32.vlgmr.msra.gmra.mxu0 %vm2523_vm14, %v2500_v15  ;;  %v2673_v52 = vpop.permute.xlu1 %2672  ;;  %v3297_v17 = vld [vmem:[%s7059_s5 + $0x270] sm:$0xff] }
 0x3b6   :  { %5024 = vmatpush3.msra.mxu1 %v2682_v34  ;;  %5041 = vmatpush3.msra.mxu0 %v2771_v35  ;;  %v2675_v56 = vsel %vm2499_vm13, %v2670_v14, %v2673_v52  ;;  %v3122_v14 = vld [vmem:[%s7059_s5 + $0x1f8] sm:$0xff]  ;;  %v3117_v34 = vld [vmem:[%s7059_s5 + $0x1d0] sm:$0xff]  ;;  %v3028_v35 = vld [vmem:[%s7059_s5 + $0x180] sm:$0xff] }
 0x3b7   :  { %5025 = vmatprep.subr.mxu1 %v7077_v12  ;;  %5042 = vmatprep.subr.mxu0 %v7077_v12  ;;  %v2761_v39 = vpop.permute.xlu0 %2760  ;;  %v3295_v52 = vld [vmem:[%s7059_s5 + $0x260] sm:$0xff] }
 0x3b8   :  { %5026 = vmatpush3.msra.mxu1 %v2681_v25  ;;  %5043 = vmatpush3.msra.mxu0 %v2770_v30  ;;  %v2763_v49 = vsel %vm2499_vm13, %v2758_v50, %v2761_v39  ;;  %v3032_v50 = vld [vmem:[%s7059_s5 + $0x1a0] sm:$0xff]  ;;  %v3116_v25 = vld [vmem:[%s7059_s5 + $0x1c8] sm:$0xff] }
 0x3b9   :  { %5027 = vmatprep.subr.mxu1 %v7077_v12  ;;  %5044 = vmatprep.subr.mxu0 %v7077_v12  ;;  %v2849_v1 = vpop.permute.xlu1 %2848  ;;  %v3115_v30 = vld [vmem:[%s7059_s5 + $0x1c0] sm:$0xff] }
 0x3ba   :  { %5028 = vmatpush3.msra.mxu1 %v2680_v31  ;;  %5045 = vmatpush3.msra.mxu0 %v2769_v45  ;;  %v2851_v54 = vsel %vm2499_vm13, %v2846_v19, %v2849_v1  ;;  %v3120_v19 = vld [vmem:[%s7059_s5 + $0x1e8] sm:$0xff]  ;;  %v3203_v39 = vld [vmem:[%s7059_s5 + $0x200] sm:$0xff]  ;;  %v3470_v1 = vld [vmem:[%s7059_s5 + $0x2d8] sm:$0xff] }
 0x3bb   :  { %5029 = vmatprep.subr.mxu1 %v7077_v12  ;;  %5046 = vmatprep.subr.mxu0 %v7077_v12  ;;  %v2937_v61 = vpop.permute.xlu0 %2936 }
 0x3bc   :  { %5030 = vmatpush3.msra.mxu1 %v2679_v36  ;;  %5047 = vmatpush3.msra.mxu0 %v2768_v10  ;;  %v2939_v23 = vsel %vm2499_vm13, %v2934_v9, %v2937_v61  ;;  %v3031_v9 = vld [vmem:[%s7059_s5 + $0x198] sm:$0xff] }
 0x3bd   :  { %5031 = vmatprep.subr.mxu1 %v7077_v12  ;;  %5048 = vmatprep.subr.mxu0 %v7077_v12  ;;  %v3025_v15 = vpop.permute.xlu1 %3024  ;;  %v3210_v36 = vld [vmem:[%s7059_s5 + $0x238] sm:$0xff] }
 0x3be   :  { %5032 = vmatpush3.msra.mxu1 %v2678_v46  ;;  %5049 = vmatpush3.msra.mxu0 %v2767_v55  ;;  %v3027_v31 = vsel %vm2499_vm13, %v3022_v26, %v3025_v15  ;;  %v3209_v26 = vld [vmem:[%s7059_s5 + $0x230] sm:$0xff]  ;;  %v3298_v46 = vld [vmem:[%s7059_s5 + $0x278] sm:$0xff]  ;;  %v3208_v55 = vld [vmem:[%s7059_s5 + $0x228] sm:$0xff] }
 0x3bf   :  { %5033 = vmatprep.subr.mxu1 %v7077_v12  ;;  %5050 = vmatprep.subr.mxu0 %v7077_v12  ;;  %v3112_v45 = vpop.permute.xlu0 %3111  ;;  %v3645_v15 = vld [vmem:[%s7059_s5 + $0x350] sm:$0xff] }
 0x3c0   :  { %5034 = vmatpush3.msra.mxu1 %v2677_v48  ;;  %5051 = vmatpush3.msra.mxu0 %v2766_v51  ;;  %v3114_v10 = vsel %vm2499_vm13, %v2495_v22, %v3112_v45  ;;  %v3207_v22 = vld [vmem:[%s7059_s5 + $0x220] sm:$0xff]  ;;  %v3296_v48 = vld [vmem:[%s7059_s5 + $0x268] sm:$0xff]  ;;  %v3206_v51 = vld [vmem:[%s7059_s5 + $0x218] sm:$0xff] }
 0x3c1   :  { %5035 = vmatprep.subr.mxu1 %v7077_v12  ;;  %5052 = vmatprep.subr.mxu0 %v7077_v12  ;;  %v3643_v45 = vld [vmem:[%s7059_s5 + $0x340] sm:$0xff] }
 0x3c2   :  { %5036 = vmatpush3.msra.mxu1 %v2676_v32  ;;  %5053 = vmatpush3.msra.mxu0 %v2765_v11  ;;  %v3205_v32 = vld [vmem:[%s7059_s5 + $0x210] sm:$0xff]  ;;  %v3294_v11 = vld [vmem:[%s7059_s5 + $0x258] sm:$0xff] }
 0x3c3   :  { %5038 = vmatmul.mubr.msk.f32.vlgmr.msra.gmra.mxu1 %vm2523_vm14, %v2675_v56  ;;  %5054 = vmatprep.subr.mxu0 %v7077_v12  ;;  %v3293_v56 = vld [vmem:[%s7059_s5 + $0x250] sm:$0xff] }
 0x3c4   :  { %5059 = vmatprep.subr.mxu1 %v7077_v12  ;;  %5055 = vmatpush3.msra.mxu0 %v2764_v38  ;;  %v3204_v38 = vld [vmem:[%s7059_s5 + $0x208] sm:$0xff] }
 0x3c5   :  { %5056 = vmatprep.mubr.msk.f32.mxu0 %vm5434_vm12, %v7077_v12  ;;  %5060 = vmatpush3.msra.mxu1 %v2859_v43  ;;  %v3200_v43 = vpop.permute.xlu1 %3199 }
 0x3c6   :  { %5057 = vmatmul.mubr.msk.f32.vlgmr.msra.gmra.mxu0 %vm2523_vm14, %v2763_v49  ;;  %5061 = vmatprep.subr.mxu1 %v7077_v12  ;;  %v3291_v49 = vld [vmem:[%s7059_s5 + $0x240] sm:$0xff] }
 0x3c7   :  { %5078 = vmatprep.subr.mxu0 %v7077_v12  ;;  %5062 = vmatpush3.msra.mxu1 %v2858_v18  ;;  %v3292_v18 = vld [vmem:[%s7059_s5 + $0x248] sm:$0xff] }
 0x3c8   :  { %5079 = vmatpush3.msra.mxu0 %v2947_v57  ;;  %5063 = vmatprep.subr.mxu1 %v7077_v12  ;;  %v3202_v57 = vsel %vm2499_vm13, %v6353_v24, %v3200_v43  ;;  %v3923_v24 = vld [vmem:[%s7061_s7 + $0x70] sm:$0xff] }
 0x3c9   :  { %5080 = vmatprep.subr.mxu0 %v7077_v12  ;;  %5064 = vmatpush3.msra.mxu1 %v2857_v59  ;;  %v3288_v59 = vpop.permute.xlu0 %3287  ;;  %v3376_v61 = vpop.permute.xlu1 %3375 }
 0x3ca   :  { %5081 = vmatpush3.msra.mxu0 %v2946_v5  ;;  %5065 = vmatprep.subr.mxu1 %v7077_v12  ;;  %v3386_v5 = vld [vmem:[%s7059_s5 + $0x2b8] sm:$0xff] }
 0x3cb   :  { %5082 = vmatprep.subr.mxu0 %v7077_v12  ;;  %5066 = vmatpush3.msra.mxu1 %v2856_v40  ;;  %v3385_v40 = vld [vmem:[%s7059_s5 + $0x2b0] sm:$0xff] }
 0x3cc   :  { %5083 = vmatpush3.msra.mxu0 %v2945_v41  ;;  %5067 = vmatprep.subr.mxu1 %v7077_v12  ;;  %v3290_v41 = vsel %vm2499_vm13, %v3285_v13, %v3288_v59  ;;  %v3473_v13 = vld [vmem:[%s7059_s5 + $0x2f0] sm:$0xff] }
 0x3cd   :  { %5084 = vmatprep.subr.mxu0 %v7077_v12  ;;  %5068 = vmatpush3.msra.mxu1 %v2855_v42  ;;  %v3474_v42 = vld [vmem:[%s7059_s5 + $0x2f8] sm:$0xff] }
 0x3ce   :  { %5085 = vmatpush3.msra.mxu0 %v2944_v58  ;;  %5069 = vmatprep.subr.mxu1 %v7077_v12  ;;  %v3384_v58 = vld [vmem:[%s7059_s5 + $0x2a8] sm:$0xff] }
 0x3cf   :  { %5086 = vmatprep.subr.mxu0 %v7077_v12  ;;  %5070 = vmatpush3.msra.mxu1 %v2854_v47  ;;  %v3383_v47 = vld [vmem:[%s7059_s5 + $0x2a0] sm:$0xff] }
 0x3d0   :  { %5087 = vmatpush3.msra.mxu0 %v2943_v37  ;;  %5071 = vmatprep.subr.mxu1 %v7077_v12  ;;  %v3472_v37 = vld [vmem:[%s7059_s5 + $0x2e8] sm:$0xff] }
 0x3d1   :  { %5088 = vmatprep.subr.mxu0 %v7077_v12  ;;  %5072 = vmatpush3.msra.mxu1 %v2853_v2  ;;  %v3382_v2 = vld [vmem:[%s7059_s5 + $0x298] sm:$0xff] }
 0x3d2   :  { %5089 = vmatpush3.msra.mxu0 %v2942_v60  ;;  %5073 = vmatprep.subr.mxu1 %v7077_v12  ;;  %v3471_v60 = vld [vmem:[%s7059_s5 + $0x2e0] sm:$0xff] }
 0x3d3   :  { %5090 = vmatprep.subr.mxu0 %v7077_v12  ;;  %5074 = vmatpush3.msra.mxu1 %v2852_v62  ;;  %v3381_v62 = vld [vmem:[%s7059_s5 + $0x290] sm:$0xff] }
 0x3d4   :  { %5075 = vmatprep.mubr.msk.f32.mxu1 %vm5434_vm12, %v7077_v12  ;;  %5091 = vmatpush3.msra.mxu0 %v2941_v4  ;;  %v3380_v4 = vld [vmem:[%s7059_s5 + $0x288] sm:$0xff] }
 0x3d5   :  { %5076 = vmatmul.mubr.msk.f32.vlgmr.msra.gmra.mxu1 %vm2523_vm14, %v2851_v54  ;;  %5092 = vmatprep.subr.mxu0 %v7077_v12  ;;  %v3379_v54 = vld [vmem:[%s7059_s5 + $0x280] sm:$0xff] }
 0x3d6   :  { %5097 = vmatprep.subr.mxu1 %v7077_v12  ;;  %5093 = vmatpush3.msra.mxu0 %v2940_v53  ;;  %v3469_v53 = vld [vmem:[%s7059_s5 + $0x2d0] sm:$0xff] }
 0x3d7   :  { %5094 = vmatprep.mubr.msk.f32.mxu0 %vm5434_vm12, %v7077_v12  ;;  %5098 = vmatpush3.msra.mxu1 %v3035_v16  ;;  %v3468_v16 = vld [vmem:[%s7059_s5 + $0x2c8] sm:$0xff] }
 0x3d8   :  { %5095 = vmatmul.mubr.msk.f32.vlgmr.msra.gmra.mxu0 %vm2523_vm14, %v2939_v23  ;;  %5099 = vmatprep.subr.mxu1 %v7077_v12  ;;  %v3378_v23 = vsel %vm2499_vm13, %v3373_v0, %v3376_v61  ;;  %v3561_v0 = vld [vmem:[%s7059_s5 + $0x330] sm:$0xff] }
 0x3d9   :  { %5116 = vmatprep.subr.mxu0 %v7077_v12  ;;  %5100 = vmatpush3.msra.mxu1 %v3034_v7  ;;  %v3467_v7 = vld [vmem:[%s7059_s5 + $0x2c0] sm:$0xff] }
 0x3da   :  { %5117 = vmatpush3.msra.mxu0 %v3122_v14  ;;  %5101 = vmatprep.subr.mxu1 %v7077_v12  ;;  %v3464_v14 = vpop.permute.xlu0 %3463 }
 0x3db   :  { %5118 = vmatprep.subr.mxu0 %v7077_v12  ;;  %5102 = vmatpush3.msra.mxu1 %v3033_v63  ;;  %v3562_v63 = vld [vmem:[%s7059_s5 + $0x338] sm:$0xff] }
 0x3dc   :  { %5119 = vmatpush3.msra.mxu0 %v3121_v44  ;;  %5103 = vmatprep.subr.mxu1 %v7077_v12  ;;  %v3466_v44 = vsel %vm2499_vm13, %v3461_v3, %v3464_v14  ;;  %v3649_v3 = vld [vmem:[%s7059_s5 + $0x370] sm:$0xff]  ;;  %v4014_v14 = vld [vmem:[%s7063_s9 + $0x48] sm:$0xff] }
 0x3dd   :  { %5120 = vmatprep.subr.mxu0 %v7077_v12  ;;  %5104 = vmatpush3.msra.mxu1 %v3032_v50  ;;  %v3650_v50 = vld [vmem:[%s7059_s5 + $0x378] sm:$0xff] }
 0x3de   :  { %5121 = vmatpush3.msra.mxu0 %v3120_v19  ;;  %5105 = vmatprep.subr.mxu1 %v7077_v12  ;;  %v3560_v19 = vld [vmem:[%s7059_s5 + $0x328] sm:$0xff] }
 0x3df   :  { %5122 = vmatprep.subr.mxu0 %v7077_v12  ;;  %5106 = vmatpush3.msra.mxu1 %v3031_v9  ;;  %v3559_v9 = vld [vmem:[%s7059_s5 + $0x320] sm:$0xff] }
 0x3e0   :  { %5123 = vmatpush3.msra.mxu0 %v3119_v29  ;;  %5107 = vmatprep.subr.mxu1 %v7077_v12  ;;  %v3648_v29 = vld [vmem:[%s7059_s5 + $0x368] sm:$0xff] }
 0x3e1   :  { %5124 = vmatprep.subr.mxu0 %v7077_v12  ;;  %5108 = vmatpush3.msra.mxu1 %v3030_v8  ;;  %v3558_v8 = vld [vmem:[%s7059_s5 + $0x318] sm:$0xff] }
 0x3e2   :  { %5125 = vmatpush3.msra.mxu0 %v3118_v33  ;;  %5109 = vmatprep.subr.mxu1 %v7077_v12  ;;  %v3647_v33 = vld [vmem:[%s7059_s5 + $0x360] sm:$0xff] }
 0x3e3   :  { %5126 = vmatprep.subr.mxu0 %v7077_v12  ;;  %5110 = vmatpush3.msra.mxu1 %v3029_v6  ;;  %v6812_v6 = vld [vmem:[#allocation2 + $0x10] sm:$0xff] }
 0x3e4   :  { %5127 = vmatpush3.msra.mxu0 %v3117_v34  ;;  %5111 = vmatprep.subr.mxu1 %v7077_v12  ;;  %v3557_v34 = vld [vmem:[%s7059_s5 + $0x310] sm:$0xff] }
 0x3e5   :  { %5128 = vmatprep.subr.mxu0 %v7077_v12  ;;  %5112 = vmatpush3.msra.mxu1 %v3028_v35  ;;  %v3556_v35 = vld [vmem:[%s7059_s5 + $0x308] sm:$0xff] }
 0x3e6   :  { %5113 = vmatprep.mubr.msk.f32.mxu1 %vm5434_vm12, %v7077_v12  ;;  %5129 = vmatpush3.msra.mxu0 %v3116_v25  ;;  %v3555_v25 = vld [vmem:[%s7059_s5 + $0x300] sm:$0xff] }
 0x3e7   :  { %5114 = vmatmul.mubr.msk.f32.vlgmr.msra.gmra.mxu1 %vm2523_vm14, %v3027_v31  ;;  %5130 = vmatprep.subr.mxu0 %v7077_v12  ;;  %v3644_v31 = vld [vmem:[%s7059_s5 + $0x348] sm:$0xff] }
 0x3e8   :  { %5135 = vmatprep.subr.mxu1 %v7077_v12  ;;  %5131 = vmatpush3.msra.mxu0 %v3115_v30  ;;  %v3552_v30 = vpop.permute.xlu1 %3551 }
 0x3e9   :  { %5132 = vmatprep.mubr.msk.f32.mxu0 %vm5434_vm12, %v7077_v12  ;;  %5136 = vmatpush3.msra.mxu1 %v3210_v36  ;;  %v3554_v36 = vsel %vm2499_vm13, %v3549_v20, %v3552_v30  ;;  %v3737_v20 = vld [vmem:[%s7059_s5 + $0x3b0] sm:$0xff] }
 0x3ea   :  { %5133 = vmatmul.mubr.msk.f32.vlgmr.msra.gmra.mxu0 %vm2523_vm14, %v3114_v10  ;;  %5137 = vmatprep.subr.mxu1 %v7077_v12  ;;  %v3738_v10 = vld [vmem:[%s7059_s5 + $0x3b8] sm:$0xff] }
 0x3eb   :  { %5154 = vmatprep.subr.mxu0 %v7077_v12  ;;  %5138 = vmatpush3.msra.mxu1 %v3209_v26  ;;  %v3640_v26 = vpop.permute.xlu0 %3639 }
 0x3ec   :  { %5155 = vmatpush3.msra.mxu0 %v3298_v46  ;;  %5139 = vmatprep.subr.mxu1 %v7077_v12  ;;  %v3642_v46 = vsel %vm2499_vm13, %v3637_v21, %v3640_v26  ;;  %v3824_v21 = vld [vmem:[%s7059_s5 + $0x3f0] sm:$0xff]  ;;  %v3728_v43 = vpop.permute.xlu1 %3727 }
 0x3ed   :  { %5156 = vmatprep.subr.mxu0 %v7077_v12  ;;  %5140 = vmatpush3.msra.mxu1 %v3208_v55  ;;  %v3825_v55 = vld [vmem:[%s7059_s5 + $0x3f8] sm:$0xff]  ;;  %v3730_v59 = vsel %vm2499_vm13, %v3725_v28, %v3728_v43  ;;  %v3921_v28 = vld [vmem:[%s7061_s7 + $0x60] sm:$0xff] }
 0x3ee   :  { %5157 = vmatpush3.msra.mxu0 %v3297_v17  ;;  %5141 = vmatprep.subr.mxu1 %v7077_v12  ;;  %v3736_v17 = vld [vmem:[%s7059_s5 + $0x3a8] sm:$0xff] }
 0x3ef   :  { %5158 = vmatprep.subr.mxu0 %v7077_v12  ;;  %5142 = vmatpush3.msra.mxu1 %v3207_v22  ;;  %v3735_v22 = vld [vmem:[%s7059_s5 + $0x3a0] sm:$0xff] }
 0x3f0   :  { %5159 = vmatpush3.msra.mxu0 %v3296_v48  ;;  %5143 = vmatprep.subr.mxu1 %v7077_v12  ;;  %v3823_v48 = vld [vmem:[%s7059_s5 + $0x3e8] sm:$0xff] }
 0x3f1   :  { %5160 = vmatprep.subr.mxu0 %v7077_v12  ;;  %5144 = vmatpush3.msra.mxu1 %v3206_v51  ;;  %v3734_v51 = vld [vmem:[%s7059_s5 + $0x398] sm:$0xff] }
 0x3f2   :  { %5161 = vmatpush3.msra.mxu0 %v3295_v52  ;;  %5145 = vmatprep.subr.mxu1 %v7077_v12  ;;  %v3822_v52 = vld [vmem:[%s7059_s5 + $0x3e0] sm:$0xff] }
 0x3f3   :  { %5162 = vmatprep.subr.mxu0 %v7077_v12  ;;  %5146 = vmatpush3.msra.mxu1 %v3205_v32  ;;  %v3733_v32 = vld [vmem:[%s7059_s5 + $0x390] sm:$0xff] }
 0x3f4   :  { %5163 = vmatpush3.msra.mxu0 %v3294_v11  ;;  %5147 = vmatprep.subr.mxu1 %v7077_v12  ;;  %v3821_v11 = vld [vmem:[%s7059_s5 + $0x3d8] sm:$0xff] }
 0x3f5   :  { %5164 = vmatprep.subr.mxu0 %v7077_v12  ;;  %5148 = vmatpush3.msra.mxu1 %v3204_v38  ;;  %v3732_v38 = vld [vmem:[%s7059_s5 + $0x388] sm:$0xff] }
 0x3f6   :  { %5165 = vmatpush3.msra.mxu0 %v3293_v56  ;;  %5149 = vmatprep.subr.mxu1 %v7077_v12  ;;  %v3820_v56 = vld [vmem:[%s7059_s5 + $0x3d0] sm:$0xff] }
 0x3f7   :  { %5166 = vmatprep.subr.mxu0 %v7077_v12  ;;  %5150 = vmatpush3.msra.mxu1 %v3203_v39  ;;  %v3731_v39 = vld [vmem:[%s7059_s5 + $0x380] sm:$0xff] }
 0x3f8   :  { %5151 = vmatprep.mubr.msk.f32.mxu1 %vm5434_vm12, %v7077_v12  ;;  %5167 = vmatpush3.msra.mxu0 %v3292_v18  ;;  %v3819_v18 = vld [vmem:[%s7059_s5 + $0x3c8] sm:$0xff] }
 0x3f9   :  { %5152 = vmatmul.mubr.msk.f32.vlgmr.msra.gmra.mxu1 %vm2523_vm14, %v3202_v57  ;;  %5168 = vmatprep.subr.mxu0 %v7077_v12  ;;  %v3818_v57 = vld [vmem:[%s7059_s5 + $0x3c0] sm:$0xff] }
 0x3fa   :  { %5173 = vmatprep.subr.mxu1 %v7077_v12  ;;  %5169 = vmatpush3.msra.mxu0 %v3291_v49  ;;  %v3815_v49 = vpop.permute.xlu0 %3814 }
 0x3fb   :  { %5170 = vmatprep.mubr.msk.f32.mxu0 %vm5434_vm12, %v7077_v12  ;;  %5174 = vmatpush3.msra.mxu1 %v3386_v5  ;;  %v3817_v5 = vsel %vm2499_vm13, %v3198_v27, %v3815_v49  ;;  %v3922_v27 = vld [vmem:[%s7061_s7 + $0x68] sm:$0xff] }
 0x3fc   :  { %5171 = vmatmul.mubr.msk.f32.vlgmr.msra.gmra.mxu0 %vm2523_vm14, %v3290_v41  ;;  %5175 = vmatprep.subr.mxu1 %v7077_v12  ;;  %v3919_v41 = vld [vmem:[%s7061_s7 + $0x50] sm:$0xff] }
 0x3fd   :  { %5192 = vmatprep.subr.mxu0 %v7077_v12  ;;  %5176 = vmatpush3.msra.mxu1 %v3385_v40  ;;  %v3920_v40 = vld [vmem:[%s7061_s7 + $0x58] sm:$0xff] }
 0x3fe   :  { %5193 = vmatpush3.msra.mxu0 %v3474_v42  ;;  %5177 = vmatprep.subr.mxu1 %v7077_v12  ;;  %v3918_v42 = vld [vmem:[%s7061_s7 + $0x48] sm:$0xff] }
 0x3ff   :  { %5194 = vmatprep.subr.mxu0 %v7077_v12  ;;  %5178 = vmatpush3.msra.mxu1 %v3384_v58  ;;  %v3917_v58 = vld [vmem:[%s7061_s7 + $0x40] sm:$0xff] }
 0x400   :  { %5195 = vmatpush3.msra.mxu0 %v3473_v13  ;;  %5179 = vmatprep.subr.mxu1 %v7077_v12  ;;  %v3916_v13 = vld [vmem:[%s7061_s7 + $0x38] sm:$0xff] }
 0x401   :  { %5196 = vmatprep.subr.mxu0 %v7077_v12  ;;  %5180 = vmatpush3.msra.mxu1 %v3383_v47  ;;  %v3915_v47 = vld [vmem:[%s7061_s7 + $0x30] sm:$0xff] }
 0x402   :  { %5197 = vmatpush3.msra.mxu0 %v3472_v37  ;;  %5181 = vmatprep.subr.mxu1 %v7077_v12  ;;  %v3914_v37 = vld [vmem:[%s7061_s7 + $0x28] sm:$0xff] }
 0x403   :  { %5198 = vmatprep.subr.mxu0 %v7077_v12  ;;  %5182 = vmatpush3.msra.mxu1 %v3382_v2  ;;  %v3913_v2 = vld [vmem:[%s7061_s7 + $0x20] sm:$0xff] }
 0x404   :  { %5199 = vmatpush3.msra.mxu0 %v3471_v60  ;;  %5183 = vmatprep.subr.mxu1 %v7077_v12  ;;  %v3912_v60 = vld [vmem:[%s7061_s7 + $0x18] sm:$0xff] }
 0x405   :  { %5200 = vmatprep.subr.mxu0 %v7077_v12  ;;  %5184 = vmatpush3.msra.mxu1 %v3381_v62  ;;  %v3911_v62 = vld [vmem:[%s7061_s7 + $0x10] sm:$0xff] }
 0x406   :  { %5201 = vmatpush3.msra.mxu0 %v3470_v1  ;;  %5185 = vmatprep.subr.mxu1 %v7077_v12 }
 0x407   :  { %5202 = vmatprep.subr.mxu0 %v7077_v12  ;;  %5186 = vmatpush3.msra.mxu1 %v3380_v4  ;;  %v3910_v4 = vld [vmem:[%s7061_s7 + $0x8] sm:$0xff] }
 0x408   :  { %5203 = vmatpush3.msra.mxu0 %v3469_v53  ;;  %5187 = vmatprep.subr.mxu1 %v7077_v12 }
 0x409   :  { %5204 = vmatprep.subr.mxu0 %v7077_v12  ;;  %5188 = vmatpush3.msra.mxu1 %v3379_v54 }
 0x40a   :  { %5189 = vmatprep.mubr.msk.f32.mxu1 %vm5434_vm12, %v7077_v12  ;;  %5205 = vmatpush3.msra.mxu0 %v3468_v16  ;;  %v3909_v16 = vld [vmem:[%s7061_s7] sm:$0xff] }
 0x40b   :  { %5190 = vmatmul.mubr.msk.f32.vlgmr.msra.gmra.mxu1 %vm2523_vm14, %v3378_v23  ;;  %5206 = vmatprep.subr.mxu0 %v7077_v12  ;;  %v4015_v23 = vld [vmem:[%s7063_s9 + $0x50] sm:$0xf] }
 0x40c   :  { %5211 = vmatprep.subr.mxu1 %v7077_v12  ;;  %5207 = vmatpush3.msra.mxu0 %v3467_v7 }
 0x40d   :  { %5208 = vmatprep.mubr.msk.f32.mxu0 %vm5434_vm12, %v7077_v12  ;;  %5212 = vmatpush3.msra.mxu1 %v3562_v63  ;;  %v4013_v63 = vld [vmem:[%s7063_s9 + $0x40] sm:$0xff] }
 0x40e   :  { %5209 = vmatmul.mubr.msk.f32.vlgmr.msra.gmra.mxu0 %vm2523_vm14, %v3466_v44  ;;  %5213 = vmatprep.subr.mxu1 %v7077_v12  ;;  %v4011_v44 = vld [vmem:[%s7063_s9 + $0x30] sm:$0xff] }
 0x40f   :  { %5230 = vmatprep.subr.mxu0 %v7077_v12  ;;  %5214 = vmatpush3.msra.mxu1 %v3561_v0  ;;  %v4012_v0 = vld [vmem:[%s7063_s9 + $0x38] sm:$0xff] }
 0x410   :  { %5231 = vmatpush3.msra.mxu0 %v3650_v50  ;;  %5215 = vmatprep.subr.mxu1 %v7077_v12  ;;  %v4010_v50 = vld [vmem:[%s7063_s9 + $0x28] sm:$0xff] }
 0x411   :  { %5232 = vmatprep.subr.mxu0 %v7077_v12  ;;  %5216 = vmatpush3.msra.mxu1 %v3560_v19  ;;  %v4009_v19 = vld [vmem:[%s7063_s9 + $0x20] sm:$0xff] }
 0x412   :  { %5233 = vmatpush3.msra.mxu0 %v3649_v3  ;;  %5217 = vmatprep.subr.mxu1 %v7077_v12 }
 0x413   :  { %5234 = vmatprep.subr.mxu0 %v7077_v12  ;;  %5218 = vmatpush3.msra.mxu1 %v3559_v9  ;;  %v3646_v12 = vld [vmem:[%s7059_s5 + $0x358] sm:$0xff] }
 0x414   :  { %5235 = vmatpush3.msra.mxu0 %v3648_v29  ;;  %5219 = vmatprep.subr.mxu1 %v6812_v6  ;;  %v4008_v29 = vld [vmem:[%s7063_s9 + $0x18] sm:$0xff] }
 0x415   :  { %5236 = vmatprep.subr.mxu0 %v6812_v6  ;;  %5220 = vmatpush3.msra.mxu1 %v3558_v8 }
 0x416   :  { %5237 = vmatpush3.msra.mxu0 %v3647_v33  ;;  %5221 = vmatprep.subr.mxu1 %v6812_v6 }
 0x417   :  { %5238 = vmatprep.subr.mxu0 %v6812_v6  ;;  %5222 = vmatpush3.msra.mxu1 %v3557_v34 }
 0x418   :  { %5239 = vmatpush3.msra.mxu0 %v3646_v12  ;;  %5223 = vmatprep.subr.mxu1 %v6812_v6 }
 0x419   :  { %5240 = vmatprep.subr.mxu0 %v6812_v6  ;;  %5224 = vmatpush3.msra.mxu1 %v3556_v35 }
 0x41a   :  { %5241 = vmatpush3.msra.mxu0 %v3645_v15  ;;  %5225 = vmatprep.subr.mxu1 %v6812_v6 }
 0x41b   :  { %5242 = vmatprep.subr.mxu0 %v6812_v6  ;;  %5226 = vmatpush3.msra.mxu1 %v3555_v25 }
 0x41c   :  { %5227 = vmatprep.mubr.msk.f32.mxu1 %vm5434_vm12, %v6812_v6  ;;  %5243 = vmatpush3.msra.mxu0 %v3644_v31 }
 0x41d   :  { %5228 = vmatmul.mubr.msk.f32.vlgmr.msra.gmra.mxu1 %vm2523_vm14, %v3554_v36  ;;  %5244 = vmatprep.subr.mxu0 %v6812_v6 }
 0x41e   :  { %5249 = vmatprep.subr.mxu1 %v6812_v6  ;;  %5245 = vmatpush3.msra.mxu0 %v3643_v45 }
 0x41f   :  { %5246 = vmatprep.mubr.msk.f32.mxu0 %vm5434_vm12, %v6812_v6  ;;  %5250 = vmatpush3.msra.mxu1 %v3738_v10 }
 0x420   :  { %5247 = vmatmul.mubr.msk.f32.vlgmr.msra.gmra.mxu0 %vm2523_vm14, %v3642_v46  ;;  %5251 = vmatprep.subr.mxu1 %v6812_v6 }
 0x421   :  { %5268 = vmatprep.subr.mxu0 %v6812_v6  ;;  %5252 = vmatpush3.msra.mxu1 %v3737_v20 }
 0x422   :  { %5269 = vmatpush3.msra.mxu0 %v3825_v55  ;;  %5253 = vmatprep.subr.mxu1 %v6812_v6 }
 0x423   :  { %5270 = vmatprep.subr.mxu0 %v6812_v6  ;;  %5254 = vmatpush3.msra.mxu1 %v3736_v17 }
 0x424   :  { %5271 = vmatpush3.msra.mxu0 %v3824_v21  ;;  %5255 = vmatprep.subr.mxu1 %v6812_v6 }
 0x425   :  { %5272 = vmatprep.subr.mxu0 %v6812_v6  ;;  %5256 = vmatpush3.msra.mxu1 %v3735_v22 }
 0x426   :  { %5273 = vmatpush3.msra.mxu0 %v3823_v48  ;;  %5257 = vmatprep.subr.mxu1 %v6812_v6 }
 0x427   :  { %5274 = vmatprep.subr.mxu0 %v6812_v6  ;;  %5258 = vmatpush3.msra.mxu1 %v3734_v51 }
 0x428   :  { %5275 = vmatpush3.msra.mxu0 %v3822_v52  ;;  %5259 = vmatprep.subr.mxu1 %v6812_v6 }
 0x429   :  { %5276 = vmatprep.subr.mxu0 %v6812_v6  ;;  %5260 = vmatpush3.msra.mxu1 %v3733_v32 }
 0x42a   :  { %5277 = vmatpush3.msra.mxu0 %v3821_v11  ;;  %5261 = vmatprep.subr.mxu1 %v6812_v6 }
 0x42b   :  { %5278 = vmatprep.subr.mxu0 %v6812_v6  ;;  %5262 = vmatpush3.msra.mxu1 %v3732_v38 }
 0x42c   :  { %5279 = vmatpush3.msra.mxu0 %v3820_v56  ;;  %5263 = vmatprep.subr.mxu1 %v6812_v6 }
 0x42d   :  { %5280 = vmatprep.subr.mxu0 %v6812_v6  ;;  %5264 = vmatpush3.msra.mxu1 %v3731_v39 }
 0x42e   :  { %5265 = vmatprep.mubr.msk.f32.mxu1 %vm5434_vm12, %v6812_v6  ;;  %5281 = vmatpush3.msra.mxu0 %v3819_v18 }
 0x42f   :  { %5266 = vmatmul.mubr.msk.f32.vlgmr.msra.gmra.mxu1 %vm2523_vm14, %v3730_v59  ;;  %5282 = vmatprep.subr.mxu0 %v6812_v6 }
 0x430   :  { %5283 = vmatpush3.msra.mxu0 %v3818_v57  ;;  %5284 = vmatprep.mubr.msk.f32.mxu0 %vm5434_vm12, %v6812_v6 }
 0x431   :  { %5285 = vmatmul.mubr.msk.f32.vlgmr.msra.gmra.mxu0 %vm2523_vm14, %v3817_v5  ;;  %5287 = vmatprep.subr.mxu1 %v6812_v6 }
 0x432   :  { %5317 = vmatprep.mubr.msk.f32.mxu1 %vm5434_vm12, %v6812_v6  ;;  %5320 = vmatprep.subr.mxu0 %v6812_v6 }
 0x433   :  { %5342 = vmatprep.mubr.msk.f32.mxu0 %vm5434_vm12, %v6812_v6  ;;  %5288 = vmatpush3.msra.mxu1 %v3923_v24 }
 0x434   :  { %5289 = vmatprep.subr.mxu1 %v6812_v6  ;;  %5321 = vmatpush3.msk.msra.mxu0 %vm909_vm5, %v4015_v23 }
 0x435   :  { %5290 = vmatpush3.msra.mxu1 %v3922_v27  ;;  %5322 = vmatprep.subr.mxu0 %v6812_v6 }
 0x436   :  { %5291 = vmatprep.subr.mxu1 %v6812_v6  ;;  %5323 = vmatpush3.msra.mxu0 %v4014_v14 }
 0x437   :  { %5292 = vmatpush3.msra.mxu1 %v3921_v28  ;;  %5324 = vmatprep.subr.mxu0 %v6812_v6 }
 0x438   :  { %5293 = vmatprep.subr.mxu1 %v6812_v6  ;;  %5325 = vmatpush3.msra.mxu0 %v4013_v63 }
 0x439   :  { %5294 = vmatpush3.msra.mxu1 %v3920_v40  ;;  %5326 = vmatprep.subr.mxu0 %v6812_v6 }
 0x43a   :  { %5295 = vmatprep.subr.mxu1 %v6812_v6  ;;  %5327 = vmatpush3.msra.mxu0 %v4012_v0 }
 0x43b   :  { %5296 = vmatpush3.msra.mxu1 %v3919_v41  ;;  %5328 = vmatprep.subr.mxu0 %v6812_v6 }
 0x43c   :  { %5297 = vmatprep.subr.mxu1 %v6812_v6  ;;  %5329 = vmatpush3.msra.mxu0 %v4011_v44 }
 0x43d   :  { %5298 = vmatpush3.msra.mxu1 %v3918_v42  ;;  %5330 = vmatprep.subr.mxu0 %v6812_v6  ;;  %v4352_v42 = vld [vmem:[%s7060_s6] ss:$0 sm:$0xff] }
 0x43e   :  { %5299 = vmatprep.subr.mxu1 %v6812_v6  ;;  %5331 = vmatpush3.msra.mxu0 %v4010_v50 }
 0x43f   :  { %5300 = vmatpush3.msra.mxu1 %v3917_v58  ;;  %5332 = vmatprep.subr.mxu0 %v6812_v6 }
 0x440   :  { %5301 = vmatprep.subr.mxu1 %v6812_v6  ;;  %5333 = vmatpush3.msra.mxu0 %v4009_v19 }
 0x441   :  { %5302 = vmatpush3.msra.mxu1 %v3916_v13  ;;  %5334 = vmatprep.subr.mxu0 %v6812_v6 }
 0x442   :  { %5303 = vmatprep.subr.mxu1 %v6812_v6  ;;  %5335 = vmatpush3.msra.mxu0 %v4008_v29 }
 0x443   :  { %5304 = vmatpush3.msra.mxu1 %v3915_v47  ;;  %5336 = vmatprep.subr.mxu0 %v6812_v6 }
 0x444   :  { %5305 = vmatprep.subr.mxu1 %v6812_v6 }
 0x445   :  { %5306 = vmatpush3.msra.mxu1 %v3914_v37 }
 0x446   :  { %5307 = vmatprep.subr.mxu1 %v6812_v6 }
 0x447   :  { %5308 = vmatpush3.msra.mxu1 %v3913_v2  ;;  %v4007_v2 = vld [vmem:[%s7063_s9 + $0x10] sm:$0xff] }
 0x448   :  { %5309 = vmatprep.subr.mxu1 %v6812_v6  ;;  %5337 = vmatpush3.msra.mxu0 %v4007_v2 }
 0x449   :  { %5310 = vmatpush3.msra.mxu1 %v3912_v60  ;;  %5338 = vmatprep.subr.mxu0 %v6812_v6  ;;  %v4006_v60 = vld [vmem:[%s7063_s9 + $0x8] sm:$0xff] }
 0x44a   :  { %5311 = vmatprep.subr.mxu1 %v6812_v6  ;;  %5339 = vmatpush3.msra.mxu0 %v4006_v60 }
 0x44b   :  { %5312 = vmatpush3.msra.mxu1 %v3911_v62  ;;  %5340 = vmatprep.subr.mxu0 %v6812_v6  ;;  %v4005_v62 = vld [vmem:[%s7063_s9] sm:$0xff]  ;;  %s5402_s9 = scalar_lea.vmem %s4109_s15, 32 }
 0x44c   :  { %5313 = vmatprep.subr.mxu1 %v6812_v6  ;;  %5341 = vmatpush3.msra.mxu0 %v4005_v62  ;;  %p5403_p0 = scmp.ne.s32.totalorder %s4109_s15, %s5402_s9  ;;  %p5408_p2 = scmp.lt.s32.totalorder %s5402_s9, %s5402_s9 }
 0x44d   :  { %5314 = vmatpush3.msra.mxu1 %v3910_v4 }
 0x44e   :  { %5315 = vmatprep.subr.mxu1 %v6812_v6  ;;  %p5409_p3 = por %p5408_p2, %p5407_p1 }
 0x44f   :  { %5316 = vmatpush3.msra.mxu1 %v3909_v16  ;;  %v4355_v16 = vld [vmem:[%s7064_s10] ss:$0 sm:$0xff] }
 0x450   :  { %p5410_p4 = pnand %p5409_p3, %p5403_p0 }
 0x473   :  { %v2593_v1 = vpop.f32.mrf.mxu1 }
 0x475   :  { %v5001_v53 = vpop.f32.mrf.mxu1  ;;  %v2666_v54 = vpop.f32.mrf.mxu0 }
 0x476   :  { %v2667_v61 = vadd.f32 %v2666_v54, %v2593_v1  ;;  %v4353_v1 = vld [vmem:[%s7062_s8] ss:$0 sm:$0xff] }
 0x477   :  { %v5020_v7 = vpop.f32.mrf.mxu0 }
 0x483   :  { %v2753_v3 = vpop.f32.mrf.mxu1 }
 0x484   :  { %v2757_v9 = vadd.f32 %v2753_v3, %v2667_v61 }
 0x485   :  { %v5039_v8 = vpop.f32.mrf.mxu1 }
 0x486   :  { %v2841_v33 = vpop.f32.mrf.mxu0 }
 0x487   :  { %v2845_v34 = vadd.f32 %v2841_v33, %v2757_v9 }
 0x488   :  { %v5058_v12 = vpop.f32.mrf.mxu0 }
 0x495   :  { %v2929_v35 = vpop.f32.mrf.mxu1 }
 0x496   :  { %v2933_v15 = vadd.f32 %v2929_v35, %v2845_v34 }
 0x497   :  { %v5077_v25 = vpop.f32.mrf.mxu1 }
 0x498   :  { %v3017_v30 = vpop.f32.mrf.mxu0 }
 0x499   :  { %v3021_v31 = vadd.f32 %v3017_v30, %v2933_v15 }
 0x49a   :  { %v5096_v45 = vpop.f32.mrf.mxu0 }
 0x4a7   :  { %v3105_v36 = vpop.f32.mrf.mxu1 }
 0x4a8   :  { %v3109_v32 = vadd.f32 %v3105_v36, %v3021_v31 }
 0x4a9   :  { %v5115_v26 = vpop.f32.mrf.mxu1 }
 0x4aa   :  { %v3192_v10 = vpop.f32.mrf.mxu0 }
 0x4ab   :  { %v3196_v11 = vadd.f32 %v3192_v10, %v3109_v32 }
 0x4ac   :  { %v5134_v20 = vpop.f32.mrf.mxu0 }
 0x4b9   :  { %v3280_v46 = vpop.f32.mrf.mxu1 }
 0x4ba   :  { %v3284_v56 = vadd.f32 %v3280_v46, %v3196_v11 }
 0x4bb   :  { %v5153_v55 = vpop.f32.mrf.mxu1 }
 0x4bc   :  { %v3368_v17 = vpop.f32.mrf.mxu0 }
 0x4bd   :  { %v3372_v18 = vadd.f32 %v3368_v17, %v3284_v56 }
 0x4be   :  { %v5172_v21 = vpop.f32.mrf.mxu0 }
 0x4cb   :  { %v3456_v22 = vpop.f32.mrf.mxu1 }
 0x4cc   :  { %v3460_v57 = vadd.f32 %v3456_v22, %v3372_v18 }
 0x4cd   :  { %v5191_v48 = vpop.f32.mrf.mxu1 }
 0x4ce   :  { %v3544_v51 = vpop.f32.mrf.mxu0 }
 0x4cf   :  { %v3548_v59 = vadd.f32 %v3544_v51, %v3460_v57 }
 0x4d0   :  { %v5210_v52 = vpop.f32.mrf.mxu0 }
 0x4dd   :  { %v3632_v38 = vpop.f32.mrf.mxu1 }
 0x4de   :  { %v3636_v5 = vadd.f32 %v3632_v38, %v3548_v59 }
 0x4df   :  { %v5229_v39 = vpop.f32.mrf.mxu1 }
 0x4e0   :  { %v3720_v43 = vpop.f32.mrf.mxu0 }
 0x4e1   :  { %v3724_v24 = vadd.f32 %v3720_v43, %v3636_v5 }
 0x4e2   :  { %v5248_v49 = vpop.f32.mrf.mxu0 }
 0x4ef   :  { %v3808_v27 = vpop.f32.mrf.mxu1 }
 0x4f0   :  { %v3812_v28 = vadd.f32 %v3808_v27, %v3724_v24 }
 0x4f1   :  { %v5267_v40 = vpop.f32.mrf.mxu1  ;;  %v3895_v41 = vpop.f32.mrf.mxu0 }
 0x4f2   :  { %v3899_v58 = vadd.f32 %v3895_v41, %v3812_v28 }
 0x4f3   :  { %v5286_v13 = vpop.f32.mrf.mxu0 }
 0x4f4   :  { %v3907_v47 = vadd.f32 %v4352_v42, %v3899_v58 }
 0x4f6   :  { %v3908_v37 = vmax.f32 %v3907_v47, 0.0 }
 0x4f8   :  { %5318 = vmatmul.mubr.msk.f32.vlgmr.msra.gmra.mxu1 %vm485_vm2, %v3908_v37 }
 0x5b8   :  { %v4000_v4 = vpop.f32.mrf.mxu1 }
 0x5b9   :  { %v4001_v53 = vadd.f32 %v4353_v1, %v4000_v4 }
 0x5ba   :  { %v5319_v54 = vpop.f32.mrf.mxu1 }
 0x5bb   :  { %v4004_v61 = vmax.f32 %v4001_v53, 0.0 }
 0x5bd   :  { %5343 = vmatmul.mubr.msk.f32.vlgmr.msra.gmra.mxu0 %vm4023_vm15, %v4004_v61 }
 0x67d   :  { %v4096_v6 = vpop.f32.mrf.mxu0 }
 0x67e   :  { %v4097_v7 = vadd.f32 %v4355_v16, %v4096_v6 }
 0x67f   :  { %v5344_v23 = vpop.f32.mrf.mxu0 }
 0x680   :  { %4101 = vst.msk [vmem:[#allocation3] sm:$0x3] %vm4100_vm0, %v4097_v7 }
 0x681   :  { %5413 = shalt.err (!%p5410_p4)
}
 0x682   :  { %4111 = dma.vmem_to_hbm [thread:$0]  %s4109_s15, 32, %s7065_s11, [#allocation4]  }
 0x683   :  { %5422 = dma.done.wait [#allocation4], 32  }
 0x684   :  { %5423 = vsyncadd [#allocation4], 4294967264 }
 0x685   :  { %4115 = vsyncpa [#allocation4], 1 }

</bundles_post_ra>
